<compile_context>
chip_gen: v5e
topology: v5e:2x2
jax: 0.10.0
libtpu: 0.0.40
codegen_flags: <defaults>
</compile_context>

<pallas_src>
import jax
import jax.numpy as jnp
from jax import lax
from jax.experimental import pallas as pl
from jax.experimental.pallas import tpu as pltpu


def _clstm_kernel(x_ref, wih_ref, whh_ref, b_ref, lw_ref, lb_ref,
                  pred_ref, hn_ref, cn_ref,
                  h_scr, c_scr, zx_scr, hseq_scr):
    """One grid step == one chunk of T_chunk timesteps for ALL p networks."""
    TC, B, G4 = zx_scr.shape          # G4 = 4 * P * H  (gate-major fused)
    PH = h_scr.shape[1]               # P * H

    # Initialize the fused hidden/cell state once (persists across chunks).
    @pl.when(pl.program_id(0) == 0)
    def _init():
        h_scr[...] = jnp.zeros_like(h_scr)
        c_scr[...] = jnp.zeros_like(c_scr)

    # (1) Time-parallel input projection, hoisted out of the recurrence:
    #     one lane-dense MXU matmul for the whole chunk, bias folded in.
    zx = (jnp.dot(x_ref[...], wih_ref[...],
                  preferred_element_type=jnp.float32) + b_ref[...])
    zx_scr[...] = zx.reshape(TC, B, G4)

    # (2) Serial recurrence: only h @ W_hh (block-diagonal over the P nets,
    #     gate-major columns) remains on the per-timestep critical path.
    def step(t, carry):
        h = h_scr[...]
        c = c_scr[...]
        z = zx_scr[t] + jnp.dot(h, whh_ref[...],
                                preferred_element_type=jnp.float32)  # (B, 4PH)
        i_g = jax.nn.sigmoid(z[:, 0 * PH:1 * PH])
        f_g = jax.nn.sigmoid(z[:, 1 * PH:2 * PH])
        g_g = jnp.tanh(z[:, 2 * PH:3 * PH])
        o_g = jax.nn.sigmoid(z[:, 3 * PH:4 * PH])
        c_new = f_g * c + i_g * g_g
        h_new = o_g * jnp.tanh(c_new)
        c_scr[...] = c_new
        h_scr[...] = h_new
        hseq_scr[t] = h_new
        return carry

    lax.fori_loop(0, TC, step, (), unroll=(TC <= 32))

    # (3) Deferred 1x1 Conv1d: one (TC*B, P*H) @ (P*H, P) matmul per chunk
    #     instead of T*P per-step cross-lane reductions.
    hs = hseq_scr[...].reshape(TC * B, PH)
    pred_ref[...] = (jnp.dot(hs, lw_ref[...],
                             preferred_element_type=jnp.float32) + lb_ref[...])

    # Final fused hidden/cell state (resident output block; last chunk wins).
    hn_ref[...] = h_scr[...]
    cn_ref[...] = c_scr[...]


def clstm_forward(X, params, t_chunk=None):
    """Pallas cLSTM forward.

    X: (B, T, P) float32.
    Returns (pred (B, T, P), (h_n (P, B, H), c_n (P, B, H))).
    """
    w_ih, w_hh, b_ih, b_hh, lin_w, lin_b = params
    B, T, Pin = X.shape
    P, H4, _ = w_ih.shape
    H = H4 // 4
    PH = P * H
    G4 = 4 * PH
    f32 = jnp.float32

    # Chunk the time axis so only a (t_chunk*B, ...) slab is VMEM-resident;
    # the recurrent state carries across chunks in persistent scratch.
    if t_chunk is None:
        t_chunk = T if T <= 128 else 128
    if T % t_chunk != 0 or (t_chunk != T and (t_chunk * B) % 8 != 0):
        # TODO(synk): pad the time axis for ragged / unaligned chunking.
        t_chunk = T
    num_chunks = T // t_chunk
    tcb = t_chunk * B

    # Time-major, row index = t*B + b, column = input series.
    x_flat = jnp.transpose(X, (1, 0, 2)).reshape(T * B, Pin).astype(f32)

    # Gate-major fused input-projection weight: (P_in, 4*P*H) with column
    # index = gate*(P*H) + p*H + h.
    wih_f = jnp.transpose(w_ih.astype(f32).reshape(P, 4, H, Pin),
                          (3, 1, 0, 2)).reshape(Pin, G4)
    # Fused bias (b_ih + b_hh), same gate-major column layout.
    b_f = jnp.transpose((b_ih + b_hh).astype(f32).reshape(P, 4, H),
                        (1, 0, 2)).reshape(1, G4)
    # Block-diagonal recurrent weight: rows = fused hidden (p*H + k), columns
    # gate-major; network p only sees its own hidden state.
    eye = jnp.eye(P, dtype=f32)
    w4 = w_hh.astype(f32).reshape(P, 4, H, H)          # [p, gate, h_out, h_in]
    whh_bd = jnp.einsum('pghk,pq->pkgqh', w4, eye).reshape(PH, G4)
    # Block-diagonal 1x1-conv projection (P*H -> P) and its bias row.
    lw_bd = jnp.einsum('ph,pq->phq', lin_w.astype(f32), eye).reshape(PH, P)
    lb_row = lin_b.astype(f32).reshape(1, P)
    # TODO(synk): for large P*H switch whh_bd/lw_bd to the batched-einsum form
    # ('pbh,phg->pbg') to avoid the P-fold zero padding of the block diagonal;
    # on v6e/v7x the matmul operands can additionally be cast to bfloat16.

    pred_flat, h_flat, c_flat = pl.pallas_call(
        _clstm_kernel,
        out_shape=(
            jax.ShapeDtypeStruct((T * B, P), f32),
            jax.ShapeDtypeStruct((B, PH), f32),
            jax.ShapeDtypeStruct((B, PH), f32),
        ),
        grid_spec=pltpu.PrefetchScalarGridSpec(
            num_scalar_prefetch=0,
            grid=(num_chunks,),
            in_specs=[
                pl.BlockSpec((tcb, Pin), lambda c: (c, 0)),    # X chunk
                pl.BlockSpec((Pin, G4), lambda c: (0, 0)),     # fused W_ih
                pl.BlockSpec((PH, G4), lambda c: (0, 0)),      # block-diag W_hh
                pl.BlockSpec((1, G4), lambda c: (0, 0)),       # fused bias
                pl.BlockSpec((PH, P), lambda c: (0, 0)),       # conv weight
                pl.BlockSpec((1, P), lambda c: (0, 0)),        # conv bias
            ],
            out_specs=(
                pl.BlockSpec((tcb, P), lambda c: (c, 0)),      # predictions
                pl.BlockSpec((B, PH), lambda c: (0, 0)),       # final h
                pl.BlockSpec((B, PH), lambda c: (0, 0)),       # final c
            ),
            scratch_shapes=[
                pltpu.VMEM((B, PH), f32),              # fused hidden state
                pltpu.VMEM((B, PH), f32),              # fused cell state
                pltpu.VMEM((t_chunk, B, G4), f32),     # hoisted Zx chunk
                pltpu.VMEM((t_chunk, B, PH), f32),     # h sequence chunk
            ],
        ),
        compiler_params=pltpu.CompilerParams(
            dimension_semantics=("arbitrary",)),  # chunks carry the recurrence
    )(x_flat, wih_f, whh_bd, b_f, lw_bd, lb_row)

    pred = jnp.transpose(pred_flat.reshape(T, B, P), (1, 0, 2))      # (B, T, P)
    h_n = jnp.transpose(h_flat.reshape(B, P, H), (1, 0, 2))          # (P, B, H)
    c_n = jnp.transpose(c_flat.reshape(B, P, H), (1, 0, 2))
    # TODO(synk): `truncation` only changes backward-pass detachment in the
    # original module; forward semantics are identical, so it is not modeled.
    return pred, (h_n, c_n)


def clstm_reference(X, params):
    """Plain-JAX reference reproducing the PyTorch nn.LSTM + Conv1d(h,1,1)."""
    w_ih, w_hh, b_ih, b_hh, lin_w, lin_b = params
    B, T, P = X.shape
    H = w_hh.shape[2]
    preds, hs, cs = [], [], []
    for i in range(P):
        h = jnp.zeros((B, H), jnp.float32)
        c = jnp.zeros((B, H), jnp.float32)
        ys = []
        for t in range(T):
            z = X[:, t, :] @ w_ih[i].T + h @ w_hh[i].T + b_ih[i] + b_hh[i]
            i_g = jax.nn.sigmoid(z[:, 0 * H:1 * H])
            f_g = jax.nn.sigmoid(z[:, 1 * H:2 * H])
            g_g = jnp.tanh(z[:, 2 * H:3 * H])
            o_g = jax.nn.sigmoid(z[:, 3 * H:4 * H])
            c = f_g * c + i_g * g_g
            h = o_g * jnp.tanh(c)
            ys.append(h @ lin_w[i] + lin_b[i])                  # (B,)
        preds.append(jnp.stack(ys, axis=1))                     # (B, T)
        hs.append(h)
        cs.append(c)
    return (jnp.stack(preds, axis=-1),                          # (B, T, P)
            jnp.stack(hs, axis=0),                              # (P, B, H)
            jnp.stack(cs, axis=0))                              # (P, B, H)


def init_params(key, p, hidden):
    """Deterministic init matching the PyTorch module's parameter shapes."""
    k = 1.0 / jnp.sqrt(hidden)
    keys = jax.random.split(key, 6)
    w_ih = jax.random.uniform(keys[0], (p, 4 * hidden, p), jnp.float32, -k, k)
    w_hh = jax.random.uniform(keys[1], (p, 4 * hidden, hidden), jnp.float32, -k, k)
    b_ih = jax.random.uniform(keys[2], (p, 4 * hidden), jnp.float32, -k, k)
    b_hh = jax.random.uniform(keys[3], (p, 4 * hidden), jnp.float32, -k, k)
    lin_w = jax.random.uniform(keys[4], (p, hidden), jnp.float32, -k, k)
    lin_b = jax.random.uniform(keys[5], (p,), jnp.float32, -k, k)
    return (w_ih, w_hh, b_ih, b_hh, lin_w, lin_b)


if __name__ == "__main__":
    batch, seq, p, hidden = 2, 8, 4, 32

    key = jax.random.PRNGKey(0)
    k_x, k_p = jax.random.split(key)
    X = jax.random.normal(k_x, (batch, seq, p), jnp.float32)    # (B, T, P)
    params = init_params(k_p, p, hidden)

    pred, (h_n, c_n) = jax.block_until_ready(clstm_forward(X, params))
    ref_pred, ref_h, ref_c = clstm_reference(X, params)

    assert pred.shape == (batch, seq, p), pred.shape
    assert h_n.shape == (p, batch, hidden), h_n.shape
    assert c_n.shape == (p, batch, hidden), c_n.shape
    assert jnp.allclose(pred, ref_pred, atol=1e-3, rtol=1e-3), (
        float(jnp.max(jnp.abs(pred - ref_pred))))
    assert jnp.allclose(h_n, ref_h, atol=1e-3, rtol=1e-3), (
        float(jnp.max(jnp.abs(h_n - ref_h))))
    assert jnp.allclose(c_n, ref_c, atol=1e-3, rtol=1e-3), (
        float(jnp.max(jnp.abs(c_n - ref_c))))
    print("KERNEL_OK")
</pallas_src>

<mosaic_0001>
module attributes {stable_mosaic.version = 11 : i64} {
  func.func @_clstm_kernel(%arg0: i32, %arg1: memref<16x4xf32, #tpu.memory_space<vmem>>, %arg2: memref<4x512xf32, #tpu.memory_space<vmem>>, %arg3: memref<128x512xf32, #tpu.memory_space<vmem>>, %arg4: memref<1x512xf32, #tpu.memory_space<vmem>>, %arg5: memref<128x4xf32, #tpu.memory_space<vmem>>, %arg6: memref<1x4xf32, #tpu.memory_space<vmem>>, %arg7: memref<16x4xf32, #tpu.memory_space<vmem>>, %arg8: memref<2x128xf32, #tpu.memory_space<vmem>>, %arg9: memref<2x128xf32, #tpu.memory_space<vmem>>, %arg10: memref<2x128xf32, #tpu.memory_space<vmem>>, %arg11: memref<2x128xf32, #tpu.memory_space<vmem>>, %arg12: memref<8x2x512xf32, #tpu.memory_space<vmem>>, %arg13: memref<8x2x128xf32, #tpu.memory_space<vmem>>) attributes {dimension_semantics = [#tpu.dimension_semantics<arbitrary>], iteration_bounds = array<i64: 1>, scalar_prefetch = 0 : i64, scratch_operands = 4 : i64, tpu.core_type = #tpu.core_type<tc>, window_params = [{transform_indices = @transform_0, window_bounds = array<i64: 16, 4>}, {pipeline_mode = #tpu.pipeline_mode<synchronous>, transform_indices = @transform_1, window_bounds = array<i64: 4, 512>}, {pipeline_mode = #tpu.pipeline_mode<synchronous>, transform_indices = @transform_2, window_bounds = array<i64: 128, 512>}, {pipeline_mode = #tpu.pipeline_mode<synchronous>, transform_indices = @transform_3, window_bounds = array<i64: 1, 512>}, {pipeline_mode = #tpu.pipeline_mode<synchronous>, transform_indices = @transform_4, window_bounds = array<i64: 128, 4>}, {pipeline_mode = #tpu.pipeline_mode<synchronous>, transform_indices = @transform_5, window_bounds = array<i64: 1, 4>}, {transform_indices = @transform_6, window_bounds = array<i64: 16, 4>}, {pipeline_mode = #tpu.pipeline_mode<synchronous>, transform_indices = @transform_7, window_bounds = array<i64: 2, 128>}, {pipeline_mode = #tpu.pipeline_mode<synchronous>, transform_indices = @transform_8, window_bounds = array<i64: 2, 128>}]} {
    %c0_i32 = arith.constant 0 : i32
    %0 = arith.cmpi eq, %arg0, %c0_i32 : i32
    %1 = arith.extui %0 : i1 to i32
    %c0_i32_0 = arith.constant 0 : i32
    %2 = arith.cmpi ne, %1, %c0_i32_0 : i32
    scf.if %2 {
      %cst_172 = arith.constant 0.000000e+00 : f32
      %335 = vector.broadcast %cst_172 : f32 to vector<2x128xf32>
      %c0_173 = arith.constant 0 : index
      %c0_174 = arith.constant 0 : index
      %336 = vector.load %arg10[%c0_173, %c0_174] : memref<2x128xf32, #tpu.memory_space<vmem>>, vector<2x128xf32>
      tpu.vector_store %arg10[%c0_173, %c0_174], %335 {strides = array<i32>} : memref<2x128xf32, #tpu.memory_space<vmem>>, vector<2x128xf32>,
      %cst_175 = arith.constant 0.000000e+00 : f32
      %337 = vector.broadcast %cst_175 : f32 to vector<2x128xf32>
      %c0_176 = arith.constant 0 : index
      %c0_177 = arith.constant 0 : index
      %338 = vector.load %arg11[%c0_176, %c0_177] : memref<2x128xf32, #tpu.memory_space<vmem>>, vector<2x128xf32>
      tpu.vector_store %arg11[%c0_176, %c0_177], %337 {strides = array<i32>} : memref<2x128xf32, #tpu.memory_space<vmem>>, vector<2x128xf32>,
    } else {
    }
    %c0 = arith.constant 0 : index
    %c0_1 = arith.constant 0 : index
    %3 = vector.load %arg1[%c0, %c0_1] : memref<16x4xf32, #tpu.memory_space<vmem>>, vector<16x4xf32>
    %c0_2 = arith.constant 0 : index
    %c0_3 = arith.constant 0 : index
    %4 = vector.load %arg2[%c0_2, %c0_3] : memref<4x512xf32, #tpu.memory_space<vmem>>, vector<4x512xf32>
    %cst = arith.constant dense<0.000000e+00> : vector<16x512xf32>
    %5 = tpu.matmul %3, %4, %cst {dimension_numbers = #tpu.dot_dimension_numbers<[1], [0], [0], [1], [0, 0, 1, 1], [], []>} : vector<16x4xf32>, vector<4x512xf32>, vector<16x512xf32> -> vector<16x512xf32>
    %c0_4 = arith.constant 0 : index
    %c0_5 = arith.constant 0 : index
    %6 = vector.load %arg4[%c0_4, %c0_5] : memref<1x512xf32, #tpu.memory_space<vmem>>, vector<1x512xf32>
    %7 = vector.broadcast %6 : vector<1x512xf32> to vector<16x512xf32>
    %8 = arith.addf %5, %7 : vector<16x512xf32>
    %9 = vector.shape_cast %8 : vector<16x512xf32> to vector<8x2x512xf32>
    %c0_6 = arith.constant 0 : index
    %c0_7 = arith.constant 0 : index
    %c0_8 = arith.constant 0 : index
    %10 = vector.load %arg12[%c0_6, %c0_7, %c0_8] : memref<8x2x512xf32, #tpu.memory_space<vmem>>, vector<8x2x512xf32>
    tpu.vector_store %arg12[%c0_6, %c0_7, %c0_8], %9 {strides = array<i32>} : memref<8x2x512xf32, #tpu.memory_space<vmem>>, vector<8x2x512xf32>,
    %c0_i32_9 = arith.constant 0 : i32
    %c0_10 = arith.constant 0 : index
    %c0_11 = arith.constant 0 : index
    %11 = vector.load %arg10[%c0_10, %c0_11] : memref<2x128xf32, #tpu.memory_space<vmem>>, vector<2x128xf32>
    %c0_12 = arith.constant 0 : index
    %c0_13 = arith.constant 0 : index
    %12 = vector.load %arg11[%c0_12, %c0_13] : memref<2x128xf32, #tpu.memory_space<vmem>>, vector<2x128xf32>
    %13 = arith.index_cast %c0_i32_9 : i32 to index
    %c0_14 = arith.constant 0 : index
    %c0_15 = arith.constant 0 : index
    %14 = vector.load %arg12[%13, %c0_14, %c0_15] : memref<8x2x512xf32, #tpu.memory_space<vmem>>, vector<1x2x512xf32>
    %15 = vector.shape_cast %14 : vector<1x2x512xf32> to vector<2x512xf32>
    %c0_16 = arith.constant 0 : index
    %c0_17 = arith.constant 0 : index
    %16 = vector.load %arg3[%c0_16, %c0_17] : memref<128x512xf32, #tpu.memory_space<vmem>>, vector<128x512xf32>
    %cst_18 = arith.constant dense<0.000000e+00> : vector<2x512xf32>
    %17 = tpu.matmul %11, %16, %cst_18 {dimension_numbers = #tpu.dot_dimension_numbers<[1], [0], [0], [1], [0, 0, 1, 1], [], []>} : vector<2x128xf32>, vector<128x512xf32>, vector<2x512xf32> -> vector<2x512xf32>
    %18 = arith.addf %15, %17 : vector<2x512xf32>
    %19 = vector.extract_strided_slice %18 {offsets = [0, 0], sizes = [2, 128], strides = [1, 1]} : vector<2x512xf32> to vector<2x128xf32>
    %20 = arith.negf %19 : vector<2x128xf32>
    %21 = math.exp %20 : vector<2x128xf32>
    %cst_19 = arith.constant 1.000000e+00 : f32
    %22 = vector.broadcast %cst_19 : f32 to vector<2x128xf32>
    %23 = arith.addf %22, %21 : vector<2x128xf32>
    %24 = arith.divf %22, %23 : vector<2x128xf32>
    %25 = vector.extract_strided_slice %18 {offsets = [0, 128], sizes = [2, 128], strides = [1, 1]} : vector<2x512xf32> to vector<2x128xf32>
    %26 = arith.negf %25 : vector<2x128xf32>
    %27 = math.exp %26 : vector<2x128xf32>
    %cst_20 = arith.constant 1.000000e+00 : f32
    %28 = vector.broadcast %cst_20 : f32 to vector<2x128xf32>
    %29 = arith.addf %28, %27 : vector<2x128xf32>
    %30 = arith.divf %28, %29 : vector<2x128xf32>
    %31 = vector.extract_strided_slice %18 {offsets = [0, 256], sizes = [2, 128], strides = [1, 1]} : vector<2x512xf32> to vector<2x128xf32>
    %32 = math.tanh %31 : vector<2x128xf32>
    %33 = vector.extract_strided_slice %18 {offsets = [0, 384], sizes = [2, 128], strides = [1, 1]} : vector<2x512xf32> to vector<2x128xf32>
    %34 = arith.negf %33 : vector<2x128xf32>
    %35 = math.exp %34 : vector<2x128xf32>
    %cst_21 = arith.constant 1.000000e+00 : f32
    %36 = vector.broadcast %cst_21 : f32 to vector<2x128xf32>
    %37 = arith.addf %36, %35 : vector<2x128xf32>
    %38 = arith.divf %36, %37 : vector<2x128xf32>
    %39 = arith.mulf %30, %12 : vector<2x128xf32>
    %40 = arith.mulf %24, %32 : vector<2x128xf32>
    %41 = arith.addf %39, %40 : vector<2x128xf32>
    %42 = math.tanh %41 : vector<2x128xf32>
    %43 = arith.mulf %38, %42 : vector<2x128xf32>
    %c0_22 = arith.constant 0 : index
    %c0_23 = arith.constant 0 : index
    %44 = vector.load %arg11[%c0_22, %c0_23] : memref<2x128xf32, #tpu.memory_space<vmem>>, vector<2x128xf32>
    tpu.vector_store %arg11[%c0_22, %c0_23], %41 {strides = array<i32>} : memref<2x128xf32, #tpu.memory_space<vmem>>, vector<2x128xf32>,
    %c0_24 = arith.constant 0 : index
    %c0_25 = arith.constant 0 : index
    %45 = vector.load %arg10[%c0_24, %c0_25] : memref<2x128xf32, #tpu.memory_space<vmem>>, vector<2x128xf32>
    tpu.vector_store %arg10[%c0_24, %c0_25], %43 {strides = array<i32>} : memref<2x128xf32, #tpu.memory_space<vmem>>, vector<2x128xf32>,
    %46 = arith.index_cast %c0_i32_9 : i32 to index
    %c0_26 = arith.constant 0 : index
    %c0_27 = arith.constant 0 : index
    %47 = vector.load %arg13[%46, %c0_26, %c0_27] : memref<8x2x128xf32, #tpu.memory_space<vmem>>, vector<1x2x128xf32>
    %48 = vector.shape_cast %47 : vector<1x2x128xf32> to vector<2x128xf32>
    %49 = vector.shape_cast %43 : vector<2x128xf32> to vector<1x2x128xf32>
    tpu.vector_store %arg13[%46, %c0_26, %c0_27], %49 {strides = array<i32>} : memref<8x2x128xf32, #tpu.memory_space<vmem>>, vector<1x2x128xf32>,
    %c1_i32 = arith.constant 1 : i32
    %c0_28 = arith.constant 0 : index
    %c0_29 = arith.constant 0 : index
    %50 = vector.load %arg10[%c0_28, %c0_29] : memref<2x128xf32, #tpu.memory_space<vmem>>, vector<2x128xf32>
    %c0_30 = arith.constant 0 : index
    %c0_31 = arith.constant 0 : index
    %51 = vector.load %arg11[%c0_30, %c0_31] : memref<2x128xf32, #tpu.memory_space<vmem>>, vector<2x128xf32>
    %52 = arith.index_cast %c1_i32 : i32 to index
    %c0_32 = arith.constant 0 : index
    %c0_33 = arith.constant 0 : index
    %53 = vector.load %arg12[%52, %c0_32, %c0_33] : memref<8x2x512xf32, #tpu.memory_space<vmem>>, vector<1x2x512xf32>
    %54 = vector.shape_cast %53 : vector<1x2x512xf32> to vector<2x512xf32>
    %c0_34 = arith.constant 0 : index
    %c0_35 = arith.constant 0 : index
    %55 = vector.load %arg3[%c0_34, %c0_35] : memref<128x512xf32, #tpu.memory_space<vmem>>, vector<128x512xf32>
    %cst_36 = arith.constant dense<0.000000e+00> : vector<2x512xf32>
    %56 = tpu.matmul %50, %55, %cst_36 {dimension_numbers = #tpu.dot_dimension_numbers<[1], [0], [0], [1], [0, 0, 1, 1], [], []>} : vector<2x128xf32>, vector<128x512xf32>, vector<2x512xf32> -> vector<2x512xf32>
    %57 = arith.addf %54, %56 : vector<2x512xf32>
    %58 = vector.extract_strided_slice %57 {offsets = [0, 0], sizes = [2, 128], strides = [1, 1]} : vector<2x512xf32> to vector<2x128xf32>
    %59 = arith.negf %58 : vector<2x128xf32>
    %60 = math.exp %59 : vector<2x128xf32>
    %cst_37 = arith.constant 1.000000e+00 : f32
    %61 = vector.broadcast %cst_37 : f32 to vector<2x128xf32>
    %62 = arith.addf %61, %60 : vector<2x128xf32>
    %63 = arith.divf %61, %62 : vector<2x128xf32>
    %64 = vector.extract_strided_slice %57 {offsets = [0, 128], sizes = [2, 128], strides = [1, 1]} : vector<2x512xf32> to vector<2x128xf32>
    %65 = arith.negf %64 : vector<2x128xf32>
    %66 = math.exp %65 : vector<2x128xf32>
    %cst_38 = arith.constant 1.000000e+00 : f32
    %67 = vector.broadcast %cst_38 : f32 to vector<2x128xf32>
    %68 = arith.addf %67, %66 : vector<2x128xf32>
    %69 = arith.divf %67, %68 : vector<2x128xf32>
    %70 = vector.extract_strided_slice %57 {offsets = [0, 256], sizes = [2, 128], strides = [1, 1]} : vector<2x512xf32> to vector<2x128xf32>
    %71 = math.tanh %70 : vector<2x128xf32>
    %72 = vector.extract_strided_slice %57 {offsets = [0, 384], sizes = [2, 128], strides = [1, 1]} : vector<2x512xf32> to vector<2x128xf32>
    %73 = arith.negf %72 : vector<2x128xf32>
    %74 = math.exp %73 : vector<2x128xf32>
    %cst_39 = arith.constant 1.000000e+00 : f32
    %75 = vector.broadcast %cst_39 : f32 to vector<2x128xf32>
    %76 = arith.addf %75, %74 : vector<2x128xf32>
    %77 = arith.divf %75, %76 : vector<2x128xf32>
    %78 = arith.mulf %69, %51 : vector<2x128xf32>
    %79 = arith.mulf %63, %71 : vector<2x128xf32>
    %80 = arith.addf %78, %79 : vector<2x128xf32>
    %81 = math.tanh %80 : vector<2x128xf32>
    %82 = arith.mulf %77, %81 : vector<2x128xf32>
    %c0_40 = arith.constant 0 : index
    %c0_41 = arith.constant 0 : index
    %83 = vector.load %arg11[%c0_40, %c0_41] : memref<2x128xf32, #tpu.memory_space<vmem>>, vector<2x128xf32>
    tpu.vector_store %arg11[%c0_40, %c0_41], %80 {strides = array<i32>} : memref<2x128xf32, #tpu.memory_space<vmem>>, vector<2x128xf32>,
    %c0_42 = arith.constant 0 : index
    %c0_43 = arith.constant 0 : index
    %84 = vector.load %arg10[%c0_42, %c0_43] : memref<2x128xf32, #tpu.memory_space<vmem>>, vector<2x128xf32>
    tpu.vector_store %arg10[%c0_42, %c0_43], %82 {strides = array<i32>} : memref<2x128xf32, #tpu.memory_space<vmem>>, vector<2x128xf32>,
    %85 = arith.index_cast %c1_i32 : i32 to index
    %c0_44 = arith.constant 0 : index
    %c0_45 = arith.constant 0 : index
    %86 = vector.load %arg13[%85, %c0_44, %c0_45] : memref<8x2x128xf32, #tpu.memory_space<vmem>>, vector<1x2x128xf32>
    %87 = vector.shape_cast %86 : vector<1x2x128xf32> to vector<2x128xf32>
    %88 = vector.shape_cast %82 : vector<2x128xf32> to vector<1x2x128xf32>
    tpu.vector_store %arg13[%85, %c0_44, %c0_45], %88 {strides = array<i32>} : memref<8x2x128xf32, #tpu.memory_space<vmem>>, vector<1x2x128xf32>,
    %c2_i32 = arith.constant 2 : i32
    %c0_46 = arith.constant 0 : index
    %c0_47 = arith.constant 0 : index
    %89 = vector.load %arg10[%c0_46, %c0_47] : memref<2x128xf32, #tpu.memory_space<vmem>>, vector<2x128xf32>
    %c0_48 = arith.constant 0 : index
    %c0_49 = arith.constant 0 : index
    %90 = vector.load %arg11[%c0_48, %c0_49] : memref<2x128xf32, #tpu.memory_space<vmem>>, vector<2x128xf32>
    %91 = arith.index_cast %c2_i32 : i32 to index
    %c0_50 = arith.constant 0 : index
    %c0_51 = arith.constant 0 : index
    %92 = vector.load %arg12[%91, %c0_50, %c0_51] : memref<8x2x512xf32, #tpu.memory_space<vmem>>, vector<1x2x512xf32>
    %93 = vector.shape_cast %92 : vector<1x2x512xf32> to vector<2x512xf32>
    %c0_52 = arith.constant 0 : index
    %c0_53 = arith.constant 0 : index
    %94 = vector.load %arg3[%c0_52, %c0_53] : memref<128x512xf32, #tpu.memory_space<vmem>>, vector<128x512xf32>
    %cst_54 = arith.constant dense<0.000000e+00> : vector<2x512xf32>
    %95 = tpu.matmul %89, %94, %cst_54 {dimension_numbers = #tpu.dot_dimension_numbers<[1], [0], [0], [1], [0, 0, 1, 1], [], []>} : vector<2x128xf32>, vector<128x512xf32>, vector<2x512xf32> -> vector<2x512xf32>
    %96 = arith.addf %93, %95 : vector<2x512xf32>
    %97 = vector.extract_strided_slice %96 {offsets = [0, 0], sizes = [2, 128], strides = [1, 1]} : vector<2x512xf32> to vector<2x128xf32>
    %98 = arith.negf %97 : vector<2x128xf32>
    %99 = math.exp %98 : vector<2x128xf32>
    %cst_55 = arith.constant 1.000000e+00 : f32
    %100 = vector.broadcast %cst_55 : f32 to vector<2x128xf32>
    %101 = arith.addf %100, %99 : vector<2x128xf32>
    %102 = arith.divf %100, %101 : vector<2x128xf32>
    %103 = vector.extract_strided_slice %96 {offsets = [0, 128], sizes = [2, 128], strides = [1, 1]} : vector<2x512xf32> to vector<2x128xf32>
    %104 = arith.negf %103 : vector<2x128xf32>
    %105 = math.exp %104 : vector<2x128xf32>
    %cst_56 = arith.constant 1.000000e+00 : f32
    %106 = vector.broadcast %cst_56 : f32 to vector<2x128xf32>
    %107 = arith.addf %106, %105 : vector<2x128xf32>
    %108 = arith.divf %106, %107 : vector<2x128xf32>
    %109 = vector.extract_strided_slice %96 {offsets = [0, 256], sizes = [2, 128], strides = [1, 1]} : vector<2x512xf32> to vector<2x128xf32>
    %110 = math.tanh %109 : vector<2x128xf32>
    %111 = vector.extract_strided_slice %96 {offsets = [0, 384], sizes = [2, 128], strides = [1, 1]} : vector<2x512xf32> to vector<2x128xf32>
    %112 = arith.negf %111 : vector<2x128xf32>
    %113 = math.exp %112 : vector<2x128xf32>
    %cst_57 = arith.constant 1.000000e+00 : f32
    %114 = vector.broadcast %cst_57 : f32 to vector<2x128xf32>
    %115 = arith.addf %114, %113 : vector<2x128xf32>
    %116 = arith.divf %114, %115 : vector<2x128xf32>
    %117 = arith.mulf %108, %90 : vector<2x128xf32>
    %118 = arith.mulf %102, %110 : vector<2x128xf32>
    %119 = arith.addf %117, %118 : vector<2x128xf32>
    %120 = math.tanh %119 : vector<2x128xf32>
    %121 = arith.mulf %116, %120 : vector<2x128xf32>
    %c0_58 = arith.constant 0 : index
    %c0_59 = arith.constant 0 : index
    %122 = vector.load %arg11[%c0_58, %c0_59] : memref<2x128xf32, #tpu.memory_space<vmem>>, vector<2x128xf32>
    tpu.vector_store %arg11[%c0_58, %c0_59], %119 {strides = array<i32>} : memref<2x128xf32, #tpu.memory_space<vmem>>, vector<2x128xf32>,
    %c0_60 = arith.constant 0 : index
    %c0_61 = arith.constant 0 : index
    %123 = vector.load %arg10[%c0_60, %c0_61] : memref<2x128xf32, #tpu.memory_space<vmem>>, vector<2x128xf32>
    tpu.vector_store %arg10[%c0_60, %c0_61], %121 {strides = array<i32>} : memref<2x128xf32, #tpu.memory_space<vmem>>, vector<2x128xf32>,
    %124 = arith.index_cast %c2_i32 : i32 to index
    %c0_62 = arith.constant 0 : index
    %c0_63 = arith.constant 0 : index
    %125 = vector.load %arg13[%124, %c0_62, %c0_63] : memref<8x2x128xf32, #tpu.memory_space<vmem>>, vector<1x2x128xf32>
    %126 = vector.shape_cast %125 : vector<1x2x128xf32> to vector<2x128xf32>
    %127 = vector.shape_cast %121 : vector<2x128xf32> to vector<1x2x128xf32>
    tpu.vector_store %arg13[%124, %c0_62, %c0_63], %127 {strides = array<i32>} : memref<8x2x128xf32, #tpu.memory_space<vmem>>, vector<1x2x128xf32>,
    %c3_i32 = arith.constant 3 : i32
    %c0_64 = arith.constant 0 : index
    %c0_65 = arith.constant 0 : index
    %128 = vector.load %arg10[%c0_64, %c0_65] : memref<2x128xf32, #tpu.memory_space<vmem>>, vector<2x128xf32>
    %c0_66 = arith.constant 0 : index
    %c0_67 = arith.constant 0 : index
    %129 = vector.load %arg11[%c0_66, %c0_67] : memref<2x128xf32, #tpu.memory_space<vmem>>, vector<2x128xf32>
    %130 = arith.index_cast %c3_i32 : i32 to index
    %c0_68 = arith.constant 0 : index
    %c0_69 = arith.constant 0 : index
    %131 = vector.load %arg12[%130, %c0_68, %c0_69] : memref<8x2x512xf32, #tpu.memory_space<vmem>>, vector<1x2x512xf32>
    %132 = vector.shape_cast %131 : vector<1x2x512xf32> to vector<2x512xf32>
    %c0_70 = arith.constant 0 : index
    %c0_71 = arith.constant 0 : index
    %133 = vector.load %arg3[%c0_70, %c0_71] : memref<128x512xf32, #tpu.memory_space<vmem>>, vector<128x512xf32>
    %cst_72 = arith.constant dense<0.000000e+00> : vector<2x512xf32>
    %134 = tpu.matmul %128, %133, %cst_72 {dimension_numbers = #tpu.dot_dimension_numbers<[1], [0], [0], [1], [0, 0, 1, 1], [], []>} : vector<2x128xf32>, vector<128x512xf32>, vector<2x512xf32> -> vector<2x512xf32>
    %135 = arith.addf %132, %134 : vector<2x512xf32>
    %136 = vector.extract_strided_slice %135 {offsets = [0, 0], sizes = [2, 128], strides = [1, 1]} : vector<2x512xf32> to vector<2x128xf32>
    %137 = arith.negf %136 : vector<2x128xf32>
    %138 = math.exp %137 : vector<2x128xf32>
    %cst_73 = arith.constant 1.000000e+00 : f32
    %139 = vector.broadcast %cst_73 : f32 to vector<2x128xf32>
    %140 = arith.addf %139, %138 : vector<2x128xf32>
    %141 = arith.divf %139, %140 : vector<2x128xf32>
    %142 = vector.extract_strided_slice %135 {offsets = [0, 128], sizes = [2, 128], strides = [1, 1]} : vector<2x512xf32> to vector<2x128xf32>
    %143 = arith.negf %142 : vector<2x128xf32>
    %144 = math.exp %143 : vector<2x128xf32>
    %cst_74 = arith.constant 1.000000e+00 : f32
    %145 = vector.broadcast %cst_74 : f32 to vector<2x128xf32>
    %146 = arith.addf %145, %144 : vector<2x128xf32>
    %147 = arith.divf %145, %146 : vector<2x128xf32>
    %148 = vector.extract_strided_slice %135 {offsets = [0, 256], sizes = [2, 128], strides = [1, 1]} : vector<2x512xf32> to vector<2x128xf32>
    %149 = math.tanh %148 : vector<2x128xf32>
    %150 = vector.extract_strided_slice %135 {offsets = [0, 384], sizes = [2, 128], strides = [1, 1]} : vector<2x512xf32> to vector<2x128xf32>
    %151 = arith.negf %150 : vector<2x128xf32>
    %152 = math.exp %151 : vector<2x128xf32>
    %cst_75 = arith.constant 1.000000e+00 : f32
    %153 = vector.broadcast %cst_75 : f32 to vector<2x128xf32>
    %154 = arith.addf %153, %152 : vector<2x128xf32>
    %155 = arith.divf %153, %154 : vector<2x128xf32>
    %156 = arith.mulf %147, %129 : vector<2x128xf32>
    %157 = arith.mulf %141, %149 : vector<2x128xf32>
    %158 = arith.addf %156, %157 : vector<2x128xf32>
    %159 = math.tanh %158 : vector<2x128xf32>
    %160 = arith.mulf %155, %159 : vector<2x128xf32>
    %c0_76 = arith.constant 0 : index
    %c0_77 = arith.constant 0 : index
    %161 = vector.load %arg11[%c0_76, %c0_77] : memref<2x128xf32, #tpu.memory_space<vmem>>, vector<2x128xf32>
    tpu.vector_store %arg11[%c0_76, %c0_77], %158 {strides = array<i32>} : memref<2x128xf32, #tpu.memory_space<vmem>>, vector<2x128xf32>,
    %c0_78 = arith.constant 0 : index
    %c0_79 = arith.constant 0 : index
    %162 = vector.load %arg10[%c0_78, %c0_79] : memref<2x128xf32, #tpu.memory_space<vmem>>, vector<2x128xf32>
    tpu.vector_store %arg10[%c0_78, %c0_79], %160 {strides = array<i32>} : memref<2x128xf32, #tpu.memory_space<vmem>>, vector<2x128xf32>,
    %163 = arith.index_cast %c3_i32 : i32 to index
    %c0_80 = arith.constant 0 : index
    %c0_81 = arith.constant 0 : index
    %164 = vector.load %arg13[%163, %c0_80, %c0_81] : memref<8x2x128xf32, #tpu.memory_space<vmem>>, vector<1x2x128xf32>
    %165 = vector.shape_cast %164 : vector<1x2x128xf32> to vector<2x128xf32>
    %166 = vector.shape_cast %160 : vector<2x128xf32> to vector<1x2x128xf32>
    tpu.vector_store %arg13[%163, %c0_80, %c0_81], %166 {strides = array<i32>} : memref<8x2x128xf32, #tpu.memory_space<vmem>>, vector<1x2x128xf32>,
    %c4_i32 = arith.constant 4 : i32
    %c0_82 = arith.constant 0 : index
    %c0_83 = arith.constant 0 : index
    %167 = vector.load %arg10[%c0_82, %c0_83] : memref<2x128xf32, #tpu.memory_space<vmem>>, vector<2x128xf32>
    %c0_84 = arith.constant 0 : index
    %c0_85 = arith.constant 0 : index
    %168 = vector.load %arg11[%c0_84, %c0_85] : memref<2x128xf32, #tpu.memory_space<vmem>>, vector<2x128xf32>
    %169 = arith.index_cast %c4_i32 : i32 to index
    %c0_86 = arith.constant 0 : index
    %c0_87 = arith.constant 0 : index
    %170 = vector.load %arg12[%169, %c0_86, %c0_87] : memref<8x2x512xf32, #tpu.memory_space<vmem>>, vector<1x2x512xf32>
    %171 = vector.shape_cast %170 : vector<1x2x512xf32> to vector<2x512xf32>
    %c0_88 = arith.constant 0 : index
    %c0_89 = arith.constant 0 : index
    %172 = vector.load %arg3[%c0_88, %c0_89] : memref<128x512xf32, #tpu.memory_space<vmem>>, vector<128x512xf32>
    %cst_90 = arith.constant dense<0.000000e+00> : vector<2x512xf32>
    %173 = tpu.matmul %167, %172, %cst_90 {dimension_numbers = #tpu.dot_dimension_numbers<[1], [0], [0], [1], [0, 0, 1, 1], [], []>} : vector<2x128xf32>, vector<128x512xf32>, vector<2x512xf32> -> vector<2x512xf32>
    %174 = arith.addf %171, %173 : vector<2x512xf32>
    %175 = vector.extract_strided_slice %174 {offsets = [0, 0], sizes = [2, 128], strides = [1, 1]} : vector<2x512xf32> to vector<2x128xf32>
    %176 = arith.negf %175 : vector<2x128xf32>
    %177 = math.exp %176 : vector<2x128xf32>
    %cst_91 = arith.constant 1.000000e+00 : f32
    %178 = vector.broadcast %cst_91 : f32 to vector<2x128xf32>
    %179 = arith.addf %178, %177 : vector<2x128xf32>
    %180 = arith.divf %178, %179 : vector<2x128xf32>
    %181 = vector.extract_strided_slice %174 {offsets = [0, 128], sizes = [2, 128], strides = [1, 1]} : vector<2x512xf32> to vector<2x128xf32>
    %182 = arith.negf %181 : vector<2x128xf32>
    %183 = math.exp %182 : vector<2x128xf32>
    %cst_92 = arith.constant 1.000000e+00 : f32
    %184 = vector.broadcast %cst_92 : f32 to vector<2x128xf32>
    %185 = arith.addf %184, %183 : vector<2x128xf32>
    %186 = arith.divf %184, %185 : vector<2x128xf32>
    %187 = vector.extract_strided_slice %174 {offsets = [0, 256], sizes = [2, 128], strides = [1, 1]} : vector<2x512xf32> to vector<2x128xf32>
    %188 = math.tanh %187 : vector<2x128xf32>
    %189 = vector.extract_strided_slice %174 {offsets = [0, 384], sizes = [2, 128], strides = [1, 1]} : vector<2x512xf32> to vector<2x128xf32>
    %190 = arith.negf %189 : vector<2x128xf32>
    %191 = math.exp %190 : vector<2x128xf32>
    %cst_93 = arith.constant 1.000000e+00 : f32
    %192 = vector.broadcast %cst_93 : f32 to vector<2x128xf32>
    %193 = arith.addf %192, %191 : vector<2x128xf32>
    %194 = arith.divf %192, %193 : vector<2x128xf32>
    %195 = arith.mulf %186, %168 : vector<2x128xf32>
    %196 = arith.mulf %180, %188 : vector<2x128xf32>
    %197 = arith.addf %195, %196 : vector<2x128xf32>
    %198 = math.tanh %197 : vector<2x128xf32>
    %199 = arith.mulf %194, %198 : vector<2x128xf32>
    %c0_94 = arith.constant 0 : index
    %c0_95 = arith.constant 0 : index
    %200 = vector.load %arg11[%c0_94, %c0_95] : memref<2x128xf32, #tpu.memory_space<vmem>>, vector<2x128xf32>
    tpu.vector_store %arg11[%c0_94, %c0_95], %197 {strides = array<i32>} : memref<2x128xf32, #tpu.memory_space<vmem>>, vector<2x128xf32>,
    %c0_96 = arith.constant 0 : index
    %c0_97 = arith.constant 0 : index
    %201 = vector.load %arg10[%c0_96, %c0_97] : memref<2x128xf32, #tpu.memory_space<vmem>>, vector<2x128xf32>
    tpu.vector_store %arg10[%c0_96, %c0_97], %199 {strides = array<i32>} : memref<2x128xf32, #tpu.memory_space<vmem>>, vector<2x128xf32>,
    %202 = arith.index_cast %c4_i32 : i32 to index
    %c0_98 = arith.constant 0 : index
    %c0_99 = arith.constant 0 : index
    %203 = vector.load %arg13[%202, %c0_98, %c0_99] : memref<8x2x128xf32, #tpu.memory_space<vmem>>, vector<1x2x128xf32>
    %204 = vector.shape_cast %203 : vector<1x2x128xf32> to vector<2x128xf32>
    %205 = vector.shape_cast %199 : vector<2x128xf32> to vector<1x2x128xf32>
    tpu.vector_store %arg13[%202, %c0_98, %c0_99], %205 {strides = array<i32>} : memref<8x2x128xf32, #tpu.memory_space<vmem>>, vector<1x2x128xf32>,
    %c5_i32 = arith.constant 5 : i32
    %c0_100 = arith.constant 0 : index
    %c0_101 = arith.constant 0 : index
    %206 = vector.load %arg10[%c0_100, %c0_101] : memref<2x128xf32, #tpu.memory_space<vmem>>, vector<2x128xf32>
    %c0_102 = arith.constant 0 : index
    %c0_103 = arith.constant 0 : index
    %207 = vector.load %arg11[%c0_102, %c0_103] : memref<2x128xf32, #tpu.memory_space<vmem>>, vector<2x128xf32>
    %208 = arith.index_cast %c5_i32 : i32 to index
    %c0_104 = arith.constant 0 : index
    %c0_105 = arith.constant 0 : index
    %209 = vector.load %arg12[%208, %c0_104, %c0_105] : memref<8x2x512xf32, #tpu.memory_space<vmem>>, vector<1x2x512xf32>
    %210 = vector.shape_cast %209 : vector<1x2x512xf32> to vector<2x512xf32>
    %c0_106 = arith.constant 0 : index
    %c0_107 = arith.constant 0 : index
    %211 = vector.load %arg3[%c0_106, %c0_107] : memref<128x512xf32, #tpu.memory_space<vmem>>, vector<128x512xf32>
    %cst_108 = arith.constant dense<0.000000e+00> : vector<2x512xf32>
    %212 = tpu.matmul %206, %211, %cst_108 {dimension_numbers = #tpu.dot_dimension_numbers<[1], [0], [0], [1], [0, 0, 1, 1], [], []>} : vector<2x128xf32>, vector<128x512xf32>, vector<2x512xf32> -> vector<2x512xf32>
    %213 = arith.addf %210, %212 : vector<2x512xf32>
    %214 = vector.extract_strided_slice %213 {offsets = [0, 0], sizes = [2, 128], strides = [1, 1]} : vector<2x512xf32> to vector<2x128xf32>
    %215 = arith.negf %214 : vector<2x128xf32>
    %216 = math.exp %215 : vector<2x128xf32>
    %cst_109 = arith.constant 1.000000e+00 : f32
    %217 = vector.broadcast %cst_109 : f32 to vector<2x128xf32>
    %218 = arith.addf %217, %216 : vector<2x128xf32>
    %219 = arith.divf %217, %218 : vector<2x128xf32>
    %220 = vector.extract_strided_slice %213 {offsets = [0, 128], sizes = [2, 128], strides = [1, 1]} : vector<2x512xf32> to vector<2x128xf32>
    %221 = arith.negf %220 : vector<2x128xf32>
    %222 = math.exp %221 : vector<2x128xf32>
    %cst_110 = arith.constant 1.000000e+00 : f32
    %223 = vector.broadcast %cst_110 : f32 to vector<2x128xf32>
    %224 = arith.addf %223, %222 : vector<2x128xf32>
    %225 = arith.divf %223, %224 : vector<2x128xf32>
    %226 = vector.extract_strided_slice %213 {offsets = [0, 256], sizes = [2, 128], strides = [1, 1]} : vector<2x512xf32> to vector<2x128xf32>
    %227 = math.tanh %226 : vector<2x128xf32>
    %228 = vector.extract_strided_slice %213 {offsets = [0, 384], sizes = [2, 128], strides = [1, 1]} : vector<2x512xf32> to vector<2x128xf32>
    %229 = arith.negf %228 : vector<2x128xf32>
    %230 = math.exp %229 : vector<2x128xf32>
    %cst_111 = arith.constant 1.000000e+00 : f32
    %231 = vector.broadcast %cst_111 : f32 to vector<2x128xf32>
    %232 = arith.addf %231, %230 : vector<2x128xf32>
    %233 = arith.divf %231, %232 : vector<2x128xf32>
    %234 = arith.mulf %225, %207 : vector<2x128xf32>
    %235 = arith.mulf %219, %227 : vector<2x128xf32>
    %236 = arith.addf %234, %235 : vector<2x128xf32>
    %237 = math.tanh %236 : vector<2x128xf32>
    %238 = arith.mulf %233, %237 : vector<2x128xf32>
    %c0_112 = arith.constant 0 : index
    %c0_113 = arith.constant 0 : index
    %239 = vector.load %arg11[%c0_112, %c0_113] : memref<2x128xf32, #tpu.memory_space<vmem>>, vector<2x128xf32>
    tpu.vector_store %arg11[%c0_112, %c0_113], %236 {strides = array<i32>} : memref<2x128xf32, #tpu.memory_space<vmem>>, vector<2x128xf32>,
    %c0_114 = arith.constant 0 : index
    %c0_115 = arith.constant 0 : index
    %240 = vector.load %arg10[%c0_114, %c0_115] : memref<2x128xf32, #tpu.memory_space<vmem>>, vector<2x128xf32>
    tpu.vector_store %arg10[%c0_114, %c0_115], %238 {strides = array<i32>} : memref<2x128xf32, #tpu.memory_space<vmem>>, vector<2x128xf32>,
    %241 = arith.index_cast %c5_i32 : i32 to index
    %c0_116 = arith.constant 0 : index
    %c0_117 = arith.constant 0 : index
    %242 = vector.load %arg13[%241, %c0_116, %c0_117] : memref<8x2x128xf32, #tpu.memory_space<vmem>>, vector<1x2x128xf32>
    %243 = vector.shape_cast %242 : vector<1x2x128xf32> to vector<2x128xf32>
    %244 = vector.shape_cast %238 : vector<2x128xf32> to vector<1x2x128xf32>
    tpu.vector_store %arg13[%241, %c0_116, %c0_117], %244 {strides = array<i32>} : memref<8x2x128xf32, #tpu.memory_space<vmem>>, vector<1x2x128xf32>,
    %c6_i32 = arith.constant 6 : i32
    %c0_118 = arith.constant 0 : index
    %c0_119 = arith.constant 0 : index
    %245 = vector.load %arg10[%c0_118, %c0_119] : memref<2x128xf32, #tpu.memory_space<vmem>>, vector<2x128xf32>
    %c0_120 = arith.constant 0 : index
    %c0_121 = arith.constant 0 : index
    %246 = vector.load %arg11[%c0_120, %c0_121] : memref<2x128xf32, #tpu.memory_space<vmem>>, vector<2x128xf32>
    %247 = arith.index_cast %c6_i32 : i32 to index
    %c0_122 = arith.constant 0 : index
    %c0_123 = arith.constant 0 : index
    %248 = vector.load %arg12[%247, %c0_122, %c0_123] : memref<8x2x512xf32, #tpu.memory_space<vmem>>, vector<1x2x512xf32>
    %249 = vector.shape_cast %248 : vector<1x2x512xf32> to vector<2x512xf32>
    %c0_124 = arith.constant 0 : index
    %c0_125 = arith.constant 0 : index
    %250 = vector.load %arg3[%c0_124, %c0_125] : memref<128x512xf32, #tpu.memory_space<vmem>>, vector<128x512xf32>
    %cst_126 = arith.constant dense<0.000000e+00> : vector<2x512xf32>
    %251 = tpu.matmul %245, %250, %cst_126 {dimension_numbers = #tpu.dot_dimension_numbers<[1], [0], [0], [1], [0, 0, 1, 1], [], []>} : vector<2x128xf32>, vector<128x512xf32>, vector<2x512xf32> -> vector<2x512xf32>
    %252 = arith.addf %249, %251 : vector<2x512xf32>
    %253 = vector.extract_strided_slice %252 {offsets = [0, 0], sizes = [2, 128], strides = [1, 1]} : vector<2x512xf32> to vector<2x128xf32>
    %254 = arith.negf %253 : vector<2x128xf32>
    %255 = math.exp %254 : vector<2x128xf32>
    %cst_127 = arith.constant 1.000000e+00 : f32
    %256 = vector.broadcast %cst_127 : f32 to vector<2x128xf32>
    %257 = arith.addf %256, %255 : vector<2x128xf32>
    %258 = arith.divf %256, %257 : vector<2x128xf32>
    %259 = vector.extract_strided_slice %252 {offsets = [0, 128], sizes = [2, 128], strides = [1, 1]} : vector<2x512xf32> to vector<2x128xf32>
    %260 = arith.negf %259 : vector<2x128xf32>
    %261 = math.exp %260 : vector<2x128xf32>
    %cst_128 = arith.constant 1.000000e+00 : f32
    %262 = vector.broadcast %cst_128 : f32 to vector<2x128xf32>
    %263 = arith.addf %262, %261 : vector<2x128xf32>
    %264 = arith.divf %262, %263 : vector<2x128xf32>
    %265 = vector.extract_strided_slice %252 {offsets = [0, 256], sizes = [2, 128], strides = [1, 1]} : vector<2x512xf32> to vector<2x128xf32>
    %266 = math.tanh %265 : vector<2x128xf32>
    %267 = vector.extract_strided_slice %252 {offsets = [0, 384], sizes = [2, 128], strides = [1, 1]} : vector<2x512xf32> to vector<2x128xf32>
    %268 = arith.negf %267 : vector<2x128xf32>
    %269 = math.exp %268 : vector<2x128xf32>
    %cst_129 = arith.constant 1.000000e+00 : f32
    %270 = vector.broadcast %cst_129 : f32 to vector<2x128xf32>
    %271 = arith.addf %270, %269 : vector<2x128xf32>
    %272 = arith.divf %270, %271 : vector<2x128xf32>
    %273 = arith.mulf %264, %246 : vector<2x128xf32>
    %274 = arith.mulf %258, %266 : vector<2x128xf32>
    %275 = arith.addf %273, %274 : vector<2x128xf32>
    %276 = math.tanh %275 : vector<2x128xf32>
    %277 = arith.mulf %272, %276 : vector<2x128xf32>
    %c0_130 = arith.constant 0 : index
    %c0_131 = arith.constant 0 : index
    %278 = vector.load %arg11[%c0_130, %c0_131] : memref<2x128xf32, #tpu.memory_space<vmem>>, vector<2x128xf32>
    tpu.vector_store %arg11[%c0_130, %c0_131], %275 {strides = array<i32>} : memref<2x128xf32, #tpu.memory_space<vmem>>, vector<2x128xf32>,
    %c0_132 = arith.constant 0 : index
    %c0_133 = arith.constant 0 : index
    %279 = vector.load %arg10[%c0_132, %c0_133] : memref<2x128xf32, #tpu.memory_space<vmem>>, vector<2x128xf32>
    tpu.vector_store %arg10[%c0_132, %c0_133], %277 {strides = array<i32>} : memref<2x128xf32, #tpu.memory_space<vmem>>, vector<2x128xf32>,
    %280 = arith.index_cast %c6_i32 : i32 to index
    %c0_134 = arith.constant 0 : index
    %c0_135 = arith.constant 0 : index
    %281 = vector.load %arg13[%280, %c0_134, %c0_135] : memref<8x2x128xf32, #tpu.memory_space<vmem>>, vector<1x2x128xf32>
    %282 = vector.shape_cast %281 : vector<1x2x128xf32> to vector<2x128xf32>
    %283 = vector.shape_cast %277 : vector<2x128xf32> to vector<1x2x128xf32>
    tpu.vector_store %arg13[%280, %c0_134, %c0_135], %283 {strides = array<i32>} : memref<8x2x128xf32, #tpu.memory_space<vmem>>, vector<1x2x128xf32>,
    %c7_i32 = arith.constant 7 : i32
    %c0_136 = arith.constant 0 : index
    %c0_137 = arith.constant 0 : index
    %284 = vector.load %arg10[%c0_136, %c0_137] : memref<2x128xf32, #tpu.memory_space<vmem>>, vector<2x128xf32>
    %c0_138 = arith.constant 0 : index
    %c0_139 = arith.constant 0 : index
    %285 = vector.load %arg11[%c0_138, %c0_139] : memref<2x128xf32, #tpu.memory_space<vmem>>, vector<2x128xf32>
    %286 = arith.index_cast %c7_i32 : i32 to index
    %c0_140 = arith.constant 0 : index
    %c0_141 = arith.constant 0 : index
    %287 = vector.load %arg12[%286, %c0_140, %c0_141] : memref<8x2x512xf32, #tpu.memory_space<vmem>>, vector<1x2x512xf32>
    %288 = vector.shape_cast %287 : vector<1x2x512xf32> to vector<2x512xf32>
    %c0_142 = arith.constant 0 : index
    %c0_143 = arith.constant 0 : index
    %289 = vector.load %arg3[%c0_142, %c0_143] : memref<128x512xf32, #tpu.memory_space<vmem>>, vector<128x512xf32>
    %cst_144 = arith.constant dense<0.000000e+00> : vector<2x512xf32>
    %290 = tpu.matmul %284, %289, %cst_144 {dimension_numbers = #tpu.dot_dimension_numbers<[1], [0], [0], [1], [0, 0, 1, 1], [], []>} : vector<2x128xf32>, vector<128x512xf32>, vector<2x512xf32> -> vector<2x512xf32>
    %291 = arith.addf %288, %290 : vector<2x512xf32>
    %292 = vector.extract_strided_slice %291 {offsets = [0, 0], sizes = [2, 128], strides = [1, 1]} : vector<2x512xf32> to vector<2x128xf32>
    %293 = arith.negf %292 : vector<2x128xf32>
    %294 = math.exp %293 : vector<2x128xf32>
    %cst_145 = arith.constant 1.000000e+00 : f32
    %295 = vector.broadcast %cst_145 : f32 to vector<2x128xf32>
    %296 = arith.addf %295, %294 : vector<2x128xf32>
    %297 = arith.divf %295, %296 : vector<2x128xf32>
    %298 = vector.extract_strided_slice %291 {offsets = [0, 128], sizes = [2, 128], strides = [1, 1]} : vector<2x512xf32> to vector<2x128xf32>
    %299 = arith.negf %298 : vector<2x128xf32>
    %300 = math.exp %299 : vector<2x128xf32>
    %cst_146 = arith.constant 1.000000e+00 : f32
    %301 = vector.broadcast %cst_146 : f32 to vector<2x128xf32>
    %302 = arith.addf %301, %300 : vector<2x128xf32>
    %303 = arith.divf %301, %302 : vector<2x128xf32>
    %304 = vector.extract_strided_slice %291 {offsets = [0, 256], sizes = [2, 128], strides = [1, 1]} : vector<2x512xf32> to vector<2x128xf32>
    %305 = math.tanh %304 : vector<2x128xf32>
    %306 = vector.extract_strided_slice %291 {offsets = [0, 384], sizes = [2, 128], strides = [1, 1]} : vector<2x512xf32> to vector<2x128xf32>
    %307 = arith.negf %306 : vector<2x128xf32>
    %308 = math.exp %307 : vector<2x128xf32>
    %cst_147 = arith.constant 1.000000e+00 : f32
    %309 = vector.broadcast %cst_147 : f32 to vector<2x128xf32>
    %310 = arith.addf %309, %308 : vector<2x128xf32>
    %311 = arith.divf %309, %310 : vector<2x128xf32>
    %312 = arith.mulf %303, %285 : vector<2x128xf32>
    %313 = arith.mulf %297, %305 : vector<2x128xf32>
    %314 = arith.addf %312, %313 : vector<2x128xf32>
    %315 = math.tanh %314 : vector<2x128xf32>
    %316 = arith.mulf %311, %315 : vector<2x128xf32>
    %c0_148 = arith.constant 0 : index
    %c0_149 = arith.constant 0 : index
    %317 = vector.load %arg11[%c0_148, %c0_149] : memref<2x128xf32, #tpu.memory_space<vmem>>, vector<2x128xf32>
    tpu.vector_store %arg11[%c0_148, %c0_149], %314 {strides = array<i32>} : memref<2x128xf32, #tpu.memory_space<vmem>>, vector<2x128xf32>,
    %c0_150 = arith.constant 0 : index
    %c0_151 = arith.constant 0 : index
    %318 = vector.load %arg10[%c0_150, %c0_151] : memref<2x128xf32, #tpu.memory_space<vmem>>, vector<2x128xf32>
    tpu.vector_store %arg10[%c0_150, %c0_151], %316 {strides = array<i32>} : memref<2x128xf32, #tpu.memory_space<vmem>>, vector<2x128xf32>,
    %319 = arith.index_cast %c7_i32 : i32 to index
    %c0_152 = arith.constant 0 : index
    %c0_153 = arith.constant 0 : index
    %320 = vector.load %arg13[%319, %c0_152, %c0_153] : memref<8x2x128xf32, #tpu.memory_space<vmem>>, vector<1x2x128xf32>
    %321 = vector.shape_cast %320 : vector<1x2x128xf32> to vector<2x128xf32>
    %322 = vector.shape_cast %316 : vector<2x128xf32> to vector<1x2x128xf32>
    tpu.vector_store %arg13[%319, %c0_152, %c0_153], %322 {strides = array<i32>} : memref<8x2x128xf32, #tpu.memory_space<vmem>>, vector<1x2x128xf32>,
    %c8_i32 = arith.constant 8 : i32
    %c0_154 = arith.constant 0 : index
    %c0_155 = arith.constant 0 : index
    %c0_156 = arith.constant 0 : index
    %323 = vector.load %arg13[%c0_154, %c0_155, %c0_156] : memref<8x2x128xf32, #tpu.memory_space<vmem>>, vector<8x2x128xf32>
    %324 = vector.shape_cast %323 : vector<8x2x128xf32> to vector<16x128xf32>
    %c0_157 = arith.constant 0 : index
    %c0_158 = arith.constant 0 : index
    %325 = vector.load %arg5[%c0_157, %c0_158] : memref<128x4xf32, #tpu.memory_space<vmem>>, vector<128x4xf32>
    %cst_159 = arith.constant dense<0.000000e+00> : vector<16x4xf32>
    %326 = tpu.matmul %324, %325, %cst_159 {dimension_numbers = #tpu.dot_dimension_numbers<[1], [0], [0], [1], [0, 0, 1, 1], [], []>} : vector<16x128xf32>, vector<128x4xf32>, vector<16x4xf32> -> vector<16x4xf32>
    %c0_160 = arith.constant 0 : index
    %c0_161 = arith.constant 0 : index
    %327 = vector.load %arg6[%c0_160, %c0_161] : memref<1x4xf32, #tpu.memory_space<vmem>>, vector<1x4xf32>
    %328 = vector.broadcast %327 : vector<1x4xf32> to vector<16x4xf32>
    %329 = arith.addf %326, %328 : vector<16x4xf32>
    %c0_162 = arith.constant 0 : index
    %c0_163 = arith.constant 0 : index
    %330 = vector.load %arg7[%c0_162, %c0_163] : memref<16x4xf32, #tpu.memory_space<vmem>>, vector<16x4xf32>
    tpu.vector_store %arg7[%c0_162, %c0_163], %329 {strides = array<i32>} : memref<16x4xf32, #tpu.memory_space<vmem>>, vector<16x4xf32>,
    %c0_164 = arith.constant 0 : index
    %c0_165 = arith.constant 0 : index
    %331 = vector.load %arg10[%c0_164, %c0_165] : memref<2x128xf32, #tpu.memory_space<vmem>>, vector<2x128xf32>
    %c0_166 = arith.constant 0 : index
    %c0_167 = arith.constant 0 : index
    %332 = vector.load %arg8[%c0_166, %c0_167] : memref<2x128xf32, #tpu.memory_space<vmem>>, vector<2x128xf32>
    tpu.vector_store %arg8[%c0_166, %c0_167], %331 {strides = array<i32>} : memref<2x128xf32, #tpu.memory_space<vmem>>, vector<2x128xf32>,
    %c0_168 = arith.constant 0 : index
    %c0_169 = arith.constant 0 : index
    %333 = vector.load %arg11[%c0_168, %c0_169] : memref<2x128xf32, #tpu.memory_space<vmem>>, vector<2x128xf32>
    %c0_170 = arith.constant 0 : index
    %c0_171 = arith.constant 0 : index
    %334 = vector.load %arg9[%c0_170, %c0_171] : memref<2x128xf32, #tpu.memory_space<vmem>>, vector<2x128xf32>
    tpu.vector_store %arg9[%c0_170, %c0_171], %333 {strides = array<i32>} : memref<2x128xf32, #tpu.memory_space<vmem>>, vector<2x128xf32>,
    return
  }
  func.func @transform_0(%arg0: i32) -> (i32, i32) {
    %c0_i32 = arith.constant 0 : i32
    %c0_i32_0 = arith.constant 0 : i32
    return %arg0, %c0_i32 : i32, i32
  }
  func.func @transform_1(%arg0: i32) -> (i32, i32) {
    %c0_i32 = arith.constant 0 : i32
    %c0_i32_0 = arith.constant 0 : i32
    %c0_i32_1 = arith.constant 0 : i32
    return %c0_i32, %c0_i32_0 : i32, i32
  }
  func.func @transform_2(%arg0: i32) -> (i32, i32) {
    %c0_i32 = arith.constant 0 : i32
    %c0_i32_0 = arith.constant 0 : i32
    %c0_i32_1 = arith.constant 0 : i32
    return %c0_i32, %c0_i32_0 : i32, i32
  }
  func.func @transform_3(%arg0: i32) -> (i32, i32) {
    %c0_i32 = arith.constant 0 : i32
    %c0_i32_0 = arith.constant 0 : i32
    %c0_i32_1 = arith.constant 0 : i32
    return %c0_i32, %c0_i32_0 : i32, i32
  }
  func.func @transform_4(%arg0: i32) -> (i32, i32) {
    %c0_i32 = arith.constant 0 : i32
    %c0_i32_0 = arith.constant 0 : i32
    %c0_i32_1 = arith.constant 0 : i32
    return %c0_i32, %c0_i32_0 : i32, i32
  }
  func.func @transform_5(%arg0: i32) -> (i32, i32) {
    %c0_i32 = arith.constant 0 : i32
    %c0_i32_0 = arith.constant 0 : i32
    %c0_i32_1 = arith.constant 0 : i32
    return %c0_i32, %c0_i32_0 : i32, i32
  }
  func.func @transform_6(%arg0: i32) -> (i32, i32) {
    %c0_i32 = arith.constant 0 : i32
    %c0_i32_0 = arith.constant 0 : i32
    return %arg0, %c0_i32 : i32, i32
  }
  func.func @transform_7(%arg0: i32) -> (i32, i32) {
    %c0_i32 = arith.constant 0 : i32
    %c0_i32_0 = arith.constant 0 : i32
    %c0_i32_1 = arith.constant 0 : i32
    return %c0_i32, %c0_i32_0 : i32, i32
  }
  func.func @transform_8(%arg0: i32) -> (i32, i32) {
    %c0_i32 = arith.constant 0 : i32
    %c0_i32_0 = arith.constant 0 : i32
    %c0_i32_1 = arith.constant 0 : i32
    return %c0_i32, %c0_i32_0 : i32, i32
  }
}

</mosaic_0001>

<bundles_post_ra>
// kernel: tpu_custom_call.1
= control target key start
LH: loop header
LB: loop body
LE: loop exit
PB: predicated region body
PF: predicated region fallthrough
CT: control target
= control target key end

     0   :  { %14 = vsyncpa [#allocation7], 0  ;;  %s3710_s0 = inlined_call_operand.vmem [shape: f32[16,4], index: 0, kind: input, shape index: {}]   ;;  %s3711_s1 = inlined_call_operand.vmem [shape: f32[4,512], index: 1, kind: input, shape index: {}]   ;;  %s3712_s2 = inlined_call_operand.hbm [shape: f32[128,512], index: 2, kind: input, shape index: {}]   ;;  %s3713_s3 = inlined_call_operand.vmem [shape: f32[1,512], index: 3, kind: input, shape index: {}]   ;;  %s3714_s4 = inlined_call_operand.vmem [shape: f32[128,4], index: 4, kind: input, shape index: {}]   ;;  %s3715_s5 = inlined_call_operand.vmem [shape: f32[1,4], index: 5, kind: input, shape index: {}]   ;;  %s3716_s6 = inlined_call_operand.vmem [shape: f32[16,4], index: 6, kind: output, shape index: {0}]   ;;  %s3717_s7 = inlined_call_operand.hbm [shape: f32[2,128], index: 7, kind: output, shape index: {1}]   ;;  %s3718_s8 = inlined_call_operand.hbm [shape: f32[2,128], index: 8, kind: output, shape index: {2}]  }
   0x1   :  { %15 = vsyncpa [#allocation8], 0 }
   0x2   :  { %16 = vsyncpa [#allocation11], 0  ;;  %s25_s29 = sshll.u32 %s3712_s2, 4  ;;  %s2486_s30 = smov [#allocation6]   ;;  %s26_s29 = int_to_ptr.hbm [resolvable:$true] %s25_s29 }
   0x3   :  { %s27_s9 = sshll.u32 %s2486_s30, 4  ;;  %s2487_s10 = smov 512   ;;  %s28_s9 = int_to_ptr.vmem [resolvable:$true] %s27_s9 }
   0x4   :  { %s2488_s11 = smov 32  }
   0x5   :  { %33 = dma.hbm_to_vmem [thread:$0]  %s26_s29, 8192, %s28_s9, [#allocation7], %s2487_s10, %s2487_s10, %s2488_s11  }
   0x6   :  { %2480 = dma.done.wait [#allocation7], 8192  }
   0x7   :  { %2481 = vsyncadd [#allocation7], 4294959104  ;;  %v2540_v0 = vld [vmem:[#allocation6 + $0x1e0] sm:$0xff]  ;;  %v53_v5 = vld [vmem:[%s3711_s1 + $0x8] sm:$0xff]  ;;  %vm80_vm0 = vcmask 1043456   ;;  %vm73_vm1 = vcmask 31744  }
   0x8   :  { %v2542_v1 = vld [vmem:[#allocation6 + $0x1c0] sm:$0xff]  ;;  %313 = vmatpush.msra.mxu1 %v2540_v0  ;;  %68 = vst [vmem:[#allocation1 + $0x10] ss:$2 sm:$0xff] %v53_v5  ;;  %v2577_v13 = vld [vmem:[#allocation6 + $0x1f0] sm:$0xff]  ;;  %v2579_v14 = vld [vmem:[#allocation6 + $0x1f8] sm:$0xff]  ;;  %v2489_v22 = vmov 0.0  }
   0x9   :  { %v52_v2 = vld [vmem:[%s3711_s1] sm:$0xff]  ;;  %v2592_v18 = vld [vmem:[#allocation6 + $0x1d0] sm:$0xff]  ;;  %v2594_v19 = vld [vmem:[#allocation6 + $0x1d8] sm:$0xff]  ;;  %48 = vst [vmem:[#allocation2] sm:$0x3] %v2489_v22  ;;  %vm197_vm2 = vcmask 1045508  }
   0xa   :  { %v2548_v3 = vld [vmem:[#allocation6 + $0x1a0] sm:$0xff]  ;;  %66 = vst [vmem:[#allocation1] ss:$2 sm:$0xff] %v52_v2  ;;  %314 = vmatpush.msra.mxu1 %v2542_v1  ;;  %v2599_v20 = vld [vmem:[%s3710_s0 + $0x8] sm:$0xff]  ;;  %v2608_v24 = vld [vmem:[#allocation6 + $0x1b8] sm:$0xff]  ;;  %vm200_vm3 = vcmask 1043458  }
   0xb   :  { %v2551_v4 = vld [vmem:[#allocation6 + $0x180] sm:$0xff]  ;;  %v2606_v23 = vld [vmem:[#allocation6 + $0x1b0] sm:$0xff]  ;;  %49 = vst [vmem:[#allocation3] sm:$0x3] %v2489_v22  ;;  %v2620_v27 = vld [vmem:[#allocation6 + $0x198] sm:$0xff]  ;;  %vm202_vm4 = vcmask 1045504  }
   0xc   :  { %315 = vmatpush.msra.mxu1 %v2548_v3  ;;  %v2557_v6 = vld [vmem:[#allocation6 + $0x160] sm:$0xff]  ;;  %v2618_v26 = vld [vmem:[#allocation6 + $0x190] sm:$0xff]  ;;  %v2629_v30 = vld [vmem:[#allocation6 + $0x178] sm:$0xff]  ;;  %vm195_vm5 = vcmask 1041408   ;;  %vm204_vm6 = vcmask 1045506   ;;  %s2490_s26 = smov [#allocation9]  }
   0xd   :  { %v2563_v7 = vld [vmem:[%s3710_s0] sm:$0xff]  ;;  %v2627_v29 = vld [vmem:[#allocation6 + $0x170] sm:$0xff]  ;;  %v2642_v33 = vld [vmem:[#allocation6 + $0x158] sm:$0xff]  ;;  %s2207_s27 = sshll.u32 %s2490_s26, 4  ;;  %s2209_s30 = sshll.u32 %s3717_s7, 4  ;;  %s2208_s27 = int_to_ptr.vmem [resolvable:$true] %s2207_s27  ;;  %s2210_s30 = int_to_ptr.hbm [resolvable:$true] %s2209_s30 }
   0xe   :  { %316 = vmatpush.msra.mxu1 %v2551_v4  ;;  %v2565_v8 = vld [vmem:[#allocation6 + $0x140] sm:$0xff]  ;;  %v2640_v32 = vld [vmem:[#allocation6 + $0x150] sm:$0xff]  ;;  %v2651_v36 = vld [vmem:[#allocation6 + $0x138] sm:$0xff]  ;;  %s2491_s9 = smov [#allocation10]   ;;  %s2220_s13 = sshll.u32 %s3718_s8, 4  ;;  %s2221_s13 = int_to_ptr.hbm [resolvable:$true] %s2220_s13 }
   0xf   :  { %v2569_v11 = vld [vmem:[#allocation6 + $0x120] sm:$0xff]  ;;  %v71_v15 = vld.sshfl [vmem:[#allocation1 + $0x10] sm:$0xff pattern:$0x75316420]  ;;  %v2670_v41 = vld [vmem:[#allocation6 + $0x1e8] sm:$0xff]  ;;  %s2218_s10 = sshll.u32 %s2491_s9, 4  ;;  %s2219_s10 = int_to_ptr.vmem [resolvable:$true] %s2218_s10 }
  0x10   :  { %317 = vmatpush.msra.mxu1 %v2557_v6  ;;  %v2575_v12 = vld [vmem:[#allocation6 + $0x100] sm:$0xff]  ;;  %v2649_v35 = vld [vmem:[#allocation6 + $0x130] sm:$0xff]  ;;  %v2663_v39 = vld [vmem:[#allocation6 + $0x118] sm:$0xff] }
  0x11   :  { %v70_v9 = vld.sshfl [vmem:[#allocation1 + $0x8] sm:$0xff pattern:$0x75316420]  ;;  %v69_v10 = vld.sshfl [vmem:[#allocation1] sm:$0xff pattern:$0x75316420] }
  0x12   :  { %2240 = vmatpush.msk.msra.mxu2 %vm80_vm0, %v70_v9  ;;  %2237 = vmatpush.msk.msra.mxu0 %vm80_vm0, %v69_v10  ;;  %v72_v16 = vld.sshfl [vmem:[#allocation1 + $0x18] sm:$0xff pattern:$0x75316420]  ;;  %v2661_v38 = vld [vmem:[#allocation6 + $0x110] sm:$0xff]  ;;  %v2679_v44 = vld [vmem:[#allocation2] sm:$0x3] }
  0x13   :  { %2241 = vmatmul.msk.f32.vlgmr.msra.gmra.mxu2 %vm73_vm1, %v2563_v7  ;;  %318 = vmatpush.msra.mxu1 %v2565_v8  ;;  %v2585_v17 = vld [vmem:[#allocation6 + $0xe0] sm:$0xff]  ;;  %v2672_v42 = vld [vmem:[#allocation6 + $0xf0] sm:$0xff]  ;;  %v2677_v43 = vld [vmem:[#allocation6 + $0xf8] sm:$0xff] }
  0x14   :  { %2238 = vmatmul.msk.f32.vlgmr.msra.gmra.mxu0 %vm73_vm1, %v2563_v7  ;;  %2243 = vmatpush.msk.msrb.mxu2 %vm80_vm0, %v71_v15  ;;  %v2601_v21 = vld [vmem:[#allocation6 + $0xc0] sm:$0xff]  ;;  %v2682_v45 = vld [vmem:[#allocation6 + $0x1c8] sm:$0xff]  ;;  %v2684_v46 = vld [vmem:[#allocation6 + $0xd0] sm:$0xff] }
  0x15   :  { %319 = vmatpush.msra.mxu1 %v2569_v11  ;;  %546 = vmatpush.msrb.mxu0 %v2540_v0  ;;  %v2611_v25 = vld [vmem:[#allocation6 + $0xa0] sm:$0xff]  ;;  %v2689_v47 = vld [vmem:[#allocation6 + $0xd8] sm:$0xff]  ;;  %v2691_v48 = vld [vmem:[#allocation6 + $0x1a8] sm:$0xff] }
  0x16   :  { %2246 = vmatpush.msk.msra.mxu3 %vm80_vm0, %v72_v16  ;;  %353 = vmatpush.msra.mxu2 %v2577_v13  ;;  %v2622_v28 = vld [vmem:[#allocation6 + $0x80] sm:$0xff]  ;;  %v2694_v49 = vld [vmem:[#allocation6 + $0xb0] sm:$0xff]  ;;  %v2699_v50 = vld [vmem:[#allocation6 + $0xb8] sm:$0xff] }
  0x17   :  { %320 = vmatpush.msra.mxu1 %v2575_v12  ;;  %2247 = vmatmul.msk.f32.vlgmr.msra.gmra.mxu3 %vm73_vm1, %v2563_v7  ;;  %v2633_v31 = vld [vmem:[#allocation6 + $0x60] sm:$0xff]  ;;  %v2703_v51 = vld [vmem:[#allocation6 + $0x188] sm:$0xff]  ;;  %v2706_v52 = vld [vmem:[#allocation6 + $0x90] sm:$0xff] }
  0x18   :  { %373 = vmatpush.msrb.mxu3 %v2579_v14  ;;  %547 = vmatpush.msrb.mxu0 %v2542_v1  ;;  %v2644_v34 = vld [vmem:[#allocation6 + $0x40] sm:$0xff]  ;;  %v2710_v53 = vld [vmem:[#allocation6 + $0x98] sm:$0xff]  ;;  %v2712_v54 = vld [vmem:[#allocation6 + $0x168] sm:$0xff] }
  0x19   :  { %321 = vmatpush.msra.mxu1 %v2585_v17  ;;  %354 = vmatpush.msra.mxu2 %v2592_v18  ;;  %v2654_v37 = vld [vmem:[#allocation6 + $0x20] sm:$0xff]  ;;  %v2715_v55 = vld [vmem:[#allocation6 + $0x70] sm:$0xff]  ;;  %v2720_v56 = vld [vmem:[#allocation6 + $0x78] sm:$0xff] }
  0x1a   :  { %374 = vmatpush.msrb.mxu3 %v2594_v19  ;;  %548 = vmatpush.msrb.mxu0 %v2548_v3  ;;  %v2665_v40 = vld [vmem:[#allocation6] sm:$0xff]  ;;  %v2722_v57 = vld [vmem:[#allocation6 + $0x148] sm:$0xff]  ;;  %v2725_v58 = vld [vmem:[#allocation6 + $0x50] sm:$0xff] }
  0x1b   :  { %2242 = vmatmul.msk.f32.gmra.mxu2 %vm73_vm1, %v2599_v20  ;;  %322 = vmatpush.msra.mxu1 %v2601_v21  ;;  %v2730_v59 = vld [vmem:[#allocation6 + $0x58] sm:$0xff]  ;;  %v2732_v60 = vld [vmem:[#allocation6 + $0x128] sm:$0xff]  ;;  %v2735_v61 = vld [vmem:[#allocation6 + $0x30] sm:$0xff] }
  0x1c   :  { %355 = vmatpush.msra.mxu2 %v2606_v23  ;;  %375 = vmatpush.msrb.mxu3 %v2608_v24  ;;  %v2740_v62 = vld [vmem:[#allocation6 + $0x38] sm:$0xff]  ;;  %v2742_v63 = vld [vmem:[#allocation6 + $0x108] sm:$0xff]  ;;  %v2745_v2 = vld [vmem:[#allocation6 + $0x10] sm:$0xff] }
  0x1d   :  { %323 = vmatpush.msra.mxu1 %v2611_v25  ;;  %2239 = vmatmul.msk.f32.gmra.mxu0 %vm73_vm1, %v2599_v20  ;;  %v2750_v5 = vld [vmem:[#allocation6 + $0x18] sm:$0xff]  ;;  %v2770_v9 = vld [vmem:[#allocation6 + $0x88] sm:$0xff] }
  0x1e   :  { %356 = vmatpush.msra.mxu2 %v2618_v26  ;;  %376 = vmatpush.msrb.mxu3 %v2620_v27  ;;  %v2776_v10 = vld [vmem:[#allocation6 + $0x68] sm:$0xff] }
  0x1f   :  { %324 = vmatpush.msra.mxu1 %v2622_v28  ;;  %2248 = vmatmul.msk.f32.gmra.mxu3 %vm73_vm1, %v2599_v20  ;;  %v2794_v15 = vld [vmem:[#allocation6 + $0x8] sm:$0xff] }
  0x20   :  { %357 = vmatpush.msra.mxu2 %v2627_v29  ;;  %377 = vmatpush.msrb.mxu3 %v2629_v30 }
  0x21   :  { %325 = vmatpush.msra.mxu1 %v2633_v31  ;;  %549 = vmatpush.msrb.mxu0 %v2551_v4 }
  0x22   :  { %358 = vmatpush.msra.mxu2 %v2640_v32  ;;  %378 = vmatpush.msrb.mxu3 %v2642_v33 }
  0x23   :  { %2244 = vmatmul.msk.f32.vlgmr.msrb.gmra.mxu2 %vm73_vm1, %v2563_v7  ;;  %326 = vmatpush.msra.mxu1 %v2644_v34  ;;  %v2758_v7 = vld [vmem:[#allocation6 + $0xc8] sm:$0xff] }
  0x24   :  { %359 = vmatpush.msra.mxu2 %v2649_v35  ;;  %379 = vmatpush.msrb.mxu3 %v2651_v36 }
  0x25   :  { %327 = vmatpush.msra.mxu1 %v2654_v37  ;;  %550 = vmatpush.msrb.mxu0 %v2557_v6  ;;  %v2752_v6 = vld [vmem:[#allocation6 + $0xe8] sm:$0xff] }
  0x26   :  { %360 = vmatpush.msra.mxu2 %v2661_v38  ;;  %380 = vmatpush.msrb.mxu3 %v2663_v39 }
  0x27   :  { %328 = vmatpush.msra.mxu1 %v2665_v40  ;;  %551 = vmatpush.msrb.mxu0 %v2565_v8  ;;  %v2764_v8 = vld [vmem:[#allocation6 + $0xa8] sm:$0xff] }
  0x28   :  { %361 = vmatpush.msra.mxu2 %v2672_v42  ;;  %381 = vmatpush.msrb.mxu3 %v2677_v43 }
  0x29   :  { %333 = vmatpush.msrb.mxu1 %v2670_v41  ;;  %552 = vmatpush.msrb.mxu0 %v2569_v11  ;;  %v2782_v11 = vld [vmem:[#allocation6 + $0x48] sm:$0xff] }
  0x2a   :  { %329 = vmatmul.f32.vlgmr.msra.gmra.mxu1 %v2679_v44  ;;  %362 = vmatpush.msra.mxu2 %v2684_v46 }
  0x2b   :  { %334 = vmatpush.msrb.mxu1 %v2682_v45  ;;  %2245 = vmatmul.msk.f32.gmra.mxu2 %vm73_vm1, %v2599_v20 }
  0x2c   :  { %382 = vmatpush.msrb.mxu3 %v2689_v47  ;;  %363 = vmatpush.msra.mxu2 %v2694_v49 }
  0x2d   :  { %335 = vmatpush.msrb.mxu1 %v2691_v48  ;;  %553 = vmatpush.msrb.mxu0 %v2575_v12  ;;  %v2788_v12 = vld [vmem:[#allocation6 + $0x28] sm:$0xff] }
  0x2e   :  { %383 = vmatpush.msrb.mxu3 %v2699_v50  ;;  %364 = vmatpush.msra.mxu2 %v2706_v52 }
  0x2f   :  { %336 = vmatpush.msrb.mxu1 %v2703_v51  ;;  %554 = vmatpush.msrb.mxu0 %v2585_v17 }
  0x30   :  { %384 = vmatpush.msrb.mxu3 %v2710_v53  ;;  %365 = vmatpush.msra.mxu2 %v2715_v55 }
  0x31   :  { %337 = vmatpush.msrb.mxu1 %v2712_v54  ;;  %555 = vmatpush.msrb.mxu0 %v2601_v21 }
  0x32   :  { %385 = vmatpush.msrb.mxu3 %v2720_v56  ;;  %366 = vmatpush.msra.mxu2 %v2725_v58 }
  0x33   :  { %338 = vmatpush.msrb.mxu1 %v2722_v57  ;;  %556 = vmatpush.msrb.mxu0 %v2611_v25 }
  0x34   :  { %386 = vmatpush.msrb.mxu3 %v2730_v59  ;;  %367 = vmatpush.msra.mxu2 %v2735_v61 }
  0x35   :  { %339 = vmatpush.msrb.mxu1 %v2732_v60  ;;  %557 = vmatpush.msrb.mxu0 %v2622_v28 }
  0x36   :  { %387 = vmatpush.msrb.mxu3 %v2740_v62  ;;  %368 = vmatpush.msra.mxu2 %v2745_v2 }
  0x37   :  { %340 = vmatpush.msrb.mxu1 %v2742_v63  ;;  %369 = vmatmul.f32.vlgmr.msra.gmra.mxu2 %v2679_v44 }
  0x38   :  { %388 = vmatpush.msrb.mxu3 %v2750_v5  ;;  %586 = vmatpush.msrb.mxu2 %v2577_v13 }
  0x39   :  { %341 = vmatpush.msrb.mxu1 %v2752_v6  ;;  %389 = vmatmul.f32.vlgmr.msrb.gmra.mxu3 %v2679_v44 }
  0x3a   :  { %606 = vmatpush.msra.mxu3 %v2579_v14  ;;  %587 = vmatpush.msrb.mxu2 %v2592_v18 }
  0x3b   :  { %342 = vmatpush.msrb.mxu1 %v2758_v7  ;;  %558 = vmatpush.msrb.mxu0 %v2633_v31 }
  0x3c   :  { %607 = vmatpush.msra.mxu3 %v2594_v19  ;;  %588 = vmatpush.msrb.mxu2 %v2606_v23 }
  0x3d   :  { %343 = vmatpush.msrb.mxu1 %v2764_v8  ;;  %559 = vmatpush.msrb.mxu0 %v2644_v34 }
  0x3e   :  { %608 = vmatpush.msra.mxu3 %v2608_v24  ;;  %589 = vmatpush.msrb.mxu2 %v2618_v26 }
  0x3f   :  { %344 = vmatpush.msrb.mxu1 %v2770_v9  ;;  %560 = vmatpush.msrb.mxu0 %v2654_v37 }
  0x40   :  { %609 = vmatpush.msra.mxu3 %v2620_v27  ;;  %590 = vmatpush.msrb.mxu2 %v2627_v29 }
  0x41   :  { %345 = vmatpush.msrb.mxu1 %v2776_v10  ;;  %561 = vmatpush.msrb.mxu0 %v2665_v40 }
  0x42   :  { %610 = vmatpush.msra.mxu3 %v2629_v30  ;;  %591 = vmatpush.msrb.mxu2 %v2640_v32 }
  0x43   :  { %346 = vmatpush.msrb.mxu1 %v2782_v11  ;;  %780 = vmatpush.msra.mxu0 %v2540_v0  ;;  %v54_v0 = vld [vmem:[%s3713_s3] sm:$0xf] }
  0x44   :  { %611 = vmatpush.msra.mxu3 %v2642_v33  ;;  %592 = vmatpush.msrb.mxu2 %v2649_v35  ;;  %v58_v28 = vperm.slane %v54_v0, 2 }
  0x45   :  { %347 = vmatpush.msrb.mxu1 %v2788_v12  ;;  %781 = vmatpush.msra.mxu0 %v2542_v1 }
  0x46   :  { %612 = vmatpush.msra.mxu3 %v2651_v36  ;;  %593 = vmatpush.msrb.mxu2 %v2661_v38 }
  0x47   :  { %348 = vmatpush.msrb.mxu1 %v2794_v15  ;;  %782 = vmatpush.msra.mxu0 %v2548_v3  ;;  %v57_v3 = vperm.slane %v54_v0, 1 }
  0x48   :  { %349 = vmatmul.f32.vlgmr.msrb.gmra.mxu1 %v2679_v44  ;;  %613 = vmatpush.msra.mxu3 %v2663_v39 }
  0x49   :  { %566 = vmatpush.msra.mxu1 %v2670_v41  ;;  %594 = vmatpush.msrb.mxu2 %v2672_v42 }
  0x4a   :  { %614 = vmatpush.msra.mxu3 %v2677_v43  ;;  %783 = vmatpush.msra.mxu0 %v2551_v4  ;;  %v56_v4 = vperm.slane %v54_v0, 0 }
  0x4b   :  { %567 = vmatpush.msra.mxu1 %v2682_v45  ;;  %595 = vmatpush.msrb.mxu2 %v2684_v46 }
  0x4c   :  { %615 = vmatpush.msra.mxu3 %v2689_v47 }
  0x4d   :  { %568 = vmatpush.msra.mxu1 %v2691_v48  ;;  %596 = vmatpush.msrb.mxu2 %v2694_v49 }
  0x4e   :  { %616 = vmatpush.msra.mxu3 %v2699_v50 }
  0x4f   :  { %569 = vmatpush.msra.mxu1 %v2703_v51  ;;  %597 = vmatpush.msrb.mxu2 %v2706_v52 }
  0x50   :  { %617 = vmatpush.msra.mxu3 %v2710_v53 }
  0x51   :  { %570 = vmatpush.msra.mxu1 %v2712_v54  ;;  %598 = vmatpush.msrb.mxu2 %v2715_v55 }
  0x52   :  { %618 = vmatpush.msra.mxu3 %v2720_v56 }
  0x53   :  { %571 = vmatpush.msra.mxu1 %v2722_v57  ;;  %599 = vmatpush.msrb.mxu2 %v2725_v58 }
  0x54   :  { %619 = vmatpush.msra.mxu3 %v2730_v59 }
  0x55   :  { %572 = vmatpush.msra.mxu1 %v2732_v60  ;;  %600 = vmatpush.msrb.mxu2 %v2735_v61 }
  0x56   :  { %620 = vmatpush.msra.mxu3 %v2740_v62 }
  0x57   :  { %573 = vmatpush.msra.mxu1 %v2742_v63  ;;  %601 = vmatpush.msrb.mxu2 %v2745_v2 }
  0x58   :  { %621 = vmatpush.msra.mxu3 %v2750_v5 }
  0x59   :  { %574 = vmatpush.msra.mxu1 %v2752_v6  ;;  %820 = vmatpush.msra.mxu2 %v2577_v13 }
  0x5a   :  { %840 = vmatpush.msrb.mxu3 %v2579_v14 }
  0x5b   :  { %575 = vmatpush.msra.mxu1 %v2758_v7  ;;  %821 = vmatpush.msra.mxu2 %v2592_v18 }
  0x5c   :  { %841 = vmatpush.msrb.mxu3 %v2594_v19 }
  0x5d   :  { %576 = vmatpush.msra.mxu1 %v2764_v8  ;;  %822 = vmatpush.msra.mxu2 %v2606_v23 }
  0x5e   :  { %842 = vmatpush.msrb.mxu3 %v2608_v24  ;;  %v59_v24 = vperm.slane %v54_v0, 3 }
  0x5f   :  { %577 = vmatpush.msra.mxu1 %v2770_v9  ;;  %823 = vmatpush.msra.mxu2 %v2618_v26 }
  0x60   :  { %843 = vmatpush.msrb.mxu3 %v2620_v27 }
  0x61   :  { %578 = vmatpush.msra.mxu1 %v2776_v10  ;;  %824 = vmatpush.msra.mxu2 %v2627_v29 }
  0x62   :  { %844 = vmatpush.msrb.mxu3 %v2629_v30 }
  0x63   :  { %579 = vmatpush.msra.mxu1 %v2782_v11  ;;  %825 = vmatpush.msra.mxu2 %v2640_v32 }
  0x64   :  { %845 = vmatpush.msrb.mxu3 %v2642_v33 }
  0x65   :  { %580 = vmatpush.msra.mxu1 %v2788_v12  ;;  %826 = vmatpush.msra.mxu2 %v2649_v35 }
  0x66   :  { %846 = vmatpush.msrb.mxu3 %v2651_v36 }
  0x67   :  { %581 = vmatpush.msra.mxu1 %v2794_v15  ;;  %827 = vmatpush.msra.mxu2 %v2661_v38 }
  0x68   :  { %847 = vmatpush.msrb.mxu3 %v2663_v39 }
  0x69   :  { %800 = vmatpush.msrb.mxu1 %v2670_v41  ;;  %828 = vmatpush.msra.mxu2 %v2672_v42 }
  0x6a   :  { %848 = vmatpush.msrb.mxu3 %v2677_v43 }
  0x6b   :  { %801 = vmatpush.msrb.mxu1 %v2682_v45  ;;  %829 = vmatpush.msra.mxu2 %v2684_v46 }
  0x6c   :  { %849 = vmatpush.msrb.mxu3 %v2689_v47 }
  0x6d   :  { %802 = vmatpush.msrb.mxu1 %v2691_v48  ;;  %830 = vmatpush.msra.mxu2 %v2694_v49 }
  0x6e   :  { %850 = vmatpush.msrb.mxu3 %v2699_v50 }
  0x6f   :  { %803 = vmatpush.msrb.mxu1 %v2703_v51  ;;  %831 = vmatpush.msra.mxu2 %v2706_v52 }
  0x70   :  { %851 = vmatpush.msrb.mxu3 %v2710_v53 }
  0x71   :  { %804 = vmatpush.msrb.mxu1 %v2712_v54  ;;  %832 = vmatpush.msra.mxu2 %v2715_v55 }
  0x72   :  { %852 = vmatpush.msrb.mxu3 %v2720_v56 }
  0x73   :  { %805 = vmatpush.msrb.mxu1 %v2722_v57  ;;  %833 = vmatpush.msra.mxu2 %v2725_v58 }
  0x74   :  { %853 = vmatpush.msrb.mxu3 %v2730_v59 }
  0x75   :  { %806 = vmatpush.msrb.mxu1 %v2732_v60  ;;  %834 = vmatpush.msra.mxu2 %v2735_v61 }
  0x76   :  { %854 = vmatpush.msrb.mxu3 %v2740_v62 }
  0x77   :  { %807 = vmatpush.msrb.mxu1 %v2742_v63  ;;  %835 = vmatpush.msra.mxu2 %v2745_v2 }
  0x78   :  { %855 = vmatpush.msrb.mxu3 %v2750_v5 }
  0x79   :  { %808 = vmatpush.msrb.mxu1 %v2752_v6 }
  0x7b   :  { %809 = vmatpush.msrb.mxu1 %v2758_v7 }
  0x7d   :  { %810 = vmatpush.msrb.mxu1 %v2764_v8 }
  0x7f   :  { %811 = vmatpush.msrb.mxu1 %v2770_v9 }
  0x81   :  { %812 = vmatpush.msrb.mxu1 %v2776_v10 }
  0x83   :  { %813 = vmatpush.msrb.mxu1 %v2782_v11 }
  0x85   :  { %814 = vmatpush.msrb.mxu1 %v2788_v12 }
  0x87   :  { %815 = vmatpush.msrb.mxu1 %v2794_v15 }
  0x91   :  { %v106_v1 = vpop.f32.mrf.mxu0 }
  0x92   :  { %v107_v16 = vadd.f32 %v106_v1, %v56_v4 }
  0x96   :  { %v129_v13 = vpop.f32.mrf.mxu2 }
  0x97   :  { %v130_v14 = vadd.f32 %v129_v13, %v57_v3 }
  0x99   :  { %v189_v17 = vrot.slane %v130_v14, 6 }
  0x9a   :  { %v175_v18 = vpop.f32.mrf.mxu3  ;;  %v109_v22 = vpop.f32.mrf.mxu0 }
  0x9b   :  { %v201_v19 = vsel %vm200_vm3, %v107_v16, %v189_v17  ;;  %v207_v20 = vsel %vm197_vm2, %v107_v16, %v189_v17  ;;  %v211_v21 = vsel %vm202_vm4, %v189_v17, %v107_v16  ;;  %v110_v26 = vadd.f32 %v109_v22, %v56_v4 }
  0x9c   :  { %v176_v29 = vadd.f32 %v175_v18, %v59_v24  ;;  %v196_v5 = vsel %vm195_vm5, %v107_v16, %v189_v17 }
  0x9e   :  { %v132_v23 = vpop.f32.mrf.mxu2  ;;  %v191_v38 = vrot.slane %v176_v29, 2 }
  0x9f   :  { %v133_v25 = vadd.f32 %v132_v23, %v57_v3 }
  0xa1   :  { %v192_v27 = vrot.slane %v133_v25, 6 }
  0xa2   :  { %v178_v30 = vpop.f32.mrf.mxu3 }
  0xa3   :  { %v179_v31 = vadd.f32 %v178_v30, %v59_v24  ;;  %v215_v32 = vsel %vm195_vm5, %v110_v26, %v192_v27  ;;  %v218_v33 = vsel %vm200_vm3, %v110_v26, %v192_v27  ;;  %v222_v34 = vsel %vm197_vm2, %v110_v26, %v192_v27 }
  0xa4   :  { %v226_v35 = vsel %vm202_vm4, %v192_v27, %v110_v26 }
  0xa5   :  { %v194_v48 = vrot.slane %v179_v31, 2 }
  0xa6   :  { %v152_v36 = vpop.f32.mrf.mxu2 }
  0xa7   :  { %v153_v37 = vadd.f32 %v152_v36, %v58_v28  ;;  %v330_v58 = vpop.f32.mrf.mxu1 }
  0xa9   :  { %v190_v39 = vrot.slane %v153_v37, 4 }
  0xab   :  { %v203_v40 = vsel %vm202_vm4, %v191_v38, %v190_v39  ;;  %v208_v41 = vsel %vm195_vm5, %v190_v39, %v191_v38  ;;  %v212_v42 = vsel %vm200_vm3, %v190_v39, %v191_v38  ;;  %v198_v2 = vsel %vm197_vm2, %v190_v39, %v191_v38  ;;  %v247_v39 = vld [vmem:[#allocation3] sm:$0x3] }
  0xac   :  { %v2904_v43 = vsel %vm204_vm6, %v201_v19, %v203_v40  ;;  %v2907_v44 = vsel %vm80_vm0, %v208_v41, %v207_v20  ;;  %v2910_v45 = vsel %vm204_vm6, %v212_v42, %v211_v21  ;;  %v199_v9 = vsel %vm80_vm0, %v196_v5, %v198_v2 }
  0xad   :  { %3765 = vst [vmem:[#allocation15_spill] sm:$0xff] %v2910_v45  ;;  %v3140_v45 = vld [vmem:[#allocation6 + $0x30] sm:$0xff] }
  0xae   :  { %v155_v46 = vpop.f32.mrf.mxu2 }
  0xaf   :  { %v156_v47 = vadd.f32 %v155_v46, %v58_v28 }
  0xb1   :  { %v193_v49 = vrot.slane %v156_v47, 4 }
  0xb3   :  { %v216_v50 = vsel %vm197_vm2, %v193_v49, %v194_v48  ;;  %v219_v51 = vsel %vm202_vm4, %v194_v48, %v193_v49  ;;  %v223_v52 = vsel %vm195_vm5, %v193_v49, %v194_v48  ;;  %v227_v53 = vsel %vm200_vm3, %v193_v49, %v194_v48 }
  0xb4   :  { %v2917_v54 = vsel %vm80_vm0, %v215_v32, %v216_v50  ;;  %v2920_v55 = vsel %vm204_vm6, %v218_v33, %v219_v51  ;;  %v2923_v56 = vsel %vm80_vm0, %v223_v52, %v222_v34  ;;  %v2926_v57 = vsel %vm204_vm6, %v227_v53, %v226_v35 }
  0xb5   :  { %3766 = vst [vmem:[#allocation16_spill] sm:$0xff] %v2917_v54  ;;  %v3136_v54 = vld [vmem:[#allocation6 + $0x28] sm:$0xff] }
  0xb6   :  { %3767 = vst [vmem:[#allocation17_spill] sm:$0xff] %v2920_v55  ;;  %v3131_v55 = vld [vmem:[#allocation6 + $0x58] sm:$0xff] }
  0xb7   :  { %3768 = vst [vmem:[#allocation18_spill] sm:$0xff] %v2923_v56  ;;  %v3122_v56 = vld [vmem:[#allocation6 + $0x78] sm:$0xff] }
  0xb8   :  { %3769 = vst [vmem:[#allocation19_spill] sm:$0xff] %v2926_v57  ;;  %v3120_v57 = vld [vmem:[#allocation6 + $0x70] sm:$0xff] }
  0xb9   :  { %3780 = vst [vmem:[#allocation30_spill] sm:$0xff] %v3120_v57 }
  0xba   :  { %v370_v59 = vpop.f32.mrf.mxu2  ;;  %3781 = vst [vmem:[#allocation31_spill] sm:$0xff] %v3122_v56 }
  0xbb   :  { %v398_v61 = vrot.slane %v370_v59, 4  ;;  %3784 = vst [vmem:[#allocation34_spill] sm:$0xff] %v3131_v55 }
  0xbc   :  { %v390_v60 = vpop.f32.mrf.mxu3  ;;  %3785 = vst [vmem:[#allocation35_spill] sm:$0xff] %v3136_v54 }
  0xbd   :  { %v399_v62 = vrot.slane %v390_v60, 2 }
  0xbf   :  { %v401_v7 = vsel %vm197_vm2, %v398_v61, %v399_v62 }
  0xc5   :  { %v350_v63 = vpop.f32.mrf.mxu1 }
  0xc6   :  { %v397_v6 = vrot.slane %v350_v63, 6 }
  0xc8   :  { %v400_v8 = vsel %vm195_vm5, %v330_v58, %v397_v6 }
  0xc9   :  { %v402_v10 = vsel %vm80_vm0, %v400_v8, %v401_v7 }
  0xca   :  { %v404_v11 = vadd.f32 %v402_v10, %v199_v9 }
  0xcc   :  { %v2249_v12 = vmul.f32 -1.442695, %v404_v11  ;;  %v425_v15 = vrot.slane %v404_v11, 2  ;;  %v449_v0 = vrot.slane %v404_v11, 6  ;;  %v446_v23 = vrot.slane %v404_v11, 4 }
  0xce   :  { %2280 = vpow2.f32 %v2249_v12  ;;  %v2250_v1 = vmul.f32 -1.442695, %v425_v15  ;;  %v2251_v3 = vmul.f32 -1.442695, %v449_v0  ;;  %v206_v0 = vrot.slane %v2904_v43, 2 }
  0xd0   :  { %2282 = vpow2.f32 %v2250_v1 }
  0xd1   :  { %2284 = vpow2.f32 %v2251_v3 }
  0xd4   :  { %v2281_v4 = vpop.eup %2280 }
  0xd5   :  { %v408_v13 = vadd.f32 1.0, %v2281_v4  ;;  %v2938_v4 = vld [vmem:[#allocation6 + $0x160] sm:$0xff] }
  0xd6   :  { %v2283_v14 = vpop.eup %2282  ;;  %784 = vmatpush.msra.mxu0 %v2938_v4 }
  0xd7   :  { %v2285_v16 = vpop.eup %2284  ;;  %2286 = vrcp.f32 %v408_v13  ;;  %v430_v17 = vadd.f32 1.0, %v2283_v14  ;;  %v420_v27 = vand.u32 2147483648, %v408_v13  ;;  %v418_v29 = vand.u32 2147483647, %v408_v13  ;;  %v2941_v14 = vld [vmem:[#allocation6 + $0x140] sm:$0xff] }
  0xd8   :  { %v454_v18 = vadd.f32 1.0, %v2285_v16  ;;  %vm414_vm8 = vweird.f32 %v408_v13  ;;  %785 = vmatpush.msra.mxu0 %v2941_v14 }
  0xd9   :  { %2288 = vrcp.f32 %v430_v17  ;;  %v442_v32 = vand.u32 2147483648, %v430_v17  ;;  %v440_v34 = vand.u32 2147483647, %v430_v17  ;;  %v421_v36 = vor.u32 1.1754944e-38, %v420_v27 }
  0xda   :  { %2290 = vrcp.f32 %v454_v18  ;;  %vm419_vm11 = vcmp.eq.f32.partialorder %v418_v29, 8.507059e+37  ;;  %vm436_vm12 = vweird.f32 %v430_v17  ;;  %v466_v53 = vand.u32 2147483648, %v454_v18  ;;  %v2959_v29 = vld [vmem:[#allocation6 + $0x80] sm:$0xff] }
  0xdb   :  { %2292 = vtanh.f32 %v446_v23  ;;  %v443_v41 = vor.u32 1.1754944e-38, %v442_v32  ;;  %vm441_vm14 = vcmp.eq.f32.partialorder %v440_v34, 8.507059e+37  ;;  %vm460_vm3 = vweird.f32 %v454_v18  ;;  %v2953_v23 = vld [vmem:[#allocation6 + $0xc0] sm:$0xff] }
  0xdc   :  { %v464_v58 = vand.u32 2147483647, %v454_v18  ;;  %v467_v60 = vor.u32 1.1754944e-38, %v466_v53  ;;  %v2962_v32 = vld [vmem:[#allocation6 + $0x60] sm:$0xff] }
  0xdd   :  { %v2287_v19 = vpop.eup %2286  ;;  %3770 = vst [vmem:[#allocation20_spill] sm:$0xff] %v2962_v32  ;;  %v2967_v34 = vld [vmem:[#allocation6 + $0x20] sm:$0xff] }
  0xde   :  { %v410_v20 = vmul.f32 %v2287_v19, %v408_v13  ;;  %vm415_vm7 = vweird.f32 %v2287_v19  ;;  %vm465_vm6 = vcmp.eq.f32.partialorder %v464_v58, 8.507059e+37  ;;  %3772 = vst [vmem:[#allocation22_spill] sm:$0xff] %v2967_v34 }
  0xdf   :  { %v2289_v21 = vpop.eup %2288  ;;  %vm416_vm9 = vmor %vm414_vm8, %vm415_vm7 }
  0xe0   :  { %v411_v22 = vsub.f32 1.0, %v410_v20  ;;  %v2291_v24 = vpop.eup %2290  ;;  %v432_v25 = vmul.f32 %v2289_v21, %v430_v17  ;;  %vm437_vm10 = vweird.f32 %v2289_v21 }
  0xe1   :  { %v456_v28 = vmul.f32 %v2291_v24, %v454_v18  ;;  %vm438_vm13 = vmor %vm436_vm12, %vm437_vm10  ;;  %v2293_v46 = vpop.eup %2292  ;;  %vm461_vm15 = vweird.f32 %v2291_v24 }
  0xe2   :  { %v412_v26 = vmul.f32 %v2287_v19, %v411_v22  ;;  %v433_v30 = vsub.f32 1.0, %v432_v25  ;;  %vm462_vm4 = vmor %vm460_vm3, %vm461_vm15  ;;  %v2950_v22 = vld [vmem:[#allocation6 + $0xe0] sm:$0xff] }
  0xe3   :  { %v457_v37 = vsub.f32 1.0, %v456_v28 }
  0xe4   :  { %v413_v31 = vadd.f32 %v2287_v19, %v412_v26  ;;  %v434_v33 = vmul.f32 %v2289_v21, %v433_v30  ;;  %v2956_v26 = vld [vmem:[#allocation6 + $0xa0] sm:$0xff] }
  0xe5   :  { %v458_v48 = vmul.f32 %v2291_v24, %v457_v37 }
  0xe6   :  { %v417_v35 = vsel %vm416_vm9, %v2287_v19, %v413_v31  ;;  %v435_v38 = vadd.f32 %v2289_v21, %v434_v33  ;;  %v2944_v19 = vld [vmem:[#allocation6 + $0x120] sm:$0xff] }
  0xe7   :  { %v422_v40 = vsel %vm419_vm11, %v421_v36, %v417_v35  ;;  %v459_v52 = vadd.f32 %v2291_v24, %v458_v48  ;;  %786 = vmatpush.msra.mxu0 %v2944_v19  ;;  %v2964_v33 = vld [vmem:[#allocation6 + $0x40] sm:$0xff] }
  0xe8   :  { %v439_v42 = vsel %vm438_vm13, %v2289_v21, %v435_v38  ;;  %v471_v50 = vmul.f32 %v2293_v46, %v422_v40  ;;  %v2947_v21 = vld [vmem:[#allocation6 + $0x100] sm:$0xff]  ;;  %3771 = vst [vmem:[#allocation21_spill] sm:$0xff] %v2964_v33 }
  0xe9   :  { %v444_v47 = vsel %vm441_vm14, %v443_v41, %v439_v42  ;;  %v463_v59 = vsel %vm462_vm4, %v2291_v24, %v459_v52  ;;  %787 = vmatpush.msra.mxu0 %v2947_v21  ;;  %v2970_v36 = vld [vmem:[#allocation6] sm:$0xff] }
  0xea   :  { %v470_v49 = vmul.f32 %v444_v47, %v247_v39  ;;  %v468_v62 = vsel %vm465_vm6, %v467_v60, %v463_v59 }
  0xeb   :  { %788 = vmatpush.msra.mxu0 %v2950_v22 }
  0xec   :  { %v472_v51 = vadd.f32 %v471_v50, %v470_v49 }
  0xed   :  { %789 = vmatpush.msra.mxu0 %v2953_v23 }
  0xee   :  { %2294 = vtanh.f32 %v472_v51  ;;  %475 = vst [vmem:[#allocation3] sm:$0x3] %v472_v51 }
  0xef   :  { %790 = vmatpush.msra.mxu0 %v2956_v26 }
  0xf1   :  { %791 = vmatpush.msra.mxu0 %v2959_v29 }
  0xf3   :  { %792 = vmatpush.msra.mxu0 %v2962_v32 }
  0xf4   :  { %v2295_v61 = vpop.eup %2294 }
  0xf5   :  { %v474_v63 = vmul.f32 %v2295_v61, %v468_v62  ;;  %793 = vmatpush.msra.mxu0 %v2964_v33 }
  0xf7   :  { %476 = vst [vmem:[#allocation2] sm:$0x3] %v474_v63  ;;  %794 = vmatpush.msra.mxu0 %v2967_v34 }
  0xf8   :  { %477 = vst [vmem:[#allocation5] sm:$0x3] %v474_v63 }
  0xf9   :  { %795 = vmatpush.msra.mxu0 %v2970_v36 }
  0xfe   :  { %v478_v2 = vld [vmem:[#allocation2] sm:$0x3] }
  0xff   :  { %562 = vmatmul.f32.vlgmr.msrb.gmra.mxu0 %v478_v2  ;;  %582 = vmatmul.f32.vlgmr.msra.gmra.mxu1 %v478_v2  ;;  %v2116_v5 = vld [vmem:[#allocation5] sm:$0x3] }
 0x100   :  { %602 = vmatmul.f32.vlgmr.msrb.gmra.mxu2 %v478_v2  ;;  %622 = vmatmul.f32.vlgmr.msra.gmra.mxu3 %v478_v2  ;;  %2152 = vst [vmem:[#allocation1] ss:$4 sm:$0xff] %v2116_v5 }
 0x17c   :  { %v583_v6 = vpop.f32.mrf.mxu1  ;;  %v563_v12 = vpop.f32.mrf.mxu0 }
 0x17d   :  { %v630_v7 = vrot.slane %v583_v6, 6 }
 0x17f   :  { %v633_v15 = vsel %vm195_vm5, %v563_v12, %v630_v7  ;;  %v479_v7 = vld [vmem:[#allocation3] sm:$0x3] }
 0x183   :  { %v603_v8 = vpop.f32.mrf.mxu2  ;;  %v623_v9 = vpop.f32.mrf.mxu3 }
 0x184   :  { %v631_v10 = vrot.slane %v603_v8, 4  ;;  %v632_v11 = vrot.slane %v623_v9, 2 }
 0x186   :  { %v634_v1 = vsel %vm197_vm2, %v631_v10, %v632_v11 }
 0x187   :  { %v635_v3 = vsel %vm80_vm0, %v633_v15, %v634_v1 }
 0x188   :  { %v637_v13 = vadd.f32 %v635_v3, %v206_v0 }
 0x18a   :  { %v2252_v16 = vmul.f32 -1.442695, %v637_v13  ;;  %v658_v17 = vrot.slane %v637_v13, 2  ;;  %v682_v18 = vrot.slane %v637_v13, 6  ;;  %v679_v40 = vrot.slane %v637_v13, 4 }
 0x18c   :  { %2296 = vpow2.f32 %v2252_v16  ;;  %v2253_v43 = vmul.f32 -1.442695, %v658_v17  ;;  %v2254_v20 = vmul.f32 -1.442695, %v682_v18 }
 0x18e   :  { %2298 = vpow2.f32 %v2253_v43 }
 0x18f   :  { %2300 = vpow2.f32 %v2254_v20 }
 0x192   :  { %v2297_v24 = vpop.eup %2296 }
 0x193   :  { %v641_v25 = vadd.f32 1.0, %v2297_v24 }
 0x194   :  { %v2299_v27 = vpop.eup %2298 }
 0x195   :  { %v2301_v28 = vpop.eup %2300  ;;  %2302 = vrcp.f32 %v641_v25  ;;  %v663_v30 = vadd.f32 1.0, %v2299_v27  ;;  %v653_v47 = vand.u32 2147483648, %v641_v25  ;;  %v651_v49 = vand.u32 2147483647, %v641_v25  ;;  %v2976_v27 = vld [vmem:[#allocation6 + $0x1e8] sm:$0xff] }
 0x196   :  { %v687_v31 = vadd.f32 1.0, %v2301_v28  ;;  %vm647_vm8 = vweird.f32 %v641_v25  ;;  %3773 = vst [vmem:[#allocation23_spill] sm:$0xff] %v2976_v27  ;;  %v2978_v28 = vld [vmem:[#allocation6 + $0x1f0] sm:$0xff]  ;;  %1034 = vmatpush.msra.mxu1 %v2976_v27 }
 0x197   :  { %2304 = vrcp.f32 %v663_v30  ;;  %v675_v52 = vand.u32 2147483648, %v663_v30  ;;  %v673_v58 = vand.u32 2147483647, %v663_v30  ;;  %v654_v60 = vor.u32 1.1754944e-38, %v653_v47  ;;  %3774 = vst [vmem:[#allocation24_spill] sm:$0xff] %v2978_v28  ;;  %1054 = vmatpush.msrb.mxu2 %v2978_v28  ;;  %v3002_v47 = vld [vmem:[#allocation6 + $0x1b0] sm:$0xff] }
 0x198   :  { %2306 = vrcp.f32 %v687_v31  ;;  %vm652_vm11 = vcmp.eq.f32.partialorder %v651_v49, 8.507059e+37  ;;  %vm669_vm12 = vweird.f32 %v663_v30  ;;  %v699_v0 = vand.u32 2147483648, %v687_v31 }
 0x199   :  { %2308 = vtanh.f32 %v679_v40  ;;  %v676_v2 = vor.u32 1.1754944e-38, %v675_v52  ;;  %vm674_vm14 = vcmp.eq.f32.partialorder %v673_v58, 8.507059e+37  ;;  %vm693_vm3 = vweird.f32 %v687_v31  ;;  %v3010_v52 = vld [vmem:[#allocation6 + $0x180] sm:$0xff]  ;;  %v3014_v58 = vld [vmem:[#allocation6 + $0x190] sm:$0xff] }
 0x19a   :  { %v697_v1 = vand.u32 2147483647, %v687_v31  ;;  %v700_v13 = vor.u32 1.1754944e-38, %v699_v0  ;;  %v3053_v0 = vld [vmem:[#allocation6 + $0x130] sm:$0xff] }
 0x19b   :  { %v2303_v35 = vpop.eup %2302 }
 0x19c   :  { %v643_v37 = vmul.f32 %v2303_v35, %v641_v25  ;;  %vm648_vm7 = vweird.f32 %v2303_v35  ;;  %vm698_vm6 = vcmp.eq.f32.partialorder %v697_v1, 8.507059e+37  ;;  %v2974_v25 = vld [vmem:[#allocation6 + $0x1e0] sm:$0xff]  ;;  %v3055_v1 = vld [vmem:[#allocation6 + $0x138] sm:$0xff] }
 0x19d   :  { %v2305_v38 = vpop.eup %2304  ;;  %vm649_vm9 = vmor %vm647_vm8, %vm648_vm7  ;;  %1014 = vmatpush.msrb.mxu0 %v2974_v25 }
 0x19e   :  { %v644_v39 = vsub.f32 1.0, %v643_v37  ;;  %v2307_v41 = vpop.eup %2306  ;;  %v665_v42 = vmul.f32 %v2305_v38, %v663_v30  ;;  %vm670_vm10 = vweird.f32 %v2305_v38  ;;  %v2982_v30 = vld [vmem:[#allocation6 + $0x1f8] sm:$0xff]  ;;  %v2990_v37 = vld [vmem:[#allocation6 + $0x1d0] sm:$0xff] }
 0x19f   :  { %v689_v48 = vmul.f32 %v2307_v41, %v687_v31  ;;  %vm671_vm13 = vmor %vm669_vm12, %vm670_vm10  ;;  %v2309_v6 = vpop.eup %2308  ;;  %vm694_vm15 = vweird.f32 %v2307_v41  ;;  %1074 = vmatpush.msra.mxu3 %v2982_v30  ;;  %v2986_v31 = vld [vmem:[#allocation6 + $0x1c0] sm:$0xff]  ;;  %1055 = vmatpush.msrb.mxu2 %v2990_v37 }
 0x1a0   :  { %v645_v46 = vmul.f32 %v2303_v35, %v644_v39  ;;  %v666_v50 = vsub.f32 1.0, %v665_v42  ;;  %vm695_vm4 = vmor %vm693_vm3, %vm694_vm15  ;;  %1015 = vmatpush.msrb.mxu0 %v2986_v31  ;;  %v2994_v39 = vld [vmem:[#allocation6 + $0x1d8] sm:$0xff]  ;;  %v2998_v42 = vld [vmem:[#allocation6 + $0x1a0] sm:$0xff] }
 0x1a1   :  { %v690_v61 = vsub.f32 1.0, %v689_v48  ;;  %3776 = vst [vmem:[#allocation26_spill] sm:$0xff] %v2994_v39  ;;  %1075 = vmatpush.msra.mxu3 %v2994_v39  ;;  %1056 = vmatpush.msrb.mxu2 %v3002_v47 }
 0x1a2   :  { %v646_v51 = vadd.f32 %v2303_v35, %v645_v46  ;;  %v667_v53 = vmul.f32 %v2305_v38, %v666_v50  ;;  %v3000_v46 = vld [vmem:[#allocation6 + $0x1a8] sm:$0xff]  ;;  %1016 = vmatpush.msrb.mxu0 %v2998_v42  ;;  %v3006_v50 = vld [vmem:[#allocation6 + $0x1b8] sm:$0xff] }
 0x1a3   :  { %v691_v9 = vmul.f32 %v2307_v41, %v690_v61  ;;  %1076 = vmatpush.msra.mxu3 %v3006_v50  ;;  %1057 = vmatpush.msrb.mxu2 %v3014_v58 }
 0x1a4   :  { %v650_v59 = vsel %vm649_vm9, %v2303_v35, %v646_v51  ;;  %v668_v62 = vadd.f32 %v2305_v38, %v667_v53  ;;  %v2988_v35 = vld [vmem:[#allocation6 + $0x1c8] sm:$0xff]  ;;  %1017 = vmatpush.msrb.mxu0 %v3010_v52 }
 0x1a5   :  { %v655_v63 = vsel %vm652_vm11, %v654_v60, %v650_v59  ;;  %v692_v15 = vadd.f32 %v2307_v41, %v691_v9  ;;  %3775 = vst [vmem:[#allocation25_spill] sm:$0xff] %v2988_v35  ;;  %1035 = vmatpush.msra.mxu1 %v2988_v35  ;;  %v3012_v53 = vld [vmem:[#allocation6 + $0x188] sm:$0xff]  ;;  %v210_v60 = vrot.slane %v2907_v44, 4  ;;  %v3042_v9 = vld [vmem:[#allocation6 + $0x158] sm:$0xff] }
 0x1a6   :  { %v672_v5 = vsel %vm671_vm13, %v2305_v38, %v668_v62  ;;  %v704_v11 = vmul.f32 %v2309_v6, %v655_v63  ;;  %v3021_v62 = vld [vmem:[#allocation6 + $0x198] sm:$0xff]  ;;  %1018 = vmatpush.msrb.mxu0 %v2938_v4 }
 0x1a7   :  { %v677_v8 = vsel %vm674_vm14, %v676_v2, %v672_v5  ;;  %v696_v3 = vsel %vm695_vm4, %v2307_v41, %v692_v15  ;;  %1036 = vmatpush.msra.mxu1 %v3000_v46  ;;  %1077 = vmatpush.msra.mxu3 %v3021_v62  ;;  %v3026_v2 = vld [vmem:[#allocation6 + $0x168] sm:$0xff]  ;;  %v3028_v5 = vld [vmem:[#allocation6 + $0x170] sm:$0xff]  ;;  %v3030_v6 = vld [vmem:[#allocation6 + $0x178] sm:$0xff] }
 0x1a8   :  { %v703_v10 = vmul.f32 %v677_v8, %v479_v7  ;;  %v701_v17 = vsel %vm698_vm6, %v700_v13, %v696_v3  ;;  %1058 = vmatpush.msrb.mxu2 %v3028_v5  ;;  %v3038_v7 = vld [vmem:[#allocation6 + $0x148] sm:$0xff]  ;;  %v3040_v8 = vld [vmem:[#allocation6 + $0x150] sm:$0xff]  ;;  %1019 = vmatpush.msrb.mxu0 %v2941_v14 }
 0x1a9   :  { %1037 = vmatpush.msra.mxu1 %v3012_v53  ;;  %1078 = vmatpush.msra.mxu3 %v3030_v6  ;;  %v3051_v15 = vld [vmem:[#allocation6 + $0x128] sm:$0xff] }
 0x1aa   :  { %v705_v12 = vadd.f32 %v704_v11, %v703_v10  ;;  %1059 = vmatpush.msrb.mxu2 %v3040_v8  ;;  %1020 = vmatpush.msrb.mxu0 %v2944_v19 }
 0x1ab   :  { %1038 = vmatpush.msra.mxu1 %v3026_v2  ;;  %1079 = vmatpush.msra.mxu3 %v3042_v9 }
 0x1ac   :  { %2310 = vtanh.f32 %v705_v12  ;;  %708 = vst [vmem:[#allocation3] sm:$0x3] %v705_v12  ;;  %1060 = vmatpush.msrb.mxu2 %v3053_v0  ;;  %1021 = vmatpush.msrb.mxu0 %v2947_v21 }
 0x1ad   :  { %1039 = vmatpush.msra.mxu1 %v3038_v7  ;;  %1080 = vmatpush.msra.mxu3 %v3055_v1 }
 0x1ae   :  { %1022 = vmatpush.msrb.mxu0 %v2950_v22 }
 0x1af   :  { %1040 = vmatpush.msra.mxu1 %v3051_v15 }
 0x1b0   :  { %1023 = vmatpush.msrb.mxu0 %v2953_v23 }
 0x1b2   :  { %v2311_v16 = vpop.eup %2310  ;;  %1024 = vmatpush.msrb.mxu0 %v2956_v26 }
 0x1b3   :  { %v707_v18 = vmul.f32 %v2311_v16, %v701_v17  ;;  %v3061_v16 = vld [vmem:[#allocation6 + $0x108] sm:$0xff]  ;;  %v3063_v17 = vld [vmem:[#allocation6 + $0x110] sm:$0xff] }
 0x1b4   :  { %1041 = vmatpush.msra.mxu1 %v3061_v16  ;;  %1061 = vmatpush.msrb.mxu2 %v3063_v17 }
 0x1b5   :  { %709 = vst [vmem:[#allocation2] sm:$0x3] %v707_v18  ;;  %1025 = vmatpush.msrb.mxu0 %v2959_v29 }
 0x1b6   :  { %711 = vst [vmem:[#allocation5 + $0x2] sm:$0x3] %v707_v18  ;;  %v3065_v18 = vld [vmem:[#allocation6 + $0x118] sm:$0xff] }
 0x1b7   :  { %1081 = vmatpush.msra.mxu3 %v3065_v18  ;;  %1026 = vmatpush.msrb.mxu0 %v2962_v32 }
 0x1b9   :  { %1027 = vmatpush.msrb.mxu0 %v2964_v33  ;;  %v3151_v33 = vld [vmem:[#allocation6 + $0x10] sm:$0xff] }
 0x1ba   :  { %3788 = vst [vmem:[#allocation38_spill] sm:$0xff] %v3151_v33 }
 0x1bb   :  { %1028 = vmatpush.msrb.mxu0 %v2967_v34 }
 0x1bc   :  { %v712_v43 = vld [vmem:[#allocation2] sm:$0x3] }
 0x1bd   :  { %796 = vmatmul.f32.vlgmr.msra.gmra.mxu0 %v712_v43  ;;  %816 = vmatmul.f32.vlgmr.msrb.gmra.mxu1 %v712_v43  ;;  %v2117_v20 = vld [vmem:[#allocation5 + $0x2] sm:$0x3] }
 0x1be   :  { %836 = vmatmul.f32.vlgmr.msra.gmra.mxu2 %v712_v43  ;;  %856 = vmatmul.f32.vlgmr.msrb.gmra.mxu3 %v712_v43  ;;  %2154 = vst [vmem:[#allocation1 + $0x1] ss:$4 sm:$0xff] %v2117_v20  ;;  %v3071_v43 = vld [vmem:[#allocation6 + $0xe8] sm:$0xff]  ;;  %v3073_v20 = vld [vmem:[#allocation6 + $0xf0] sm:$0xff] }
 0x1bf   :  { %1042 = vmatpush.msra.mxu1 %v3071_v43  ;;  %1062 = vmatpush.msrb.mxu2 %v3073_v20 }
 0x1c0   :  { %1029 = vmatpush.msrb.mxu0 %v2970_v36 }
 0x1c2   :  { %1248 = vmatpush.msra.mxu0 %v2974_v25 }
 0x1c4   :  { %1249 = vmatpush.msra.mxu0 %v2986_v31 }
 0x1c6   :  { %1250 = vmatpush.msra.mxu0 %v2998_v42 }
 0x1c8   :  { %1251 = vmatpush.msra.mxu0 %v3010_v52 }
 0x1ca   :  { %1252 = vmatpush.msra.mxu0 %v2938_v4 }
 0x1cc   :  { %1253 = vmatpush.msra.mxu0 %v2941_v14 }
 0x1ce   :  { %1254 = vmatpush.msra.mxu0 %v2944_v19 }
 0x1d0   :  { %1255 = vmatpush.msra.mxu0 %v2947_v21 }
 0x1d2   :  { %1256 = vmatpush.msra.mxu0 %v2950_v22 }
 0x1d4   :  { %1257 = vmatpush.msra.mxu0 %v2953_v23 }
 0x1d6   :  { %1258 = vmatpush.msra.mxu0 %v2956_v26  ;;  %v3795_v26 = vld [vmem:[#allocation30_spill] sm:$0xff] }
 0x1d8   :  { %1259 = vmatpush.msra.mxu0 %v2959_v29 }
 0x23a   :  { %v817_v24 = vpop.f32.mrf.mxu1  ;;  %v797_v51 = vpop.f32.mrf.mxu0 }
 0x23b   :  { %v864_v38 = vrot.slane %v817_v24, 6  ;;  %v3075_v24 = vld [vmem:[#allocation6 + $0xf8] sm:$0xff] }
 0x23c   :  { %1082 = vmatpush.msra.mxu3 %v3075_v24 }
 0x23d   :  { %v867_v59 = vsel %vm195_vm5, %v797_v51, %v864_v38  ;;  %v3081_v38 = vld [vmem:[#allocation6 + $0xc8] sm:$0xff] }
 0x23e   :  { %1043 = vmatpush.msra.mxu1 %v3081_v38  ;;  %v3093_v51 = vld [vmem:[#allocation6 + $0xa8] sm:$0xff] }
 0x240   :  { %1044 = vmatpush.msra.mxu1 %v3093_v51 }
 0x241   :  { %v837_v40 = vpop.f32.mrf.mxu2  ;;  %v857_v41 = vpop.f32.mrf.mxu3 }
 0x242   :  { %v865_v48 = vrot.slane %v837_v40, 4  ;;  %v866_v49 = vrot.slane %v857_v41, 2  ;;  %v3083_v40 = vld [vmem:[#allocation6 + $0xd0] sm:$0xff]  ;;  %v3085_v41 = vld [vmem:[#allocation6 + $0xd8] sm:$0xff] }
 0x243   :  { %1063 = vmatpush.msrb.mxu2 %v3083_v40  ;;  %1083 = vmatpush.msra.mxu3 %v3085_v41 }
 0x244   :  { %v868_v61 = vsel %vm197_vm2, %v865_v48, %v866_v49 }
 0x245   :  { %v869_v63 = vsel %vm80_vm0, %v867_v59, %v868_v61  ;;  %v3095_v59 = vld [vmem:[#allocation6 + $0xb0] sm:$0xff] }
 0x246   :  { %v3032_v44 = vadd.f32 %v869_v63, %v210_v60  ;;  %v3097_v60 = vld [vmem:[#allocation6 + $0xb8] sm:$0xff]  ;;  %1064 = vmatpush.msrb.mxu2 %v3095_v59 }
 0x247   :  { %1084 = vmatpush.msra.mxu3 %v3097_v60 }
 0x248   :  { %v2255_v10 = vmul.f32 -1.442695, %v3032_v44  ;;  %v892_v11 = vrot.slane %v3032_v44, 2  ;;  %v916_v12 = vrot.slane %v3032_v44, 6 }
 0x24a   :  { %2312 = vpow2.f32 %v2255_v10  ;;  %v2256_v3 = vmul.f32 -1.442695, %v892_v11  ;;  %v2257_v13 = vmul.f32 -1.442695, %v916_v12  ;;  %v3104_v10 = vld [vmem:[#allocation6 + $0x88] sm:$0xff]  ;;  %v3106_v11 = vld [vmem:[#allocation6 + $0x90] sm:$0xff] }
 0x24b   :  { %3777 = vst [vmem:[#allocation27_spill] sm:$0xff] %v3106_v11  ;;  %v3108_v12 = vld [vmem:[#allocation6 + $0x98] sm:$0xff]  ;;  %1045 = vmatpush.msra.mxu1 %v3104_v10  ;;  %1065 = vmatpush.msrb.mxu2 %v3106_v11 }
 0x24c   :  { %2314 = vpow2.f32 %v2256_v3  ;;  %3778 = vst [vmem:[#allocation28_spill] sm:$0xff] %v3108_v12  ;;  %1085 = vmatpush.msra.mxu3 %v3108_v12  ;;  %v3146_v12 = vld [vmem:[#allocation6 + $0x8] sm:$0xff] }
 0x24d   :  { %2316 = vpow2.f32 %v2257_v13  ;;  %1066 = vmatpush.msrb.mxu2 %v3120_v57  ;;  %3787 = vst [vmem:[#allocation37_spill] sm:$0xff] %v3146_v12 }
 0x24e   :  { %1086 = vmatpush.msra.mxu3 %v3122_v56 }
 0x250   :  { %v2313_v48 = vpop.eup %2312  ;;  %1087 = vmatpush.msra.mxu3 %v3131_v55  ;;  %v913_v55 = vrot.slane %v3032_v44, 4 }
 0x251   :  { %v3089_v49 = vadd.f32 1.0, %v2313_v48  ;;  %v3118_v48 = vld [vmem:[#allocation6 + $0x68] sm:$0xff] }
 0x252   :  { %v2315_v61 = vpop.eup %2314  ;;  %3779 = vst [vmem:[#allocation29_spill] sm:$0xff] %v3118_v48  ;;  %1046 = vmatpush.msra.mxu1 %v3118_v48  ;;  %v3142_v48 = vld [vmem:[#allocation6 + $0x38] sm:$0xff]  ;;  %v3791_v22 = vld [vmem:[#allocation27_spill] sm:$0xff] }
 0x253   :  { %v2317_v63 = vpop.eup %2316  ;;  %2318 = vrcp.f32 %v3089_v49  ;;  %v3110_v3 = vadd.f32 1.0, %v2315_v61  ;;  %v3127_v61 = vld [vmem:[#allocation6 + $0x48] sm:$0xff]  ;;  %3786 = vst [vmem:[#allocation36_spill] sm:$0xff] %v3142_v48  ;;  %1088 = vmatpush.msra.mxu3 %v3142_v48  ;;  %v887_v48 = vand.u32 2147483648, %v3089_v49  ;;  %v885_v44 = vand.u32 2147483647, %v3089_v49 }
 0x254   :  { %v3112_v13 = vadd.f32 1.0, %v2317_v63  ;;  %3782 = vst [vmem:[#allocation32_spill] sm:$0xff] %v3127_v61  ;;  %v3129_v63 = vld [vmem:[#allocation6 + $0x50] sm:$0xff]  ;;  %1047 = vmatpush.msra.mxu1 %v3127_v61  ;;  %v3153_v61 = vld [vmem:[#allocation6 + $0x18] sm:$0xff]  ;;  %vm881_vm8 = vweird.f32 %v3089_v49 }
 0x255   :  { %2320 = vrcp.f32 %v3110_v3  ;;  %3783 = vst [vmem:[#allocation33_spill] sm:$0xff] %v3129_v63  ;;  %1067 = vmatpush.msrb.mxu2 %v3129_v63  ;;  %1089 = vmatpush.msra.mxu3 %v3153_v61  ;;  %vm886_vm11 = vcmp.eq.f32.partialorder %v885_v44, 8.507059e+37  ;;  %vm903_vm12 = vweird.f32 %v3110_v3  ;;  %v3792_v23 = vld [vmem:[#allocation28_spill] sm:$0xff] }
 0x256   :  { %2322 = vrcp.f32 %v3112_v13  ;;  %1048 = vmatpush.msra.mxu1 %v3136_v54  ;;  %v933_v4 = vand.u32 2147483648, %v3112_v13  ;;  %vm927_vm3 = vweird.f32 %v3112_v13  ;;  %v931_v14 = vand.u32 2147483647, %v3112_v13 }
 0x257   :  { %1068 = vmatpush.msrb.mxu2 %v3140_v45  ;;  %1308 = vmatpush.msrb.mxu3 %v2982_v30  ;;  %2324 = vtanh.f32 %v913_v55 }
 0x258   :  { %1049 = vmatpush.msra.mxu1 %v3146_v12  ;;  %vm932_vm6 = vcmp.eq.f32.partialorder %v931_v14, 8.507059e+37 }
 0x259   :  { %v2319_v32 = vpop.eup %2318  ;;  %1069 = vmatpush.msrb.mxu2 %v3151_v33  ;;  %1309 = vmatpush.msrb.mxu3 %v2994_v39 }
 0x25a   :  { %v877_v57 = vmul.f32 %v2319_v32, %v3089_v49  ;;  %vm882_vm7 = vweird.f32 %v2319_v32  ;;  %1268 = vmatpush.msrb.mxu1 %v2976_v27  ;;  %v713_v27 = vld [vmem:[#allocation3] sm:$0x3] }
 0x25b   :  { %v2321_v56 = vpop.eup %2320  ;;  %1288 = vmatpush.msra.mxu2 %v2978_v28  ;;  %vm3178_vm9 = vmor %vm881_vm8, %vm882_vm7  ;;  %v907_v28 = vand.u32 2147483647, %v3110_v3  ;;  %1310 = vmatpush.msrb.mxu3 %v3006_v50 }
 0x25c   :  { %v878_v63 = vsub.f32 1.0, %v877_v57  ;;  %v3160_v11 = vpop.eup %2322  ;;  %v899_v54 = vmul.f32 %v2321_v56, %v3110_v3  ;;  %1269 = vmatpush.msrb.mxu1 %v2988_v35  ;;  %vm904_vm10 = vweird.f32 %v2321_v56  ;;  %v3799_v29 = vld [vmem:[#allocation33_spill] sm:$0xff] }
 0x25d   :  { %v923_v57 = vmul.f32 %v3160_v11, %v3112_v13  ;;  %1289 = vmatpush.msra.mxu2 %v2990_v37  ;;  %vm905_vm13 = vmor %vm903_vm12, %vm904_vm10  ;;  %vm908_vm14 = vcmp.eq.f32.partialorder %v907_v28, 8.507059e+37  ;;  %1311 = vmatpush.msrb.mxu3 %v3021_v62  ;;  %vm928_vm15 = vweird.f32 %v3160_v11  ;;  %v3793_v13 = vld [vmem:[#allocation20_spill] sm:$0xff] }
 0x25e   :  { %v879_v34 = vmul.f32 %v2319_v32, %v878_v63  ;;  %v900_v12 = vsub.f32 1.0, %v899_v54  ;;  %v909_v63 = vand.u32 2147483648, %v3110_v3  ;;  %1270 = vmatpush.msrb.mxu1 %v3000_v46  ;;  %vm929_vm4 = vmor %vm927_vm3, %vm928_vm15  ;;  %1260 = vmatpush.msra.mxu0 %v3793_v13 }
 0x25f   :  { %v924_v49 = vsub.f32 1.0, %v923_v57  ;;  %1290 = vmatpush.msra.mxu2 %v3002_v47  ;;  %1312 = vmatpush.msrb.mxu3 %v3030_v6 }
 0x260   :  { %v880_v33 = vadd.f32 %v2319_v32, %v879_v34  ;;  %v901_v54 = vmul.f32 %v2321_v56, %v900_v12  ;;  %v888_v34 = vor.u32 1.1754944e-38, %v887_v48  ;;  %v910_v39 = vor.u32 1.1754944e-38, %v909_v63  ;;  %1271 = vmatpush.msrb.mxu1 %v3012_v53  ;;  %v3794_v63 = vld [vmem:[#allocation29_spill] sm:$0xff] }
 0x261   :  { %1291 = vmatpush.msra.mxu2 %v3014_v58  ;;  %v925_v48 = vmul.f32 %v3160_v11, %v924_v49  ;;  %1313 = vmatpush.msrb.mxu3 %v3042_v9  ;;  %v3800_v49 = vld [vmem:[#allocation34_spill] sm:$0xff] }
 0x262   :  { %v884_v55 = vsel %vm3178_vm9, %v2319_v32, %v880_v33  ;;  %v902_v35 = vadd.f32 %v2321_v56, %v901_v54  ;;  %v2325_v33 = vpop.eup %2324  ;;  %1272 = vmatpush.msrb.mxu1 %v3026_v2  ;;  %v3796_v54 = vld [vmem:[#allocation31_spill] sm:$0xff] }
 0x263   :  { %v889_v12 = vsel %vm886_vm11, %v888_v34, %v884_v55  ;;  %1292 = vmatpush.msra.mxu2 %v3028_v5  ;;  %v926_v28 = vadd.f32 %v3160_v11, %v925_v48  ;;  %1314 = vmatpush.msrb.mxu3 %v3055_v1  ;;  %v3797_v55 = vld [vmem:[#allocation21_spill] sm:$0xff]  ;;  %v3798_v34 = vld [vmem:[#allocation32_spill] sm:$0xff] }
 0x264   :  { %v906_v32 = vsel %vm905_vm13, %v2321_v56, %v902_v35  ;;  %v938_v44 = vmul.f32 %v2325_v33, %v889_v12  ;;  %1273 = vmatpush.msrb.mxu1 %v3038_v7  ;;  %v934_v35 = vor.u32 1.1754944e-38, %v933_v4  ;;  %1261 = vmatpush.msra.mxu0 %v3797_v55  ;;  %v3801_v12 = vld [vmem:[#allocation22_spill] sm:$0xff]  ;;  %v3803_v33 = vld [vmem:[#allocation36_spill] sm:$0xff]  ;;  %v3804_v48 = vld [vmem:[#allocation37_spill] sm:$0xff] }
 0x265   :  { %v911_v3 = vsel %vm908_vm14, %v910_v39, %v906_v32  ;;  %1293 = vmatpush.msra.mxu2 %v3040_v8  ;;  %1315 = vmatpush.msrb.mxu3 %v3065_v18  ;;  %v930_v19 = vsel %vm929_vm4, %v3160_v11, %v926_v28  ;;  %v3802_v32 = vld [vmem:[#allocation35_spill] sm:$0xff]  ;;  %v3809_v28 = vld [vmem:[#allocation26_spill] sm:$0xff] }
 0x266   :  { %v937_v57 = vmul.f32 %v911_v3, %v713_v27  ;;  %1274 = vmatpush.msrb.mxu1 %v3051_v15  ;;  %v935_v39 = vsel %vm932_vm6, %v934_v35, %v930_v19  ;;  %1262 = vmatpush.msra.mxu0 %v3801_v12 }
 0x267   :  { %1294 = vmatpush.msra.mxu2 %v3053_v0  ;;  %1316 = vmatpush.msrb.mxu3 %v3075_v24 }
 0x268   :  { %v939_v56 = vadd.f32 %v938_v44, %v937_v57  ;;  %1275 = vmatpush.msrb.mxu1 %v3061_v16  ;;  %1263 = vmatpush.msra.mxu0 %v2970_v36  ;;  %v3805_v57 = vld [vmem:[#allocation38_spill] sm:$0xff]  ;;  %v3806_v44 = vld [vmem:[#allocation23_spill] sm:$0xff]  ;;  %v3808_v36 = vld [vmem:[#allocation25_spill] sm:$0xff] }
 0x269   :  { %1295 = vmatpush.msra.mxu2 %v3063_v17  ;;  %1317 = vmatpush.msrb.mxu3 %v3085_v41 }
 0x26a   :  { %2326 = vtanh.f32 %v939_v56  ;;  %942 = vst [vmem:[#allocation3] sm:$0x3] %v939_v56  ;;  %1276 = vmatpush.msrb.mxu1 %v3071_v43  ;;  %v3807_v56 = vld [vmem:[#allocation24_spill] sm:$0xff] }
 0x26b   :  { %1296 = vmatpush.msra.mxu2 %v3073_v20  ;;  %1318 = vmatpush.msrb.mxu3 %v3097_v60 }
 0x26c   :  { %1277 = vmatpush.msrb.mxu1 %v3081_v38 }
 0x26d   :  { %1297 = vmatpush.msra.mxu2 %v3083_v40  ;;  %1319 = vmatpush.msrb.mxu3 %v3792_v23 }
 0x26e   :  { %1278 = vmatpush.msrb.mxu1 %v3093_v51 }
 0x26f   :  { %1298 = vmatpush.msra.mxu2 %v3095_v59  ;;  %1320 = vmatpush.msrb.mxu3 %v3796_v54 }
 0x270   :  { %v2327_v21 = vpop.eup %2326  ;;  %1279 = vmatpush.msrb.mxu1 %v3104_v10 }
 0x271   :  { %v941_v11 = vmul.f32 %v2327_v21, %v935_v39  ;;  %1299 = vmatpush.msra.mxu2 %v3791_v22  ;;  %1321 = vmatpush.msrb.mxu3 %v3800_v49 }
 0x272   :  { %1280 = vmatpush.msrb.mxu1 %v3794_v63 }
 0x273   :  { %945 = vst [vmem:[#allocation5 + $0x4] sm:$0x3] %v941_v11  ;;  %1300 = vmatpush.msra.mxu2 %v3795_v26  ;;  %1322 = vmatpush.msrb.mxu3 %v3803_v33 }
 0x274   :  { %943 = vst [vmem:[#allocation2] sm:$0x3] %v941_v11  ;;  %1281 = vmatpush.msrb.mxu1 %v3798_v34 }
 0x275   :  { %1301 = vmatpush.msra.mxu2 %v3799_v29  ;;  %1323 = vmatpush.msrb.mxu3 %v3153_v61 }
 0x276   :  { %1282 = vmatpush.msrb.mxu1 %v3802_v32 }
 0x277   :  { %1302 = vmatpush.msra.mxu2 %v3140_v45 }
 0x278   :  { %1283 = vmatpush.msrb.mxu1 %v3804_v48 }
 0x279   :  { %1303 = vmatpush.msra.mxu2 %v3805_v57 }
 0x27a   :  { %v2118_v27 = vld [vmem:[#allocation5 + $0x4] sm:$0x3] }
 0x27b   :  { %v946_v3 = vld [vmem:[#allocation2] sm:$0x3]  ;;  %2156 = vst [vmem:[#allocation1 + $0x2] ss:$4 sm:$0xff] %v2118_v27 }
 0x27c   :  { %1030 = vmatmul.f32.vlgmr.msrb.gmra.mxu0 %v946_v3  ;;  %1050 = vmatmul.f32.vlgmr.msra.gmra.mxu1 %v946_v3 }
 0x27d   :  { %1070 = vmatmul.f32.vlgmr.msrb.gmra.mxu2 %v946_v3  ;;  %1090 = vmatmul.f32.vlgmr.msra.gmra.mxu3 %v946_v3 }
 0x27e   :  { %1482 = vmatpush.msrb.mxu0 %v2974_v25  ;;  %1502 = vmatpush.msra.mxu1 %v3806_v44 }
 0x27f   :  { %1522 = vmatpush.msrb.mxu2 %v3807_v56  ;;  %1542 = vmatpush.msra.mxu3 %v2982_v30 }
 0x280   :  { %1483 = vmatpush.msrb.mxu0 %v2986_v31  ;;  %1503 = vmatpush.msra.mxu1 %v3808_v36 }
 0x281   :  { %1523 = vmatpush.msrb.mxu2 %v2990_v37  ;;  %1543 = vmatpush.msra.mxu3 %v3809_v28 }
 0x282   :  { %1484 = vmatpush.msrb.mxu0 %v2998_v42  ;;  %1504 = vmatpush.msra.mxu1 %v3000_v46 }
 0x283   :  { %1524 = vmatpush.msrb.mxu2 %v3002_v47  ;;  %1544 = vmatpush.msra.mxu3 %v3006_v50 }
 0x284   :  { %1485 = vmatpush.msrb.mxu0 %v3010_v52  ;;  %1505 = vmatpush.msra.mxu1 %v3012_v53  ;;  %v3810_v52 = vld [vmem:[#allocation15_spill] sm:$0xff] }
 0x285   :  { %1525 = vmatpush.msrb.mxu2 %v3014_v58  ;;  %1545 = vmatpush.msra.mxu3 %v3021_v62  ;;  %v214_v53 = vrot.slane %v3810_v52, 6 }
 0x286   :  { %1506 = vmatpush.msra.mxu1 %v3026_v2 }
 0x287   :  { %1526 = vmatpush.msrb.mxu2 %v3028_v5  ;;  %1546 = vmatpush.msra.mxu3 %v3030_v6 }
 0x288   :  { %1507 = vmatpush.msra.mxu1 %v3038_v7 }
 0x289   :  { %1527 = vmatpush.msrb.mxu2 %v3040_v8  ;;  %1547 = vmatpush.msra.mxu3 %v3042_v9 }
 0x28a   :  { %1508 = vmatpush.msra.mxu1 %v3051_v15 }
 0x28b   :  { %1528 = vmatpush.msrb.mxu2 %v3053_v0  ;;  %1548 = vmatpush.msra.mxu3 %v3055_v1 }
 0x28c   :  { %1509 = vmatpush.msra.mxu1 %v3061_v16 }
 0x28d   :  { %1529 = vmatpush.msrb.mxu2 %v3063_v17  ;;  %1549 = vmatpush.msra.mxu3 %v3065_v18 }
 0x28e   :  { %1510 = vmatpush.msra.mxu1 %v3071_v43 }
 0x28f   :  { %1530 = vmatpush.msrb.mxu2 %v3073_v20  ;;  %1550 = vmatpush.msra.mxu3 %v3075_v24 }
 0x290   :  { %1511 = vmatpush.msra.mxu1 %v3081_v38 }
 0x291   :  { %1531 = vmatpush.msrb.mxu2 %v3083_v40  ;;  %1551 = vmatpush.msra.mxu3 %v3085_v41 }
 0x292   :  { %1512 = vmatpush.msra.mxu1 %v3093_v51 }
 0x293   :  { %1532 = vmatpush.msrb.mxu2 %v3095_v59  ;;  %1552 = vmatpush.msra.mxu3 %v3097_v60 }
 0x294   :  { %1513 = vmatpush.msra.mxu1 %v3104_v10 }
 0x295   :  { %1533 = vmatpush.msrb.mxu2 %v3791_v22  ;;  %1553 = vmatpush.msra.mxu3 %v3792_v23 }
 0x296   :  { %1514 = vmatpush.msra.mxu1 %v3794_v63 }
 0x297   :  { %1534 = vmatpush.msrb.mxu2 %v3795_v26  ;;  %1554 = vmatpush.msra.mxu3 %v3796_v54  ;;  %v947_v54 = vld [vmem:[#allocation3] sm:$0x3] }
 0x298   :  { %1515 = vmatpush.msra.mxu1 %v3798_v34 }
 0x299   :  { %1535 = vmatpush.msrb.mxu2 %v3799_v29  ;;  %1555 = vmatpush.msra.mxu3 %v3800_v49 }
 0x29a   :  { %1516 = vmatpush.msra.mxu1 %v3802_v32 }
 0x29b   :  { %1536 = vmatpush.msrb.mxu2 %v3140_v45  ;;  %1556 = vmatpush.msra.mxu3 %v3803_v33 }
 0x29c   :  { %1517 = vmatpush.msra.mxu1 %v3804_v48 }
 0x29d   :  { %1537 = vmatpush.msrb.mxu2 %v3805_v57  ;;  %1557 = vmatpush.msra.mxu3 %v3153_v61 }
 0x2f9   :  { %v1051_v25 = vpop.f32.mrf.mxu1  ;;  %v1031_v47 = vpop.f32.mrf.mxu0 }
 0x2fa   :  { %v1098_v30 = vrot.slane %v1051_v25, 6 }
 0x2fc   :  { %v1101_v50 = vsel %vm195_vm5, %v1031_v47, %v1098_v30 }
 0x300   :  { %v1071_v31 = vpop.f32.mrf.mxu2  ;;  %v1091_v37 = vpop.f32.mrf.mxu3 }
 0x301   :  { %v1099_v42 = vrot.slane %v1071_v31, 4  ;;  %v1100_v46 = vrot.slane %v1091_v37, 2 }
 0x303   :  { %v1102_v45 = vsel %vm197_vm2, %v1099_v42, %v1100_v46 }
 0x304   :  { %v1103_v58 = vsel %vm80_vm0, %v1101_v50, %v1102_v45  ;;  %v3311_v45 = vld [vmem:[#allocation6 + $0x160] sm:$0xff] }
 0x305   :  { %v1105_v62 = vadd.f32 %v1103_v58, %v214_v53  ;;  %v3811_v58 = vld [vmem:[#allocation16_spill] sm:$0xff]  ;;  %1486 = vmatpush.msrb.mxu0 %v3311_v45 }
 0x307   :  { %v2258_v2 = vmul.f32 -1.442695, %v1105_v62  ;;  %v1126_v5 = vrot.slane %v1105_v62, 2  ;;  %v1150_v6 = vrot.slane %v1105_v62, 6  ;;  %v1147_v38 = vrot.slane %v1105_v62, 4 }
 0x309   :  { %2328 = vpow2.f32 %v2258_v2  ;;  %v2259_v7 = vmul.f32 -1.442695, %v1126_v5  ;;  %v2260_v8 = vmul.f32 -1.442695, %v1150_v6  ;;  %v3315_v2 = vld [vmem:[#allocation6 + $0x140] sm:$0xff] }
 0x30a   :  { %1487 = vmatpush.msrb.mxu0 %v3315_v2 }
 0x30b   :  { %2330 = vpow2.f32 %v2259_v7 }
 0x30c   :  { %2332 = vpow2.f32 %v2260_v8  ;;  %v3318_v8 = vld [vmem:[#allocation6 + $0x120] sm:$0xff] }
 0x30d   :  { %1488 = vmatpush.msrb.mxu0 %v3318_v8 }
 0x30f   :  { %v2329_v9 = vpop.eup %2328 }
 0x310   :  { %v1109_v15 = vadd.f32 1.0, %v2329_v9 }
 0x311   :  { %v2331_v0 = vpop.eup %2330 }
 0x312   :  { %v2333_v1 = vpop.eup %2332  ;;  %2334 = vrcp.f32 %v1109_v15  ;;  %v1131_v16 = vadd.f32 1.0, %v2331_v0  ;;  %v1121_v59 = vand.u32 2147483648, %v1109_v15  ;;  %v1119_v10 = vand.u32 2147483647, %v1109_v15  ;;  %v3321_v0 = vld [vmem:[#allocation6 + $0x100] sm:$0xff] }
 0x313   :  { %v1155_v17 = vadd.f32 1.0, %v2333_v1  ;;  %vm1115_vm8 = vweird.f32 %v1109_v15  ;;  %1489 = vmatpush.msrb.mxu0 %v3321_v0  ;;  %v3324_v1 = vld [vmem:[#allocation6 + $0xe0] sm:$0xff] }
 0x314   :  { %2336 = vrcp.f32 %v1131_v16  ;;  %v1143_v14 = vand.u32 2147483648, %v1131_v16  ;;  %v1141_v35 = vand.u32 2147483647, %v1131_v16  ;;  %v1122_v39 = vor.u32 1.1754944e-38, %v1121_v59  ;;  %v3338_v59 = vld [vmem:[#allocation6 + $0x40] sm:$0xff] }
 0x315   :  { %2338 = vrcp.f32 %v1155_v17  ;;  %vm1120_vm11 = vcmp.eq.f32.partialorder %v1119_v10, 8.507059e+37  ;;  %vm1137_vm12 = vweird.f32 %v1131_v16  ;;  %v1167_v33 = vand.u32 2147483648, %v1155_v17  ;;  %1490 = vmatpush.msrb.mxu0 %v3324_v1  ;;  %3813 = vst [vmem:[#allocation28_spill] sm:$0xff] %v3338_v59 }
 0x316   :  { %2340 = vtanh.f32 %v1147_v38  ;;  %v1144_v13 = vor.u32 1.1754944e-38, %v1143_v14  ;;  %vm1142_vm14 = vcmp.eq.f32.partialorder %v1141_v35, 8.507059e+37  ;;  %vm1161_vm3 = vweird.f32 %v1155_v17  ;;  %v3333_v38 = vld [vmem:[#allocation6 + $0x80] sm:$0xff] }
 0x317   :  { %v1165_v27 = vand.u32 2147483647, %v1155_v17  ;;  %v1168_v48 = vor.u32 1.1754944e-38, %v1167_v33 }
 0x318   :  { %v2335_v18 = vpop.eup %2334 }
 0x319   :  { %v1111_v43 = vmul.f32 %v2335_v18, %v1109_v15  ;;  %vm1116_vm7 = vweird.f32 %v2335_v18  ;;  %vm1166_vm6 = vcmp.eq.f32.partialorder %v1165_v27, 8.507059e+37 }
 0x31a   :  { %v2337_v20 = vpop.eup %2336  ;;  %vm1117_vm9 = vmor %vm1115_vm8, %vm1116_vm7 }
 0x31b   :  { %v1112_v24 = vsub.f32 1.0, %v1111_v43  ;;  %v2339_v40 = vpop.eup %2338  ;;  %v1133_v41 = vmul.f32 %v2337_v20, %v1131_v16  ;;  %vm1138_vm10 = vweird.f32 %v2337_v20  ;;  %v3327_v16 = vld [vmem:[#allocation6 + $0xc0] sm:$0xff] }
 0x31c   :  { %v1157_v60 = vmul.f32 %v2339_v40, %v1155_v17  ;;  %vm1139_vm13 = vmor %vm1137_vm12, %vm1138_vm10  ;;  %v2341_v26 = vpop.eup %2340  ;;  %vm1162_vm15 = vweird.f32 %v2339_v40  ;;  %1491 = vmatpush.msrb.mxu0 %v3327_v16  ;;  %v3330_v43 = vld [vmem:[#allocation6 + $0xa0] sm:$0xff] }
 0x31d   :  { %v1113_v51 = vmul.f32 %v2335_v18, %v1112_v24  ;;  %v1134_v61 = vsub.f32 1.0, %v1133_v41  ;;  %vm1163_vm4 = vmor %vm1161_vm3, %vm1162_vm15 }
 0x31e   :  { %v1158_v11 = vsub.f32 1.0, %v1157_v60  ;;  %1492 = vmatpush.msrb.mxu0 %v3330_v43  ;;  %v3341_v60 = vld [vmem:[#allocation6 + $0x20] sm:$0xff] }
 0x31f   :  { %v1114_v4 = vadd.f32 %v2335_v18, %v1113_v51  ;;  %v1135_v19 = vmul.f32 %v2337_v20, %v1134_v61  ;;  %v3336_v51 = vld [vmem:[#allocation6 + $0x60] sm:$0xff]  ;;  %3814 = vst [vmem:[#allocation20_spill] sm:$0xff] %v3341_v60 }
 0x320   :  { %v1159_v34 = vmul.f32 %v2339_v40, %v1158_v11  ;;  %1493 = vmatpush.msrb.mxu0 %v3333_v38  ;;  %3812 = vst [vmem:[#allocation27_spill] sm:$0xff] %v3336_v51  ;;  %v3344_v61 = vld [vmem:[#allocation6] sm:$0xff] }
 0x321   :  { %v1118_v21 = vsel %vm1117_vm9, %v2335_v18, %v1114_v4  ;;  %v1136_v22 = vadd.f32 %v2337_v20, %v1135_v19 }
 0x322   :  { %v1123_v23 = vsel %vm1120_vm11, %v1122_v39, %v1118_v21  ;;  %v1160_v32 = vadd.f32 %v2339_v40, %v1159_v34  ;;  %1494 = vmatpush.msrb.mxu0 %v3336_v51 }
 0x323   :  { %v1140_v63 = vsel %vm1139_vm13, %v2337_v20, %v1136_v22  ;;  %v1172_v49 = vmul.f32 %v2341_v26, %v1123_v23 }
 0x324   :  { %v1145_v55 = vsel %vm1142_vm14, %v1144_v13, %v1140_v63  ;;  %v1164_v3 = vsel %vm1163_vm4, %v2339_v40, %v1160_v32  ;;  %1495 = vmatpush.msrb.mxu0 %v3338_v59 }
 0x325   :  { %v1171_v29 = vmul.f32 %v1145_v55, %v947_v54  ;;  %v1169_v44 = vsel %vm1166_vm6, %v1168_v48, %v1164_v3 }
 0x326   :  { %1496 = vmatpush.msrb.mxu0 %v3341_v60 }
 0x327   :  { %v1173_v12 = vadd.f32 %v1172_v49, %v1171_v29 }
 0x328   :  { %1497 = vmatpush.msrb.mxu0 %v3344_v61 }
 0x329   :  { %2342 = vtanh.f32 %v1173_v12  ;;  %1176 = vst [vmem:[#allocation3] sm:$0x3] %v1173_v12 }
 0x32f   :  { %v2343_v57 = vpop.eup %2342 }
 0x330   :  { %v1175_v56 = vmul.f32 %v2343_v57, %v1169_v44  ;;  %v1181_v57 = vld [vmem:[#allocation3] sm:$0x3] }
 0x332   :  { %1179 = vst [vmem:[#allocation5 + $0x6] sm:$0x3] %v1175_v56 }
 0x333   :  { %1177 = vst [vmem:[#allocation2] sm:$0x3] %v1175_v56 }
 0x339   :  { %v2119_v36 = vld [vmem:[#allocation5 + $0x6] sm:$0x3] }
 0x33a   :  { %v1180_v28 = vld [vmem:[#allocation2] sm:$0x3]  ;;  %2158 = vst [vmem:[#allocation1 + $0x3] ss:$4 sm:$0xff] %v2119_v36 }
 0x33b   :  { %1264 = vmatmul.f32.vlgmr.msra.gmra.mxu0 %v1180_v28  ;;  %1284 = vmatmul.f32.vlgmr.msrb.gmra.mxu1 %v1180_v28 }
 0x33c   :  { %1304 = vmatmul.f32.vlgmr.msra.gmra.mxu2 %v1180_v28  ;;  %1324 = vmatmul.f32.vlgmr.msrb.gmra.mxu3 %v1180_v28 }
 0x3b8   :  { %v1285_v25 = vpop.f32.mrf.mxu1  ;;  %v1265_v47 = vpop.f32.mrf.mxu0 }
 0x3b9   :  { %v1332_v30 = vrot.slane %v1285_v25, 6 }
 0x3bb   :  { %v1335_v50 = vsel %vm195_vm5, %v1265_v47, %v1332_v30 }
 0x3bf   :  { %v1305_v31 = vpop.f32.mrf.mxu2  ;;  %v1325_v37 = vpop.f32.mrf.mxu3 }
 0x3c0   :  { %v1333_v42 = vrot.slane %v1305_v31, 4  ;;  %v1334_v46 = vrot.slane %v1325_v37, 2 }
 0x3c2   :  { %v1336_v52 = vsel %vm197_vm2, %v1333_v42, %v1334_v46 }
 0x3c3   :  { %v1337_v53 = vsel %vm80_vm0, %v1335_v50, %v1336_v52 }
 0x3c4   :  { %v1339_v62 = vadd.f32 %v1337_v53, %v3811_v58 }
 0x3c6   :  { %v2261_v5 = vmul.f32 -1.442695, %v1339_v62  ;;  %v1360_v6 = vrot.slane %v1339_v62, 2  ;;  %v1384_v7 = vrot.slane %v1339_v62, 6  ;;  %v1381_v35 = vrot.slane %v1339_v62, 4 }
 0x3c8   :  { %2344 = vpow2.f32 %v2261_v5  ;;  %v2262_v9 = vmul.f32 -1.442695, %v1360_v6  ;;  %v2263_v15 = vmul.f32 -1.442695, %v1384_v7  ;;  %v3348_v5 = vld [vmem:[#allocation6 + $0x1e0] sm:$0xff]  ;;  %v3350_v6 = vld [vmem:[#allocation6 + $0x1e8] sm:$0xff] }
 0x3c9   :  { %v3352_v7 = vld [vmem:[#allocation6 + $0x1f0] sm:$0xff]  ;;  %1716 = vmatpush.msra.mxu0 %v3348_v5  ;;  %1736 = vmatpush.msrb.mxu1 %v3350_v6 }
 0x3ca   :  { %2346 = vpow2.f32 %v2262_v9  ;;  %v3356_v9 = vld [vmem:[#allocation6 + $0x1f8] sm:$0xff]  ;;  %1756 = vmatpush.msra.mxu2 %v3352_v7 }
 0x3cb   :  { %2348 = vpow2.f32 %v2263_v15  ;;  %1776 = vmatpush.msrb.mxu3 %v3356_v9  ;;  %v3360_v15 = vld [vmem:[#allocation6 + $0x1c0] sm:$0xff] }
 0x3cc   :  { %1717 = vmatpush.msra.mxu0 %v3360_v15 }
 0x3ce   :  { %v2345_v17 = vpop.eup %2344 }
 0x3cf   :  { %v1343_v18 = vadd.f32 1.0, %v2345_v17  ;;  %v3362_v17 = vld [vmem:[#allocation6 + $0x1c8] sm:$0xff] }
 0x3d0   :  { %v2347_v20 = vpop.eup %2346  ;;  %1737 = vmatpush.msrb.mxu1 %v3362_v17 }
 0x3d1   :  { %v2349_v24 = vpop.eup %2348  ;;  %2350 = vrcp.f32 %v1343_v18  ;;  %v1365_v40 = vadd.f32 1.0, %v2347_v20  ;;  %v1355_v22 = vand.u32 2147483648, %v1343_v18  ;;  %v1353_v13 = vand.u32 2147483647, %v1343_v18 }
 0x3d2   :  { %v1389_v41 = vadd.f32 1.0, %v2349_v24  ;;  %vm1349_vm8 = vweird.f32 %v1343_v18  ;;  %v3368_v24 = vld [vmem:[#allocation6 + $0x1d8] sm:$0xff] }
 0x3d3   :  { %2352 = vrcp.f32 %v1365_v40  ;;  %v1377_v54 = vand.u32 2147483648, %v1365_v40  ;;  %v1375_v34 = vand.u32 2147483647, %v1365_v40  ;;  %v1356_v49 = vor.u32 1.1754944e-38, %v1355_v22  ;;  %1777 = vmatpush.msrb.mxu3 %v3368_v24  ;;  %v3386_v22 = vld [vmem:[#allocation6 + $0x188] sm:$0xff] }
 0x3d4   :  { %2354 = vrcp.f32 %v1389_v41  ;;  %vm1354_vm11 = vcmp.eq.f32.partialorder %v1353_v13, 8.507059e+37  ;;  %vm1371_vm12 = vweird.f32 %v1365_v40  ;;  %v1401_v31 = vand.u32 2147483648, %v1389_v41 }
 0x3d5   :  { %2356 = vtanh.f32 %v1381_v35  ;;  %v1378_v27 = vor.u32 1.1754944e-38, %v1377_v54  ;;  %vm1376_vm14 = vcmp.eq.f32.partialorder %v1375_v34, 8.507059e+37  ;;  %vm1395_vm3 = vweird.f32 %v1389_v41 }
 0x3d6   :  { %v1399_v37 = vand.u32 2147483647, %v1389_v41  ;;  %v1402_v46 = vor.u32 1.1754944e-38, %v1401_v31  ;;  %v3435_v31 = vld [vmem:[#allocation6 + $0x108] sm:$0xff] }
 0x3d7   :  { %v2351_v10 = vpop.eup %2350 }
 0x3d8   :  { %v1345_v4 = vmul.f32 %v2351_v10, %v1343_v18  ;;  %vm1350_vm7 = vweird.f32 %v2351_v10  ;;  %vm1400_vm6 = vcmp.eq.f32.partialorder %v1399_v37, 8.507059e+37  ;;  %v3364_v18 = vld [vmem:[#allocation6 + $0x1d0] sm:$0xff] }
 0x3d9   :  { %v2353_v14 = vpop.eup %2352  ;;  %vm1351_vm9 = vmor %vm1349_vm8, %vm1350_vm7  ;;  %1757 = vmatpush.msra.mxu2 %v3364_v18  ;;  %v3437_v37 = vld [vmem:[#allocation6 + $0x110] sm:$0xff] }
 0x3da   :  { %v1346_v19 = vsub.f32 1.0, %v1345_v4  ;;  %v2355_v21 = vpop.eup %2354  ;;  %v1367_v39 = vmul.f32 %v2353_v14, %v1365_v40  ;;  %vm1372_vm10 = vweird.f32 %v2353_v14  ;;  %v3374_v4 = vld [vmem:[#allocation6 + $0x1a8] sm:$0xff] }
 0x3db   :  { %v1391_v23 = vmul.f32 %v2355_v21, %v1389_v41  ;;  %vm1373_vm13 = vmor %vm1371_vm12, %vm1372_vm10  ;;  %v2357_v48 = vpop.eup %2356  ;;  %vm1396_vm15 = vweird.f32 %v2355_v21  ;;  %1738 = vmatpush.msrb.mxu1 %v3374_v4 }
 0x3dc   :  { %v1347_v11 = vmul.f32 %v2351_v10, %v1346_v19  ;;  %v1368_v63 = vsub.f32 1.0, %v1367_v39  ;;  %vm1397_vm4 = vmor %vm1395_vm3, %vm1396_vm15 }
 0x3dd   :  { %v1392_v12 = vsub.f32 1.0, %v1391_v23  ;;  %v3388_v23 = vld [vmem:[#allocation6 + $0x190] sm:$0xff]  ;;  %1739 = vmatpush.msrb.mxu1 %v3386_v22 }
 0x3de   :  { %v1348_v26 = vadd.f32 %v2351_v10, %v1347_v11  ;;  %v1369_v55 = vmul.f32 %v2353_v14, %v1368_v63  ;;  %v3384_v11 = vld [vmem:[#allocation6 + $0x180] sm:$0xff]  ;;  %v3815_v63 = vld [vmem:[#allocation17_spill] sm:$0xff] }
 0x3df   :  { %v1393_v56 = vmul.f32 %v2355_v21, %v1392_v12  ;;  %v3404_v12 = vld [vmem:[#allocation6 + $0x178] sm:$0xff] }
 0x3e0   :  { %v1352_v29 = vsel %vm1351_vm9, %v2351_v10, %v1348_v26  ;;  %v1370_v32 = vadd.f32 %v2353_v14, %v1369_v55  ;;  %v3372_v10 = vld [vmem:[#allocation6 + $0x1a0] sm:$0xff]  ;;  %v221_v26 = vrot.slane %v3815_v63, 2  ;;  %v3395_v55 = vld [vmem:[#allocation6 + $0x198] sm:$0xff]  ;;  %v3480_v63 = vld [vmem:[#allocation6 + $0x90] sm:$0xff] }
 0x3e1   :  { %v1357_v33 = vsel %vm1354_vm11, %v1356_v49, %v1352_v29  ;;  %v1394_v30 = vadd.f32 %v2355_v21, %v1393_v56  ;;  %1718 = vmatpush.msra.mxu0 %v3372_v10  ;;  %v3400_v29 = vld [vmem:[#allocation6 + $0x168] sm:$0xff]  ;;  %v3402_v49 = vld [vmem:[#allocation6 + $0x170] sm:$0xff]  ;;  %3816 = vst [vmem:[#allocation29_spill] sm:$0xff] %v3480_v63 }
 0x3e2   :  { %v1374_v3 = vsel %vm1373_vm13, %v2353_v14, %v1370_v32  ;;  %v1406_v28 = vmul.f32 %v2357_v48, %v1357_v33  ;;  %v3376_v14 = vld [vmem:[#allocation6 + $0x1b0] sm:$0xff]  ;;  %1740 = vmatpush.msrb.mxu1 %v3400_v29  ;;  %v3412_v33 = vld [vmem:[#allocation6 + $0x148] sm:$0xff] }
 0x3e3   :  { %v1379_v44 = vsel %vm1376_vm14, %v1378_v27, %v1374_v3  ;;  %v1398_v42 = vsel %vm1397_vm4, %v2355_v21, %v1394_v30  ;;  %v3380_v21 = vld [vmem:[#allocation6 + $0x1b8] sm:$0xff]  ;;  %1758 = vmatpush.msra.mxu2 %v3376_v14  ;;  %1719 = vmatpush.msra.mxu0 %v3384_v11  ;;  %v3414_v27 = vld [vmem:[#allocation6 + $0x150] sm:$0xff]  ;;  %v3425_v56 = vld [vmem:[#allocation6 + $0x128] sm:$0xff] }
 0x3e4   :  { %v1405_v36 = vmul.f32 %v1379_v44, %v1181_v57  ;;  %v1403_v50 = vsel %vm1400_vm6, %v1402_v46, %v1398_v42  ;;  %1778 = vmatpush.msrb.mxu3 %v3380_v21  ;;  %v3416_v3 = vld [vmem:[#allocation6 + $0x158] sm:$0xff]  ;;  %1741 = vmatpush.msrb.mxu1 %v3412_v33  ;;  %v3445_v46 = vld [vmem:[#allocation6 + $0xe8] sm:$0xff] }
 0x3e5   :  { %1759 = vmatpush.msra.mxu2 %v3388_v23  ;;  %1720 = vmatpush.msra.mxu0 %v3311_v45  ;;  %v3439_v42 = vld [vmem:[#allocation6 + $0x118] sm:$0xff] }
 0x3e6   :  { %v1407_v25 = vadd.f32 %v1406_v28, %v1405_v36  ;;  %1779 = vmatpush.msrb.mxu3 %v3395_v55  ;;  %v3427_v36 = vld [vmem:[#allocation6 + $0x130] sm:$0xff]  ;;  %v3429_v28 = vld [vmem:[#allocation6 + $0x138] sm:$0xff]  ;;  %1742 = vmatpush.msrb.mxu1 %v3425_v56 }
 0x3e7   :  { %1760 = vmatpush.msra.mxu2 %v3402_v49  ;;  %1721 = vmatpush.msra.mxu0 %v3315_v2 }
 0x3e8   :  { %2358 = vtanh.f32 %v1407_v25  ;;  %1410 = vst [vmem:[#allocation3] sm:$0x3] %v1407_v25  ;;  %1780 = vmatpush.msrb.mxu3 %v3404_v12  ;;  %1743 = vmatpush.msrb.mxu1 %v3435_v31 }
 0x3e9   :  { %1761 = vmatpush.msra.mxu2 %v3414_v27  ;;  %1722 = vmatpush.msra.mxu0 %v3318_v8 }
 0x3ea   :  { %1781 = vmatpush.msrb.mxu3 %v3416_v3  ;;  %1744 = vmatpush.msrb.mxu1 %v3445_v46 }
 0x3eb   :  { %1762 = vmatpush.msra.mxu2 %v3427_v36  ;;  %1723 = vmatpush.msra.mxu0 %v3321_v0 }
 0x3ec   :  { %1782 = vmatpush.msrb.mxu3 %v3429_v28 }
 0x3ed   :  { %1763 = vmatpush.msra.mxu2 %v3437_v37  ;;  %1724 = vmatpush.msra.mxu0 %v3324_v1 }
 0x3ee   :  { %v2359_v47 = vpop.eup %2358  ;;  %1783 = vmatpush.msrb.mxu3 %v3439_v42 }
 0x3ef   :  { %v1409_v52 = vmul.f32 %v2359_v47, %v1403_v50  ;;  %v3447_v47 = vld [vmem:[#allocation6 + $0xf0] sm:$0xff]  ;;  %v3449_v50 = vld [vmem:[#allocation6 + $0xf8] sm:$0xff]  ;;  %1725 = vmatpush.msra.mxu0 %v3327_v16 }
 0x3f0   :  { %1764 = vmatpush.msra.mxu2 %v3447_v47  ;;  %1784 = vmatpush.msrb.mxu3 %v3449_v50 }
 0x3f1   :  { %1413 = vst [vmem:[#allocation5 + $0x8] sm:$0x3] %v1409_v52  ;;  %1726 = vmatpush.msra.mxu0 %v3330_v43 }
 0x3f2   :  { %1411 = vst [vmem:[#allocation2] sm:$0x3] %v1409_v52  ;;  %v3455_v52 = vld [vmem:[#allocation6 + $0xc8] sm:$0xff] }
 0x3f3   :  { %1745 = vmatpush.msrb.mxu1 %v3455_v52  ;;  %1727 = vmatpush.msra.mxu0 %v3333_v38 }
 0x3f5   :  { %1728 = vmatpush.msra.mxu0 %v3336_v51 }
 0x3f7   :  { %1729 = vmatpush.msra.mxu0 %v3338_v59  ;;  %v3525_v59 = vld [vmem:[#allocation6 + $0x10] sm:$0xff] }
 0x3f8   :  { %v2120_v53 = vld [vmem:[#allocation5 + $0x8] sm:$0x3]  ;;  %3827 = vst [vmem:[#allocation38_spill] sm:$0xff] %v3525_v59 }
 0x3f9   :  { %v1414_v58 = vld [vmem:[#allocation2] sm:$0x3]  ;;  %2160 = vst [vmem:[#allocation1 + $0x20] ss:$4 sm:$0xff] %v2120_v53  ;;  %v3457_v53 = vld [vmem:[#allocation6 + $0xd0] sm:$0xff]  ;;  %1730 = vmatpush.msra.mxu0 %v3341_v60 }
 0x3fa   :  { %1498 = vmatmul.f32.vlgmr.msrb.gmra.mxu0 %v1414_v58  ;;  %1518 = vmatmul.f32.vlgmr.msra.gmra.mxu1 %v1414_v58 }
 0x3fb   :  { %1538 = vmatmul.f32.vlgmr.msrb.gmra.mxu2 %v1414_v58  ;;  %1558 = vmatmul.f32.vlgmr.msra.gmra.mxu3 %v1414_v58  ;;  %v3459_v58 = vld [vmem:[#allocation6 + $0xd8] sm:$0xff] }
 0x3fc   :  { %1765 = vmatpush.msra.mxu2 %v3457_v53  ;;  %1785 = vmatpush.msrb.mxu3 %v3459_v58 }
 0x3fd   :  { %1731 = vmatpush.msra.mxu0 %v3344_v61 }
 0x3ff   :  { %1950 = vmatpush.msrb.mxu0 %v3348_v5  ;;  %v2135_v5 = vld [vmem:[%s3714_s4 + $0x58] sm:$0xff] }
 0x401   :  { %1951 = vmatpush.msrb.mxu0 %v3360_v15 }
 0x403   :  { %1952 = vmatpush.msrb.mxu0 %v3372_v10  ;;  %v1415_v10 = vld [vmem:[#allocation3] sm:$0x3] }
 0x405   :  { %1953 = vmatpush.msrb.mxu0 %v3384_v11 }
 0x407   :  { %1954 = vmatpush.msrb.mxu0 %v3311_v45 }
 0x409   :  { %1955 = vmatpush.msrb.mxu0 %v3315_v2 }
 0x40b   :  { %1956 = vmatpush.msrb.mxu0 %v3318_v8 }
 0x40d   :  { %1957 = vmatpush.msrb.mxu0 %v3321_v0 }
 0x40f   :  { %1958 = vmatpush.msrb.mxu0 %v3324_v1  ;;  %v3830_v1 = vld [vmem:[#allocation29_spill] sm:$0xff] }
 0x411   :  { %1959 = vmatpush.msrb.mxu0 %v3327_v16 }
 0x413   :  { %1960 = vmatpush.msrb.mxu0 %v3330_v43 }
 0x415   :  { %1961 = vmatpush.msrb.mxu0 %v3333_v38 }
 0x477   :  { %v1519_v62 = vpop.f32.mrf.mxu1  ;;  %v1499_v39 = vpop.f32.mrf.mxu0 }
 0x478   :  { %v1566_v20 = vrot.slane %v1519_v62, 6 }
 0x47a   :  { %v1569_v13 = vsel %vm195_vm5, %v1499_v39, %v1566_v20 }
 0x47e   :  { %v1539_v40 = vpop.f32.mrf.mxu2  ;;  %v1559_v41 = vpop.f32.mrf.mxu3 }
 0x47f   :  { %v1567_v19 = vrot.slane %v1539_v40, 4  ;;  %v1568_v35 = vrot.slane %v1559_v41, 2  ;;  %v3467_v40 = vld [vmem:[#allocation6 + $0xa8] sm:$0xff]  ;;  %v3469_v41 = vld [vmem:[#allocation6 + $0xb0] sm:$0xff] }
 0x480   :  { %1746 = vmatpush.msrb.mxu1 %v3467_v40  ;;  %1766 = vmatpush.msra.mxu2 %v3469_v41 }
 0x481   :  { %v1570_v54 = vsel %vm197_vm2, %v1567_v19, %v1568_v35  ;;  %v3471_v19 = vld [vmem:[#allocation6 + $0xb8] sm:$0xff] }
 0x482   :  { %v1571_v34 = vsel %vm80_vm0, %v1569_v13, %v1570_v54  ;;  %1786 = vmatpush.msrb.mxu3 %v3471_v19  ;;  %v3478_v13 = vld [vmem:[#allocation6 + $0x88] sm:$0xff]  ;;  %1767 = vmatpush.msra.mxu2 %v3480_v63 }
 0x483   :  { %v3406_v32 = vadd.f32 %v1571_v34, %v221_v26  ;;  %v3482_v26 = vld [vmem:[#allocation6 + $0x98] sm:$0xff]  ;;  %1747 = vmatpush.msrb.mxu1 %v3478_v13 }
 0x484   :  { %3817 = vst [vmem:[#allocation30_spill] sm:$0xff] %v3482_v26  ;;  %1787 = vmatpush.msrb.mxu3 %v3482_v26  ;;  %v3520_v26 = vld [vmem:[#allocation6 + $0x8] sm:$0xff] }
 0x485   :  { %v2264_v48 = vmul.f32 -1.442695, %v3406_v32  ;;  %v1594_v57 = vrot.slane %v3406_v32, 2  ;;  %v1618_v44 = vrot.slane %v3406_v32, 6  ;;  %3826 = vst [vmem:[#allocation37_spill] sm:$0xff] %v3520_v26 }
 0x487   :  { %2360 = vpow2.f32 %v2264_v48  ;;  %v2265_v25 = vmul.f32 -1.442695, %v1594_v57  ;;  %v2266_v30 = vmul.f32 -1.442695, %v1618_v44  ;;  %v3492_v48 = vld [vmem:[#allocation6 + $0x68] sm:$0xff]  ;;  %v3494_v57 = vld [vmem:[#allocation6 + $0x70] sm:$0xff] }
 0x488   :  { %3818 = vst [vmem:[#allocation31_spill] sm:$0xff] %v3492_v48  ;;  %v3496_v44 = vld [vmem:[#allocation6 + $0x78] sm:$0xff]  ;;  %1748 = vmatpush.msrb.mxu1 %v3492_v48  ;;  %1768 = vmatpush.msra.mxu2 %v3494_v57 }
 0x489   :  { %2362 = vpow2.f32 %v2265_v25  ;;  %3819 = vst [vmem:[#allocation21_spill] sm:$0xff] %v3494_v57  ;;  %v3501_v25 = vld [vmem:[#allocation6 + $0x48] sm:$0xff]  ;;  %1788 = vmatpush.msrb.mxu3 %v3496_v44  ;;  %v3516_v48 = vld [vmem:[#allocation6 + $0x38] sm:$0xff] }
 0x48a   :  { %2364 = vpow2.f32 %v2266_v30  ;;  %3820 = vst [vmem:[#allocation32_spill] sm:$0xff] %v3496_v44  ;;  %v3503_v30 = vld [vmem:[#allocation6 + $0x50] sm:$0xff]  ;;  %1749 = vmatpush.msrb.mxu1 %v3501_v25 }
 0x48b   :  { %3821 = vst [vmem:[#allocation33_spill] sm:$0xff] %v3501_v25  ;;  %1769 = vmatpush.msra.mxu2 %v3503_v30  ;;  %v3527_v25 = vld [vmem:[#allocation6 + $0x18] sm:$0xff] }
 0x48c   :  { %3822 = vst [vmem:[#allocation34_spill] sm:$0xff] %v3503_v30  ;;  %v3831_v16 = vld [vmem:[#allocation30_spill] sm:$0xff] }
 0x48d   :  { %v2361_v62 = vpop.eup %2360  ;;  %3825 = vst [vmem:[#allocation36_spill] sm:$0xff] %v3516_v48 }
 0x48e   :  { %v3463_v20 = vadd.f32 1.0, %v2361_v62  ;;  %v3505_v62 = vld [vmem:[#allocation6 + $0x58] sm:$0xff] }
 0x48f   :  { %v2363_v35 = vpop.eup %2362  ;;  %3823 = vst [vmem:[#allocation22_spill] sm:$0xff] %v3505_v62  ;;  %1789 = vmatpush.msrb.mxu3 %v3505_v62  ;;  %v1615_v62 = vrot.slane %v3406_v32, 4 }
 0x490   :  { %v2365_v39 = vpop.eup %2364  ;;  %2366 = vrcp.f32 %v3463_v20  ;;  %v3484_v54 = vadd.f32 1.0, %v2363_v35  ;;  %v3510_v35 = vld [vmem:[#allocation6 + $0x28] sm:$0xff]  ;;  %v1587_v32 = vand.u32 2147483647, %v3463_v20  ;;  %vm1583_vm8 = vweird.f32 %v3463_v20  ;;  %v3834_v43 = vld [vmem:[#allocation21_spill] sm:$0xff] }
 0x491   :  { %v3486_v34 = vadd.f32 1.0, %v2365_v39  ;;  %3824 = vst [vmem:[#allocation35_spill] sm:$0xff] %v3510_v35  ;;  %v3514_v39 = vld [vmem:[#allocation6 + $0x30] sm:$0xff]  ;;  %1750 = vmatpush.msrb.mxu1 %v3510_v35  ;;  %1790 = vmatpush.msrb.mxu3 %v3516_v48  ;;  %v1589_v48 = vand.u32 2147483648, %v3463_v20 }
 0x492   :  { %2368 = vrcp.f32 %v3484_v54  ;;  %1770 = vmatpush.msra.mxu2 %v3514_v39  ;;  %vm1588_vm11 = vcmp.eq.f32.partialorder %v1587_v32, 8.507059e+37  ;;  %vm1605_vm12 = vweird.f32 %v3484_v54 }
 0x493   :  { %2370 = vrcp.f32 %v3486_v34  ;;  %1751 = vmatpush.msrb.mxu1 %v3520_v26  ;;  %1791 = vmatpush.msrb.mxu3 %v3527_v25  ;;  %v1635_v45 = vand.u32 2147483648, %v3486_v34  ;;  %vm1629_vm3 = vweird.f32 %v3486_v34  ;;  %v1633_v2 = vand.u32 2147483647, %v3486_v34  ;;  %v3838_v38 = vld [vmem:[#allocation34_spill] sm:$0xff] }
 0x494   :  { %1771 = vmatpush.msra.mxu2 %v3525_v59  ;;  %2372 = vtanh.f32 %v1615_v62 }
 0x495   :  { %1970 = vmatpush.msra.mxu1 %v3350_v6  ;;  %2010 = vmatpush.msra.mxu3 %v3356_v9  ;;  %v1590_v9 = vor.u32 1.1754944e-38, %v1589_v48  ;;  %vm1634_vm6 = vcmp.eq.f32.partialorder %v1633_v2, 8.507059e+37 }
 0x496   :  { %v2367_v51 = vpop.eup %2366  ;;  %1990 = vmatpush.msrb.mxu2 %v3352_v7  ;;  %v1609_v7 = vand.u32 2147483647, %v3484_v54 }
 0x497   :  { %v1579_v57 = vmul.f32 %v2367_v51, %v3463_v20  ;;  %vm1584_vm7 = vweird.f32 %v2367_v51  ;;  %1971 = vmatpush.msra.mxu1 %v3362_v17  ;;  %2011 = vmatpush.msra.mxu3 %v3368_v24 }
 0x498   :  { %v2369_v44 = vpop.eup %2368  ;;  %vm3552_vm9 = vmor %vm1583_vm8, %vm1584_vm7  ;;  %1991 = vmatpush.msrb.mxu2 %v3364_v18  ;;  %vm1610_vm14 = vcmp.eq.f32.partialorder %v1609_v7, 8.507059e+37 }
 0x499   :  { %v1580_v30 = vsub.f32 1.0, %v1579_v57  ;;  %v3534_v63 = vpop.eup %2370  ;;  %v1601_v35 = vmul.f32 %v2369_v44, %v3484_v54  ;;  %vm1606_vm10 = vweird.f32 %v2369_v44  ;;  %1972 = vmatpush.msra.mxu1 %v3374_v4  ;;  %2012 = vmatpush.msra.mxu3 %v3380_v21 }
 0x49a   :  { %v1625_v57 = vmul.f32 %v3534_v63, %v3486_v34  ;;  %1992 = vmatpush.msrb.mxu2 %v3376_v14  ;;  %vm1607_vm13 = vmor %vm1605_vm12, %vm1606_vm10  ;;  %vm1630_vm15 = vweird.f32 %v3534_v63  ;;  %v2139_v34 = vld [vmem:[%s3714_s4 + $0x78] sm:$0xff] }
 0x49b   :  { %v1581_v60 = vmul.f32 %v2367_v51, %v1580_v30  ;;  %v1602_v26 = vsub.f32 1.0, %v1601_v35  ;;  %v1611_v30 = vand.u32 2147483648, %v3484_v54  ;;  %1973 = vmatpush.msra.mxu1 %v3386_v22  ;;  %2013 = vmatpush.msra.mxu3 %v3395_v55  ;;  %vm1631_vm4 = vmor %vm1629_vm3, %vm1630_vm15 }
 0x49c   :  { %v1626_v15 = vsub.f32 1.0, %v1625_v57  ;;  %1993 = vmatpush.msrb.mxu2 %v3388_v23  ;;  %v1636_v23 = vor.u32 1.1754944e-38, %v1635_v45 }
 0x49d   :  { %v1582_v59 = vadd.f32 %v2367_v51, %v1581_v60  ;;  %v1603_v6 = vmul.f32 %v2369_v44, %v1602_v26  ;;  %v1612_v24 = vor.u32 1.1754944e-38, %v1611_v30  ;;  %1974 = vmatpush.msra.mxu1 %v3400_v29  ;;  %2014 = vmatpush.msra.mxu3 %v3404_v12  ;;  %v3833_v12 = vld [vmem:[#allocation31_spill] sm:$0xff] }
 0x49e   :  { %v1627_v14 = vmul.f32 %v3534_v63, %v1626_v15  ;;  %1994 = vmatpush.msrb.mxu2 %v3402_v49  ;;  %v3832_v49 = vld [vmem:[#allocation27_spill] sm:$0xff] }
 0x49f   :  { %v1586_v60 = vsel %vm3552_vm9, %v2367_v51, %v1582_v59  ;;  %v1604_v17 = vadd.f32 %v2369_v44, %v1603_v6  ;;  %v2373_v59 = vpop.eup %2372  ;;  %1975 = vmatpush.msra.mxu1 %v3412_v33  ;;  %2015 = vmatpush.msra.mxu3 %v3416_v3  ;;  %v3835_v33 = vld [vmem:[#allocation32_spill] sm:$0xff]  ;;  %v3837_v3 = vld [vmem:[#allocation33_spill] sm:$0xff]  ;;  %v2136_v30 = vld [vmem:[%s3714_s4 + $0x60] sm:$0xff] }
 0x4a0   :  { %v1591_v18 = vsel %vm1588_vm11, %v1590_v9, %v1586_v60  ;;  %1995 = vmatpush.msrb.mxu2 %v3414_v27  ;;  %v1628_v22 = vadd.f32 %v3534_v63, %v1627_v14  ;;  %1962 = vmatpush.msrb.mxu0 %v3832_v49  ;;  %v3836_v27 = vld [vmem:[#allocation28_spill] sm:$0xff]  ;;  %v2134_v6 = vld [vmem:[%s3714_s4 + $0x50] sm:$0xff] }
 0x4a1   :  { %v1608_v51 = vsel %vm1607_vm13, %v2369_v44, %v1604_v17  ;;  %v1640_v20 = vmul.f32 %v2373_v59, %v1591_v18  ;;  %1976 = vmatpush.msra.mxu1 %v3425_v56  ;;  %2016 = vmatpush.msra.mxu3 %v3429_v28  ;;  %v3839_v56 = vld [vmem:[#allocation22_spill] sm:$0xff]  ;;  %v3841_v28 = vld [vmem:[#allocation35_spill] sm:$0xff]  ;;  %v2138_v44 = vld [vmem:[%s3714_s4 + $0x70] sm:$0xff] }
 0x4a2   :  { %v1613_v4 = vsel %vm1610_vm14, %v1612_v24, %v1608_v51  ;;  %1996 = vmatpush.msrb.mxu2 %v3427_v36  ;;  %v1632_v8 = vsel %vm1631_vm4, %v3534_v63, %v1628_v22  ;;  %1963 = vmatpush.msrb.mxu0 %v3836_v27  ;;  %v3840_v36 = vld [vmem:[#allocation20_spill] sm:$0xff]  ;;  %v2132_v18 = vld [vmem:[%s3714_s4 + $0x40] sm:$0xff]  ;;  %v2131_v59 = vld [vmem:[%s3714_s4 + $0x38] sm:$0xff] }
 0x4a3   :  { %v1639_v21 = vmul.f32 %v1613_v4, %v1415_v10  ;;  %1977 = vmatpush.msra.mxu1 %v3435_v31  ;;  %2017 = vmatpush.msra.mxu3 %v3439_v42  ;;  %v1637_v55 = vsel %vm1634_vm6, %v1636_v23, %v1632_v8  ;;  %v3842_v31 = vld [vmem:[#allocation36_spill] sm:$0xff]  ;;  %v2130_v10 = vld [vmem:[%s3714_s4 + $0x30] sm:$0xff] }
 0x4a4   :  { %1997 = vmatpush.msrb.mxu2 %v3437_v37  ;;  %1964 = vmatpush.msrb.mxu0 %v3840_v36  ;;  %v2133_v9 = vld [vmem:[%s3714_s4 + $0x48] sm:$0xff] }
 0x4a5   :  { %v1641_v11 = vadd.f32 %v1640_v20, %v1639_v21  ;;  %1978 = vmatpush.msra.mxu1 %v3445_v46  ;;  %2018 = vmatpush.msra.mxu3 %v3449_v50  ;;  %v3843_v46 = vld [vmem:[#allocation37_spill] sm:$0xff]  ;;  %v2129_v4 = vld [vmem:[%s3714_s4 + $0x28] sm:$0xff]  ;;  %v2128_v21 = vld [vmem:[%s3714_s4 + $0x20] sm:$0xff] }
 0x4a6   :  { %1998 = vmatpush.msrb.mxu2 %v3447_v47  ;;  %1965 = vmatpush.msrb.mxu0 %v3344_v61  ;;  %v3844_v47 = vld [vmem:[#allocation38_spill] sm:$0xff] }
 0x4a7   :  { %2374 = vtanh.f32 %v1641_v11  ;;  %1644 = vst [vmem:[#allocation3] sm:$0x3] %v1641_v11  ;;  %1979 = vmatpush.msra.mxu1 %v3455_v52  ;;  %2019 = vmatpush.msra.mxu3 %v3459_v58 }
 0x4a8   :  { %1999 = vmatpush.msrb.mxu2 %v3457_v53 }
 0x4a9   :  { %1980 = vmatpush.msra.mxu1 %v3467_v40  ;;  %2020 = vmatpush.msra.mxu3 %v3471_v19 }
 0x4aa   :  { %2000 = vmatpush.msrb.mxu2 %v3469_v41 }
 0x4ab   :  { %1981 = vmatpush.msra.mxu1 %v3478_v13  ;;  %2021 = vmatpush.msra.mxu3 %v3831_v16  ;;  %v3845_v13 = vld [vmem:[#allocation18_spill] sm:$0xff] }
 0x4ac   :  { %2001 = vmatpush.msrb.mxu2 %v3830_v1  ;;  %v225_v63 = vrot.slane %v3845_v13, 4  ;;  %v2126_v1 = vld [vmem:[%s3714_s4 + $0x10] sm:$0xff] }
 0x4ad   :  { %v2375_v0 = vpop.eup %2374  ;;  %1982 = vmatpush.msra.mxu1 %v3833_v12  ;;  %2022 = vmatpush.msra.mxu3 %v3835_v33  ;;  %v2125_v33 = vld [vmem:[%s3714_s4 + $0x8] sm:$0xff] }
 0x4ae   :  { %v1643_v29 = vmul.f32 %v2375_v0, %v1637_v55  ;;  %2002 = vmatpush.msrb.mxu2 %v3834_v43 }
 0x4af   :  { %1983 = vmatpush.msra.mxu1 %v3837_v3  ;;  %2023 = vmatpush.msra.mxu3 %v3839_v56 }
 0x4b0   :  { %1647 = vst [vmem:[#allocation5 + $0xa] sm:$0x3] %v1643_v29  ;;  %2003 = vmatpush.msrb.mxu2 %v3838_v38 }
 0x4b1   :  { %1645 = vst [vmem:[#allocation2] sm:$0x3] %v1643_v29  ;;  %1984 = vmatpush.msra.mxu1 %v3841_v28  ;;  %2024 = vmatpush.msra.mxu3 %v3842_v31  ;;  %v2127_v29 = vld [vmem:[%s3714_s4 + $0x18] sm:$0xff]  ;;  %v2124_v28 = vld [vmem:[%s3714_s4] sm:$0xff] }
 0x4b2   :  { %2004 = vmatpush.msrb.mxu2 %v3514_v39  ;;  %v2137_v39 = vld [vmem:[%s3714_s4 + $0x68] sm:$0xff] }
 0x4b3   :  { %1985 = vmatpush.msra.mxu1 %v3843_v46  ;;  %2025 = vmatpush.msra.mxu3 %v3527_v25 }
 0x4b4   :  { %2005 = vmatpush.msrb.mxu2 %v3844_v47 }
 0x4b7   :  { %v2121_v37 = vld [vmem:[#allocation5 + $0xa] sm:$0x3] }
 0x4b8   :  { %v1648_v42 = vld [vmem:[#allocation2] sm:$0x3]  ;;  %2162 = vst [vmem:[#allocation1 + $0x21] ss:$4 sm:$0xff] %v2121_v37 }
 0x4b9   :  { %1732 = vmatmul.f32.vlgmr.msra.gmra.mxu0 %v1648_v42  ;;  %1752 = vmatmul.f32.vlgmr.msrb.gmra.mxu1 %v1648_v42 }
 0x4ba   :  { %1772 = vmatmul.f32.vlgmr.msra.gmra.mxu2 %v1648_v42  ;;  %1792 = vmatmul.f32.vlgmr.msrb.gmra.mxu3 %v1648_v42 }
 0x4bb   :  { %2171 = vmatpush.msra.mxu0 %v2139_v34 }
 0x4bd   :  { %2172 = vmatpush.msra.mxu0 %v2138_v44 }
 0x4bf   :  { %2173 = vmatpush.msra.mxu0 %v2137_v39 }
 0x4c1   :  { %2174 = vmatpush.msra.mxu0 %v2136_v30 }
 0x4c3   :  { %2175 = vmatpush.msra.mxu0 %v2135_v5 }
 0x4c5   :  { %2176 = vmatpush.msra.mxu0 %v2134_v6 }
 0x4c7   :  { %2177 = vmatpush.msra.mxu0 %v2133_v9 }
 0x4c9   :  { %2178 = vmatpush.msra.mxu0 %v2132_v18 }
 0x4cb   :  { %2179 = vmatpush.msra.mxu0 %v2131_v59 }
 0x4cd   :  { %2180 = vmatpush.msra.mxu0 %v2130_v10 }
 0x4cf   :  { %2181 = vmatpush.msra.mxu0 %v2129_v4 }
 0x4d1   :  { %2182 = vmatpush.msra.mxu0 %v2128_v21 }
 0x4d3   :  { %2183 = vmatpush.msra.mxu0 %v2127_v29 }
 0x4d5   :  { %2184 = vmatpush.msra.mxu0 %v2126_v1 }
 0x4d7   :  { %2185 = vmatpush.msra.mxu0 %v2125_v33 }
 0x4d9   :  { %2186 = vmatpush.msra.mxu0 %v2124_v28 }
 0x536   :  { %v1753_v50 = vpop.f32.mrf.mxu1  ;;  %v1733_v19 = vpop.f32.mrf.mxu0 }
 0x537   :  { %v1800_v52 = vrot.slane %v1753_v50, 6  ;;  %v1649_v50 = vld [vmem:[#allocation3] sm:$0x3] }
 0x539   :  { %v1803_v61 = vsel %vm195_vm5, %v1733_v19, %v1800_v52 }
 0x53d   :  { %v1773_v53 = vpop.f32.mrf.mxu2  ;;  %v1793_v58 = vpop.f32.mrf.mxu3 }
 0x53e   :  { %v1801_v40 = vrot.slane %v1773_v53, 4  ;;  %v1802_v41 = vrot.slane %v1793_v58, 2 }
 0x540   :  { %v1804_v26 = vsel %vm197_vm2, %v1801_v40, %v1802_v41 }
 0x541   :  { %v1805_v54 = vsel %vm80_vm0, %v1803_v61, %v1804_v26 }
 0x542   :  { %v1807_v48 = vadd.f32 %v1805_v54, %v225_v63 }
 0x544   :  { %v2267_v25 = vmul.f32 -1.442695, %v1807_v48  ;;  %v1828_v62 = vrot.slane %v1807_v48, 2  ;;  %v1852_v35 = vrot.slane %v1807_v48, 6  ;;  %v1849_v45 = vrot.slane %v1807_v48, 4 }
 0x546   :  { %2376 = vpow2.f32 %v2267_v25  ;;  %v2268_v57 = vmul.f32 -1.442695, %v1828_v62  ;;  %v2269_v32 = vmul.f32 -1.442695, %v1852_v35 }
 0x547   :  { %v2167_v62 = vld.sshfl [vmem:[#allocation1] sm:$0xff pattern:$0x73625140] }
 0x548   :  { %2378 = vpow2.f32 %v2268_v57  ;;  %v3688_v57 = vld [vmem:[%s3715_s5] ss:$0 sm:$0xff] }
 0x549   :  { %2380 = vpow2.f32 %v2269_v32 }
 0x54c   :  { %v2377_v7 = vpop.eup %2376 }
 0x54d   :  { %v1811_v60 = vadd.f32 1.0, %v2377_v7 }
 0x54e   :  { %v2379_v15 = vpop.eup %2378 }
 0x54f   :  { %v2381_v17 = vpop.eup %2380  ;;  %2382 = vrcp.f32 %v1811_v60  ;;  %v1833_v24 = vadd.f32 1.0, %v2379_v15  ;;  %v1823_v0 = vand.u32 2147483648, %v1811_v60  ;;  %v1821_v16 = vand.u32 2147483647, %v1811_v60 }
 0x550   :  { %v3654_v51 = vadd.f32 1.0, %v2381_v17  ;;  %vm1817_vm8 = vweird.f32 %v1811_v60  ;;  %v3846_v17 = vld [vmem:[#allocation19_spill] sm:$0xff] }
 0x551   :  { %2384 = vrcp.f32 %v1833_v24  ;;  %v1845_v43 = vand.u32 2147483648, %v1833_v24  ;;  %v1843_v3 = vand.u32 2147483647, %v1833_v24  ;;  %v1824_v56 = vor.u32 1.1754944e-38, %v1823_v0 }
 0x552   :  { %2386 = vrcp.f32 %v3654_v51  ;;  %vm1822_vm11 = vcmp.eq.f32.partialorder %v1821_v16, 8.507059e+37  ;;  %vm1839_vm12 = vweird.f32 %v1833_v24  ;;  %v1869_v61 = vand.u32 2147483648, %v3654_v51 }
 0x553   :  { %2388 = vtanh.f32 %v1849_v45  ;;  %v1846_v42 = vor.u32 1.1754944e-38, %v1845_v43  ;;  %vm1844_vm14 = vcmp.eq.f32.partialorder %v1843_v3, 8.507059e+37  ;;  %vm1863_vm3 = vweird.f32 %v3654_v51 }
 0x554   :  { %v1867_v13 = vand.u32 2147483647, %v3654_v51  ;;  %v1870_v26 = vor.u32 1.1754944e-38, %v1869_v61  ;;  %v229_v18 = vrot.slane %v3846_v17, 6 }
 0x555   :  { %v2383_v14 = vpop.eup %2382 }
 0x556   :  { %v1813_v20 = vmul.f32 %v2383_v14, %v1811_v60  ;;  %vm1818_vm7 = vweird.f32 %v2383_v14  ;;  %vm1868_vm6 = vcmp.eq.f32.partialorder %v1867_v13, 8.507059e+37 }
 0x557   :  { %v2385_v11 = vpop.eup %2384  ;;  %vm1819_vm9 = vmor %vm1817_vm8, %vm1818_vm7 }
 0x558   :  { %v1814_v22 = vsub.f32 1.0, %v1813_v20  ;;  %v2387_v2 = vpop.eup %2386  ;;  %v1835_v8 = vmul.f32 %v2385_v11, %v1833_v24  ;;  %vm1840_vm10 = vweird.f32 %v2385_v11 }
 0x559   :  { %v1859_v55 = vmul.f32 %v2387_v2, %v3654_v51  ;;  %vm1841_vm13 = vmor %vm1839_vm12, %vm1840_vm10  ;;  %v2389_v47 = vpop.eup %2388  ;;  %vm1864_vm15 = vweird.f32 %v2387_v2 }
 0x55a   :  { %v1815_v23 = vmul.f32 %v2383_v14, %v1814_v22  ;;  %v1836_v49 = vsub.f32 1.0, %v1835_v8  ;;  %vm1865_vm4 = vmor %vm1863_vm3, %vm1864_vm15 }
 0x55b   :  { %v1860_v36 = vsub.f32 1.0, %v1859_v55 }
 0x55c   :  { %v1816_v12 = vadd.f32 %v2383_v14, %v1815_v23  ;;  %v1837_v27 = vmul.f32 %v2385_v11, %v1836_v49 }
 0x55d   :  { %v1861_v53 = vmul.f32 %v2387_v2, %v1860_v36 }
 0x55e   :  { %v1820_v38 = vsel %vm1819_vm9, %v2383_v14, %v1816_v12  ;;  %v1838_v31 = vadd.f32 %v2385_v11, %v1837_v27 }
 0x55f   :  { %v1825_v37 = vsel %vm1822_vm11, %v1824_v56, %v1820_v38  ;;  %v1862_v19 = vadd.f32 %v2387_v2, %v1861_v53 }
 0x560   :  { %v1842_v46 = vsel %vm1841_vm13, %v2385_v11, %v1838_v31  ;;  %v1874_v40 = vmul.f32 %v2389_v47, %v1825_v37 }
 0x561   :  { %v1847_v52 = vsel %vm1844_vm14, %v1846_v42, %v1842_v46  ;;  %v1866_v63 = vsel %vm1865_vm4, %v2387_v2, %v1862_v19 }
 0x562   :  { %v1873_v58 = vmul.f32 %v1847_v52, %v1649_v50  ;;  %v1871_v34 = vsel %vm1868_vm6, %v1870_v26, %v1866_v63 }
 0x564   :  { %v1875_v41 = vadd.f32 %v1874_v40, %v1873_v58 }
 0x566   :  { %2390 = vtanh.f32 %v1875_v41  ;;  %1878 = vst [vmem:[#allocation3] sm:$0x3] %v1875_v41 }
 0x56c   :  { %v2391_v54 = vpop.eup %2390 }
 0x56d   :  { %v1877_v48 = vmul.f32 %v2391_v54, %v1871_v34  ;;  %v1883_v40 = vld [vmem:[#allocation3] sm:$0x3] }
 0x56f   :  { %1881 = vst [vmem:[#allocation5 + $0xc] sm:$0x3] %v1877_v48 }
 0x570   :  { %1879 = vst [vmem:[#allocation2] sm:$0x3] %v1877_v48 }
 0x576   :  { %v2122_v44 = vld [vmem:[#allocation5 + $0xc] sm:$0x3] }
 0x577   :  { %v1882_v25 = vld [vmem:[#allocation2] sm:$0x3]  ;;  %2164 = vst [vmem:[#allocation1 + $0x22] ss:$4 sm:$0xff] %v2122_v44 }
 0x578   :  { %1966 = vmatmul.f32.vlgmr.msrb.gmra.mxu0 %v1882_v25  ;;  %1986 = vmatmul.f32.vlgmr.msra.gmra.mxu1 %v1882_v25 }
 0x579   :  { %2006 = vmatmul.f32.vlgmr.msrb.gmra.mxu2 %v1882_v25  ;;  %2026 = vmatmul.f32.vlgmr.msra.gmra.mxu3 %v1882_v25 }
 0x580   :  { %2187 = vmatmul.f32.vlgmr.msra.gmra.mxu0 %v2167_v62 }
 0x5f5   :  { %v1967_v35 = vpop.f32.mrf.mxu0  ;;  %v1987_v39 = vpop.f32.mrf.mxu1 }
 0x5f6   :  { %v2034_v32 = vrot.slane %v1987_v39, 6 }
 0x5f8   :  { %v2037_v15 = vsel %vm195_vm5, %v1967_v35, %v2034_v32 }
 0x5fc   :  { %v2007_v30 = vpop.f32.mrf.mxu2  ;;  %v2027_v5 = vpop.f32.mrf.mxu3 }
 0x5fd   :  { %v2035_v6 = vrot.slane %v2007_v30, 4  ;;  %v2036_v7 = vrot.slane %v2027_v5, 2  ;;  %v2188_v60 = vpop.f32.mrf.mxu0 }
 0x5fe   :  { %v2189_v9 = vadd.f32 %v3688_v57, %v2188_v60 }
 0x5ff   :  { %v2038_v24 = vsel %vm197_vm2, %v2035_v6, %v2036_v7 }
 0x600   :  { %v2039_v51 = vsel %vm80_vm0, %v2037_v15, %v2038_v24  ;;  %2194 = vst.msk [vmem:[%s3716_s6] sm:$0xff] %vm73_vm1, %v2189_v9 }
 0x601   :  { %v2041_v59 = vadd.f32 %v2039_v51, %v229_v18 }
 0x603   :  { %v2270_v10 = vmul.f32 -1.442695, %v2041_v59  ;;  %v2062_v4 = vrot.slane %v2041_v59, 2  ;;  %v2086_v14 = vrot.slane %v2041_v59, 6  ;;  %v2083_v16 = vrot.slane %v2041_v59, 4 }
 0x605   :  { %2392 = vpow2.f32 %v2270_v10  ;;  %v2271_v21 = vmul.f32 -1.442695, %v2062_v4  ;;  %v2272_v20 = vmul.f32 -1.442695, %v2086_v14 }
 0x607   :  { %2394 = vpow2.f32 %v2271_v21 }
 0x608   :  { %2396 = vpow2.f32 %v2272_v20 }
 0x60b   :  { %v2393_v11 = vpop.eup %2392 }
 0x60c   :  { %v2045_v22 = vadd.f32 1.0, %v2393_v11 }
 0x60d   :  { %v2395_v45 = vpop.eup %2394 }
 0x60e   :  { %v2397_v2 = vpop.eup %2396  ;;  %2398 = vrcp.f32 %v2045_v22  ;;  %v2067_v8 = vadd.f32 1.0, %v2395_v45  ;;  %v2057_v33 = vand.u32 2147483648, %v2045_v22  ;;  %v2055_v3 = vand.u32 2147483647, %v2045_v22 }
 0x60f   :  { %v2091_v23 = vadd.f32 1.0, %v2397_v2  ;;  %vm2051_vm2 = vweird.f32 %v2045_v22 }
 0x610   :  { %2400 = vrcp.f32 %v2067_v8  ;;  %v2079_v36 = vand.u32 2147483648, %v2067_v8  ;;  %v2077_v31 = vand.u32 2147483647, %v2067_v8  ;;  %v2058_v42 = vor.u32 1.1754944e-38, %v2057_v33 }
 0x611   :  { %2402 = vrcp.f32 %v2091_v23  ;;  %vm2056_vm8 = vcmp.eq.f32.partialorder %v2055_v3, 8.507059e+37  ;;  %vm2073_vm9 = vweird.f32 %v2067_v8  ;;  %v2103_v54 = vand.u32 2147483648, %v2091_v23 }
 0x612   :  { %2404 = vtanh.f32 %v2083_v16  ;;  %v2080_v52 = vor.u32 1.1754944e-38, %v2079_v36  ;;  %vm2078_vm11 = vcmp.eq.f32.partialorder %v2077_v31, 8.507059e+37  ;;  %vm2097_vm13 = vweird.f32 %v2091_v23 }
 0x613   :  { %v2101_v34 = vand.u32 2147483647, %v2091_v23  ;;  %v2104_v44 = vor.u32 1.1754944e-38, %v2103_v54 }
 0x614   :  { %v2399_v0 = vpop.eup %2398 }
 0x615   :  { %v2047_v55 = vmul.f32 %v2399_v0, %v2045_v22  ;;  %vm2052_vm0 = vweird.f32 %v2399_v0  ;;  %vm2102_vm15 = vcmp.eq.f32.partialorder %v2101_v34, 8.507059e+37 }
 0x616   :  { %v2401_v29 = vpop.eup %2400  ;;  %vm2053_vm5 = vmor %vm2051_vm2, %vm2052_vm0 }
 0x617   :  { %v2048_v1 = vsub.f32 1.0, %v2047_v55  ;;  %v2403_v49 = vpop.eup %2402  ;;  %v2069_v12 = vmul.f32 %v2401_v29, %v2067_v8  ;;  %vm2074_vm7 = vweird.f32 %v2401_v29 }
 0x618   :  { %v2093_v27 = vmul.f32 %v2403_v49, %v2091_v23  ;;  %vm2075_vm10 = vmor %vm2073_vm9, %vm2074_vm7  ;;  %v2405_v58 = vpop.eup %2404  ;;  %vm2098_vm12 = vweird.f32 %v2403_v49 }
 0x619   :  { %v2049_v43 = vmul.f32 %v2399_v0, %v2048_v1  ;;  %v2070_v38 = vsub.f32 1.0, %v2069_v12  ;;  %vm2099_vm14 = vmor %vm2097_vm13, %vm2098_vm12 }
 0x61a   :  { %v2094_v46 = vsub.f32 1.0, %v2093_v27 }
 0x61b   :  { %v2050_v56 = vadd.f32 %v2399_v0, %v2049_v43  ;;  %v2071_v28 = vmul.f32 %v2401_v29, %v2070_v38 }
 0x61c   :  { %v2095_v19 = vmul.f32 %v2403_v49, %v2094_v46 }
 0x61d   :  { %v2054_v37 = vsel %vm2053_vm5, %v2399_v0, %v2050_v56  ;;  %v2072_v47 = vadd.f32 %v2401_v29, %v2071_v28 }
 0x61e   :  { %v2059_v50 = vsel %vm2056_vm8, %v2058_v42, %v2054_v37  ;;  %v2096_v26 = vadd.f32 %v2403_v49, %v2095_v19 }
 0x61f   :  { %v2076_v53 = vsel %vm2075_vm10, %v2401_v29, %v2072_v47  ;;  %v2108_v13 = vmul.f32 %v2405_v58, %v2059_v50 }
 0x620   :  { %v2081_v41 = vsel %vm2078_vm11, %v2080_v52, %v2076_v53  ;;  %v2100_v48 = vsel %vm2099_vm14, %v2403_v49, %v2096_v26 }
 0x621   :  { %v2107_v61 = vmul.f32 %v2081_v41, %v1883_v40  ;;  %v2105_v62 = vsel %vm2102_vm15, %v2104_v44, %v2100_v48 }
 0x623   :  { %v2109_v63 = vadd.f32 %v2108_v13, %v2107_v61 }
 0x625   :  { %2406 = vtanh.f32 %v2109_v63  ;;  %2112 = vst [vmem:[#allocation3] sm:$0x3] %v2109_v63 }
 0x62b   :  { %v2407_v25 = vpop.eup %2406 }
 0x62c   :  { %v2111_v35 = vmul.f32 %v2407_v25, %v2105_v62  ;;  %v2198_v39 = vld [vmem:[#allocation3] sm:$0x3] }
 0x62d   :  { %2199 = vst [vmem:[#allocation10] sm:$0x3] %v2198_v39 }
 0x62e   :  { %2115 = vst [vmem:[#allocation5 + $0xe] sm:$0x3] %v2111_v35  ;;  %2223 = dma.vmem_to_hbm [thread:$0]  %s2219_s10, 32, %s2221_s13, [#allocation11]  }
 0x62f   :  { %2113 = vst [vmem:[#allocation2] sm:$0x3] %v2111_v35 }
 0x635   :  { %v2123_v32 = vld [vmem:[#allocation5 + $0xe] sm:$0x3] }
 0x636   :  { %2166 = vst [vmem:[#allocation1 + $0x23] ss:$4 sm:$0xff] %v2123_v32  ;;  %v2196_v30 = vld [vmem:[#allocation2] sm:$0x3] }
 0x637   :  { %2197 = vst [vmem:[#allocation9] sm:$0x3] %v2196_v30 }
 0x638   :  { %2212 = dma.vmem_to_hbm [thread:$0]  %s2208_s27, 32, %s2210_s30, [#allocation8]  }
 0x63d   :  { %v2168_v5 = vld.sshfl [vmem:[#allocation1 + $0x20] sm:$0xff pattern:$0x73625140] }
 0x63e   :  { %2190 = vmatmul.f32.gmra.mxu0 %v2168_v5 }
 0x6bb   :  { %v2191_v6 = vpop.f32.mrf.mxu0 }
 0x6bc   :  { %v2192_v7 = vadd.f32 %v3688_v57, %v2191_v6 }
 0x6be   :  { %2195 = vst.msk [vmem:[%s3716_s6 + $0x8] sm:$0xff] %vm73_vm1, %v2192_v7 }
 0x6bf   :  { %2482 = dma.done.wait [#allocation8], 32  }
 0x6c0   :  { %2483 = vsyncadd [#allocation8], 4294967264 }
 0x6c1   :  { %2484 = dma.done.wait [#allocation11], 32  }
 0x6c2   :  { %2485 = vsyncadd [#allocation11], 4294967264 }
 0x6c3   :  { %2234 = vsyncpa [#allocation7], 1 }
 0x6c4   :  { %2235 = vsyncpa [#allocation8], 1 }
 0x6c5   :  { %2236 = vsyncpa [#allocation11], 1 }

</bundles_post_ra>
